<compile_context>
chip_gen: v5e
topology: v5e:2x2
jax: 0.10.0
libtpu: 0.0.40
codegen_flags: <defaults>
</compile_context>

<pallas_src>
import jax
import jax.numpy as jnp
from jax import lax
from jax.experimental import pallas as pl
from jax.experimental.pallas import tpu as pltpu

KSIZE = 5
PAD = 2
GN_GROUPS = 8
GN_EPS = 1e-5

# Row layout of the stacked per-lane parameter array (shape (17, W*C)).
_ROW_DWB, _ROW_GNW, _ROW_GNB = 0, 1, 2
_ROW_W1, _ROW_B1, _ROW_W2 = 3, 7, 11
_ROW_B2, _ROW_GAMMA = 15, 16
_NUM_VEC_ROWS = 17


def _ux_kernel(x_ref, m_ref, gsel_ref, gbc_ref, vecs_ref, out_ref, xpad_ref):
    _, D, H, WC = out_ref.shape
    Dp, Hp, _ = xpad_ref.shape
    DH = D * H

    # ---- stage x into the D/H zero-halo volume; zero only the thin halo slabs ----
    xpad_ref[0:PAD, :, :] = jnp.zeros((PAD, Hp, WC), jnp.float32)
    xpad_ref[PAD + D:Dp, :, :] = jnp.zeros((PAD, Hp, WC), jnp.float32)
    xpad_ref[PAD:PAD + D, 0:PAD, :] = jnp.zeros((D, PAD, WC), jnp.float32)
    xpad_ref[PAD:PAD + D, PAD + H:Hp, :] = jnp.zeros((D, PAD, WC), jnp.float32)
    xpad_ref[PAD:PAD + D, PAD:PAD + H, :] = x_ref[0]

    # ---- depthwise 5x5x5 conv (groups=C) as 25 MXU matmuls: the W shift AND the
    #      tap weight are folded into M[kd*5+kh]; LHS is the whole (D*H, WC) slab ----
    acc = None
    for kd in range(KSIZE):
        for kh in range(KSIZE):
            lhs = xpad_ref[kd:kd + D, kh:kh + H, :].reshape(DH, WC)
            part = jnp.dot(lhs, m_ref[kd * KSIZE + kh],
                           preferred_element_type=jnp.float32)
            acc = part if acc is None else acc + part
    ydw = acc + vecs_ref[_ROW_DWB:_ROW_DWB + 1, :]          # (DH, WC)

    # ---- GroupNorm(8, C): single pass for sum / sum-of-squares, group mixing via
    #      two skinny one-hot matmuls; var = E[y^2] - mean^2 (f32) ----
    stats = jnp.concatenate(
        [jnp.sum(ydw, axis=0, keepdims=True),
         jnp.sum(ydw * ydw, axis=0, keepdims=True)], axis=0)           # (2, WC)
    grp = jnp.dot(stats, gsel_ref[...], preferred_element_type=jnp.float32)   # (2, G)
    mom = jnp.dot(grp, gbc_ref[...], preferred_element_type=jnp.float32)      # (2, WC)
    mean = mom[0:1, :]
    var = mom[1:2, :] - mean * mean
    yn = (ydw - mean) * lax.rsqrt(var + GN_EPS)
    yn = yn * vecs_ref[_ROW_GNW:_ROW_GNW + 1, :] + vecs_ref[_ROW_GNB:_ROW_GNB + 1, :]

    # ---- pwconv1 (groups=C, 1->4) -> Hardswish -> pwconv2 (4->1), fused epilogue ----
    out2 = None
    for j in range(4):
        hpre = (yn * vecs_ref[_ROW_W1 + j:_ROW_W1 + j + 1, :]
                + vecs_ref[_ROW_B1 + j:_ROW_B1 + j + 1, :])
        hact = hpre * jnp.clip(hpre + 3.0, 0.0, 6.0) * (1.0 / 6.0)     # Hardswish
        t = hact * vecs_ref[_ROW_W2 + j:_ROW_W2 + j + 1, :]
        out2 = t if out2 is None else out2 + t
    out2 = out2 + vecs_ref[_ROW_B2:_ROW_B2 + 1, :]

    # ---- layer scale + residual (drop_path = Identity); re-read x from its block ----
    res = x_ref[0].reshape(DH, WC) + vecs_ref[_ROW_GAMMA:_ROW_GAMMA + 1, :] * out2
    out_ref[0] = res.reshape(D, H, WC)


def _make_dw_matrices(dw_w, W, C):
    """Combined shift-and-weight matrices M[kd*5+kh] with
    M[src_lane, dst_lane] = dw_w[c, kd, kh, kw] for src = dst + (kw-2)*C (same c),
    zero otherwise (also realises the conv zero padding along W)."""
    WC = W * C
    w = jnp.asarray(dw_w, jnp.float32).reshape(C, KSIZE, KSIZE, KSIZE)      # (c,kd,kh,kw)
    w_flat = jnp.transpose(w, (1, 2, 3, 0)).reshape(KSIZE * KSIZE, KSIZE, C)  # (kd*5+kh,kw,c)
    lanes = jnp.arange(WC)
    src = lanes[:, None]
    dst = lanes[None, :]
    same_c = (src % C) == (dst % C)
    kw_idx = (src // C) - (dst // C) + PAD
    valid = same_c & (kw_idx >= 0) & (kw_idx < KSIZE)
    kw_safe = jnp.clip(kw_idx, 0, KSIZE - 1)
    c_mat = jnp.broadcast_to(dst % C, (WC, WC))
    gathered = w_flat[:, kw_safe, c_mat]                                    # (25, WC, WC)
    return jnp.where(valid[None, :, :], gathered, 0.0)


def _make_groupnorm_matrices(D, H, W, C):
    """Skinny GroupNorm mixing: gsel (WC, G) scatter pre-scaled by 1/count,
    gbc (G, WC) broadcast-back."""
    WC = W * C
    gc = C // GN_GROUPS
    grp_of_lane = (jnp.arange(WC) % C) // gc
    onehot = (grp_of_lane[:, None] == jnp.arange(GN_GROUPS)[None, :]).astype(jnp.float32)
    count = float(gc * D * H * W)
    return onehot / count, onehot.T


def _pack_vecs(p, W):
    """Stack all per-channel parameters, tiled along the fused (W*C) lane axis
    (lane = w*C + c), into one (17, W*C) array."""
    C = int(p["dw_b"].shape[0])

    def lane(v):                                         # (C,) -> (1, W*C)
        return jnp.tile(jnp.asarray(v, jnp.float32).reshape(1, C), (1, W))

    w1 = jnp.tile(jnp.asarray(p["w1"], jnp.float32).reshape(C, 4).T, (1, W))  # (4, WC)
    b1 = jnp.tile(jnp.asarray(p["b1"], jnp.float32).reshape(C, 4).T, (1, W))
    w2 = jnp.tile(jnp.asarray(p["w2"], jnp.float32).T, (1, W))                # (4, WC)
    rows = [lane(p["dw_b"]), lane(p["gn_w"]), lane(p["gn_b"]),
            w1, b1, w2, lane(p["b2"]), lane(p["gamma"])]
    vecs = jnp.concatenate(rows, axis=0)
    assert vecs.shape[0] == _NUM_VEC_ROWS
    return vecs


def ux_block_forward(x, params):
    """ux_block forward. x: (N, D, H, W, C) float32 (NDHWC). Returns same shape."""
    N, D, H, W, C = x.shape
    assert C % GN_GROUPS == 0, "GroupNorm(8, dim) requires dim % 8 == 0"
    WC = W * C
    Dp, Hp = D + 2 * PAD, H + 2 * PAD

    xf = x.reshape(N, D, H, WC)                          # merge the two minor dims

    mmat = _make_dw_matrices(params["dw_w"], W, C)       # (25, WC, WC)
    gsel, gbc = _make_groupnorm_matrices(D, H, W, C)     # (WC, G), (G, WC)
    vecs = _pack_vecs(params, W)                         # (17, WC)
    kparams = (mmat, gsel, gbc, vecs)

    def const_spec(a):
        nd = a.ndim
        return pl.BlockSpec(a.shape, lambda n, _nd=nd: (0,) * _nd)

    in_specs = [pl.BlockSpec((1, D, H, WC), lambda n: (n, 0, 0, 0))]
    in_specs += [const_spec(a) for a in kparams]

    # Generation-aware VMEM budget: blocks + (double-buffered) params + scratch
    # + headroom, capped at the actual per-core VMEM capacity.
    f32 = 4
    block_bytes = 2 * 2 * D * H * WC * f32
    param_bytes = 2 * sum(int(a.size) for a in kparams) * f32
    scratch_bytes = Dp * Hp * WC * f32
    need = block_bytes + param_bytes + scratch_bytes + 8 * 1024 * 1024
    try:
        vmem_cap = int(pltpu.get_tpu_info().vmem_capacity_bytes)
    except Exception:
        vmem_cap = 64 * 1024 * 1024
    vmem_limit = int(min(vmem_cap, need))

    out = pl.pallas_call(
        _ux_kernel,
        out_shape=jax.ShapeDtypeStruct((N, D, H, WC), jnp.float32),
        grid_spec=pltpu.PrefetchScalarGridSpec(
            num_scalar_prefetch=0,
            grid=(N,),
            in_specs=in_specs,
            out_specs=pl.BlockSpec((1, D, H, WC), lambda n: (n, 0, 0, 0)),
            scratch_shapes=[
                pltpu.VMEM((Dp, Hp, WC), jnp.float32),   # D/H zero-halo staging
            ]),
        compiler_params=pltpu.CompilerParams(
            dimension_semantics=("parallel",),           # batch items independent
            vmem_limit_bytes=vmem_limit),
    )(xf, *kparams)
    return out.reshape(N, D, H, W, C)


def make_params(key, C, layer_scale=1e-6):
    """Deterministic synthetic parameters (shapes match the PyTorch module __init__)."""
    ks = jax.random.split(key, 8)
    return dict(
        dw_w=jax.random.normal(ks[0], (C, 1, KSIZE, KSIZE, KSIZE), jnp.float32) * 0.05,
        dw_b=jax.random.normal(ks[1], (C,), jnp.float32) * 0.05,
        gn_w=1.0 + 0.1 * jax.random.normal(ks[2], (C,), jnp.float32),
        gn_b=0.1 * jax.random.normal(ks[3], (C,), jnp.float32),
        w1=jax.random.normal(ks[4], (4 * C,), jnp.float32) * 0.2,    # pwconv1 (4C,1,1,1,1)
        b1=jax.random.normal(ks[5], (4 * C,), jnp.float32) * 0.05,
        w2=jax.random.normal(ks[6], (C, 4), jnp.float32) * 0.2,      # pwconv2 (C,4,1,1,1)
        b2=jax.random.normal(ks[7], (C,), jnp.float32) * 0.05,
        gamma=layer_scale * jnp.ones((C,), jnp.float32),             # (1,C,1,1,1) in torch
    )


def ref_forward(x, p):
    """Pure-JAX reference of ux_block.forward (channels-last NDHWC)."""
    N, D, H, W, C = x.shape
    dhwio = jnp.transpose(p["dw_w"], (2, 3, 4, 1, 0))                # (5,5,5,1,C)
    y = lax.conv_general_dilated(
        x, dhwio, window_strides=(1, 1, 1), padding="SAME",
        dimension_numbers=("NDHWC", "DHWIO", "NDHWC"),
        feature_group_count=C) + p["dw_b"]
    gc = C // GN_GROUPS
    yg = y.reshape(N, D, H, W, GN_GROUPS, gc)
    mean = yg.mean(axis=(1, 2, 3, 5), keepdims=True)
    var = ((yg - mean) ** 2).mean(axis=(1, 2, 3, 5), keepdims=True)
    yn = ((yg - mean) / jnp.sqrt(var + GN_EPS)).reshape(N, D, H, W, C)
    yn = yn * p["gn_w"] + p["gn_b"]
    w1 = p["w1"].reshape(C, 4)
    b1 = p["b1"].reshape(C, 4)
    out2 = jnp.zeros_like(yn)
    for j in range(4):
        h = yn * w1[:, j] + b1[:, j]
        h = h * jnp.clip(h + 3.0, 0.0, 6.0) / 6.0
        out2 = out2 + h * p["w2"][:, j]
    out2 = out2 + p["b2"]
    return x + p["gamma"] * out2


if __name__ == "__main__":
    # dim must be divisible by 8 (GroupNorm(8, dim)); W*C = 128 gives a lane-dense fused axis.
    N, C, D, H, W = 2, 16, 4, 8, 8
    key = jax.random.PRNGKey(0)
    kx, kp = jax.random.split(key)
    x = jax.random.normal(kx, (N, D, H, W, C), jnp.float32)          # layout: NDHWC

    # Strong numerical check with layer scale = 1.0 (the faithful 1e-6 scale would hide the
    # non-residual path below f32 resolution of the residual add).
    p_chk = make_params(kp, C, layer_scale=1.0)
    out_chk = jax.block_until_ready(ux_block_forward(x, p_chk))
    ref_chk = ref_forward(x, p_chk)
    err = float(jnp.max(jnp.abs(out_chk - ref_chk)))
    assert jnp.allclose(out_chk, ref_chk, rtol=1e-3, atol=1e-3), f"max abs diff = {err}"

    # Faithful module parameters: layer_scale_init_value = 1e-6 (module default).
    p = make_params(kp, C, layer_scale=1e-6)
    out = jax.block_until_ready(ux_block_forward(x, p))
    ref = ref_forward(x, p)
    assert jnp.allclose(out, ref, rtol=1e-5, atol=1e-5)

    print("KERNEL_OK")
</pallas_src>

<mosaic_0001>
module attributes {stable_mosaic.version = 11 : i64} {
  func.func @_ux_kernel(%arg0: i32, %arg1: memref<1x4x8x128xf32, #tpu.memory_space<vmem>>, %arg2: memref<25x128x128xf32, #tpu.memory_space<vmem>>, %arg3: memref<128x8xf32, #tpu.memory_space<vmem>>, %arg4: memref<8x128xf32, #tpu.memory_space<vmem>>, %arg5: memref<17x128xf32, #tpu.memory_space<vmem>>, %arg6: memref<1x4x8x128xf32, #tpu.memory_space<vmem>>, %arg7: memref<8x12x128xf32, #tpu.memory_space<vmem>>) attributes {dimension_semantics = [#tpu.dimension_semantics<parallel>], iteration_bounds = array<i64: 2>, scalar_prefetch = 0 : i64, scratch_operands = 1 : i64, tpu.core_type = #tpu.core_type<tc>, window_params = [{transform_indices = @transform_0, window_bounds = array<i64: 1, 4, 8, 128>}, {pipeline_mode = #tpu.pipeline_mode<synchronous>, transform_indices = @transform_1, window_bounds = array<i64: 25, 128, 128>}, {pipeline_mode = #tpu.pipeline_mode<synchronous>, transform_indices = @transform_2, window_bounds = array<i64: 128, 8>}, {pipeline_mode = #tpu.pipeline_mode<synchronous>, transform_indices = @transform_3, window_bounds = array<i64: 8, 128>}, {pipeline_mode = #tpu.pipeline_mode<synchronous>, transform_indices = @transform_4, window_bounds = array<i64: 17, 128>}, {transform_indices = @transform_5, window_bounds = array<i64: 1, 4, 8, 128>}]} {
    %cst = arith.constant 0.000000e+00 : f32
    %0 = vector.broadcast %cst : f32 to vector<2x12x128xf32>
    %c0 = arith.constant 0 : index
    %c0_0 = arith.constant 0 : index
    %c0_1 = arith.constant 0 : index
    %1 = vector.load %arg7[%c0, %c0_0, %c0_1] : memref<8x12x128xf32, #tpu.memory_space<vmem>>, vector<2x12x128xf32>
    tpu.vector_store %arg7[%c0, %c0_0, %c0_1], %0 {strides = array<i32>} : memref<8x12x128xf32, #tpu.memory_space<vmem>>, vector<2x12x128xf32>,
    %cst_2 = arith.constant 0.000000e+00 : f32
    %2 = vector.broadcast %cst_2 : f32 to vector<2x12x128xf32>
    %c6 = arith.constant 6 : index
    %c0_3 = arith.constant 0 : index
    %c0_4 = arith.constant 0 : index
    %3 = vector.load %arg7[%c6, %c0_3, %c0_4] : memref<8x12x128xf32, #tpu.memory_space<vmem>>, vector<2x12x128xf32>
    tpu.vector_store %arg7[%c6, %c0_3, %c0_4], %2 {strides = array<i32>} : memref<8x12x128xf32, #tpu.memory_space<vmem>>, vector<2x12x128xf32>,
    %cst_5 = arith.constant 0.000000e+00 : f32
    %4 = vector.broadcast %cst_5 : f32 to vector<4x2x128xf32>
    %c2 = arith.constant 2 : index
    %c0_6 = arith.constant 0 : index
    %c0_7 = arith.constant 0 : index
    %5 = vector.load %arg7[%c2, %c0_6, %c0_7] : memref<8x12x128xf32, #tpu.memory_space<vmem>>, vector<4x2x128xf32>
    tpu.vector_store %arg7[%c2, %c0_6, %c0_7], %4 {strides = array<i32>} : memref<8x12x128xf32, #tpu.memory_space<vmem>>, vector<4x2x128xf32>,
    %cst_8 = arith.constant 0.000000e+00 : f32
    %6 = vector.broadcast %cst_8 : f32 to vector<4x2x128xf32>
    %c2_9 = arith.constant 2 : index
    %c10 = arith.constant 10 : index
    %c0_10 = arith.constant 0 : index
    %7 = vector.load %arg7[%c2_9, %c10, %c0_10] : memref<8x12x128xf32, #tpu.memory_space<vmem>>, vector<4x2x128xf32>
    tpu.vector_store %arg7[%c2_9, %c10, %c0_10], %6 {strides = array<i32>} : memref<8x12x128xf32, #tpu.memory_space<vmem>>, vector<4x2x128xf32>,
    %c0_11 = arith.constant 0 : index
    %c0_12 = arith.constant 0 : index
    %c0_13 = arith.constant 0 : index
    %c0_14 = arith.constant 0 : index
    %8 = vector.load %arg1[%c0_11, %c0_12, %c0_13, %c0_14] : memref<1x4x8x128xf32, #tpu.memory_space<vmem>>, vector<1x4x8x128xf32>
    %9 = vector.shape_cast %8 : vector<1x4x8x128xf32> to vector<4x8x128xf32>
    %c2_15 = arith.constant 2 : index
    %c2_16 = arith.constant 2 : index
    %c0_17 = arith.constant 0 : index
    %10 = vector.load %arg7[%c2_15, %c2_16, %c0_17] : memref<8x12x128xf32, #tpu.memory_space<vmem>>, vector<4x8x128xf32>
    tpu.vector_store %arg7[%c2_15, %c2_16, %c0_17], %9 {strides = array<i32>} : memref<8x12x128xf32, #tpu.memory_space<vmem>>, vector<4x8x128xf32>,
    %c0_18 = arith.constant 0 : index
    %c0_19 = arith.constant 0 : index
    %c0_20 = arith.constant 0 : index
    %11 = vector.load %arg7[%c0_18, %c0_19, %c0_20] : memref<8x12x128xf32, #tpu.memory_space<vmem>>, vector<4x8x128xf32>
    %12 = vector.shape_cast %11 : vector<4x8x128xf32> to vector<32x128xf32>
    %c0_21 = arith.constant 0 : index
    %c0_22 = arith.constant 0 : index
    %c0_23 = arith.constant 0 : index
    %13 = vector.load %arg2[%c0_21, %c0_22, %c0_23] : memref<25x128x128xf32, #tpu.memory_space<vmem>>, vector<1x128x128xf32>
    %14 = vector.shape_cast %13 : vector<1x128x128xf32> to vector<128x128xf32>
    %cst_24 = arith.constant dense<0.000000e+00> : vector<32x128xf32>
    %15 = tpu.matmul %12, %14, %cst_24 {dimension_numbers = #tpu.dot_dimension_numbers<[1], [0], [0], [1], [0, 0, 1, 1], [], []>} : vector<32x128xf32>, vector<128x128xf32>, vector<32x128xf32> -> vector<32x128xf32>
    %c0_25 = arith.constant 0 : index
    %c1 = arith.constant 1 : index
    %c0_26 = arith.constant 0 : index
    %16 = vector.load %arg7[%c0_25, %c1, %c0_26] : memref<8x12x128xf32, #tpu.memory_space<vmem>>, vector<4x8x128xf32>
    %17 = vector.shape_cast %16 : vector<4x8x128xf32> to vector<32x128xf32>
    %c1_27 = arith.constant 1 : index
    %c0_28 = arith.constant 0 : index
    %c0_29 = arith.constant 0 : index
    %18 = vector.load %arg2[%c1_27, %c0_28, %c0_29] : memref<25x128x128xf32, #tpu.memory_space<vmem>>, vector<1x128x128xf32>
    %19 = vector.shape_cast %18 : vector<1x128x128xf32> to vector<128x128xf32>
    %cst_30 = arith.constant dense<0.000000e+00> : vector<32x128xf32>
    %20 = tpu.matmul %17, %19, %cst_30 {dimension_numbers = #tpu.dot_dimension_numbers<[1], [0], [0], [1], [0, 0, 1, 1], [], []>} : vector<32x128xf32>, vector<128x128xf32>, vector<32x128xf32> -> vector<32x128xf32>
    %21 = arith.addf %15, %20 : vector<32x128xf32>
    %c0_31 = arith.constant 0 : index
    %c2_32 = arith.constant 2 : index
    %c0_33 = arith.constant 0 : index
    %22 = vector.load %arg7[%c0_31, %c2_32, %c0_33] : memref<8x12x128xf32, #tpu.memory_space<vmem>>, vector<4x8x128xf32>
    %23 = vector.shape_cast %22 : vector<4x8x128xf32> to vector<32x128xf32>
    %c2_34 = arith.constant 2 : index
    %c0_35 = arith.constant 0 : index
    %c0_36 = arith.constant 0 : index
    %24 = vector.load %arg2[%c2_34, %c0_35, %c0_36] : memref<25x128x128xf32, #tpu.memory_space<vmem>>, vector<1x128x128xf32>
    %25 = vector.shape_cast %24 : vector<1x128x128xf32> to vector<128x128xf32>
    %cst_37 = arith.constant dense<0.000000e+00> : vector<32x128xf32>
    %26 = tpu.matmul %23, %25, %cst_37 {dimension_numbers = #tpu.dot_dimension_numbers<[1], [0], [0], [1], [0, 0, 1, 1], [], []>} : vector<32x128xf32>, vector<128x128xf32>, vector<32x128xf32> -> vector<32x128xf32>
    %27 = arith.addf %21, %26 : vector<32x128xf32>
    %c0_38 = arith.constant 0 : index
    %c3 = arith.constant 3 : index
    %c0_39 = arith.constant 0 : index
    %28 = vector.load %arg7[%c0_38, %c3, %c0_39] : memref<8x12x128xf32, #tpu.memory_space<vmem>>, vector<4x8x128xf32>
    %29 = vector.shape_cast %28 : vector<4x8x128xf32> to vector<32x128xf32>
    %c3_40 = arith.constant 3 : index
    %c0_41 = arith.constant 0 : index
    %c0_42 = arith.constant 0 : index
    %30 = vector.load %arg2[%c3_40, %c0_41, %c0_42] : memref<25x128x128xf32, #tpu.memory_space<vmem>>, vector<1x128x128xf32>
    %31 = vector.shape_cast %30 : vector<1x128x128xf32> to vector<128x128xf32>
    %cst_43 = arith.constant dense<0.000000e+00> : vector<32x128xf32>
    %32 = tpu.matmul %29, %31, %cst_43 {dimension_numbers = #tpu.dot_dimension_numbers<[1], [0], [0], [1], [0, 0, 1, 1], [], []>} : vector<32x128xf32>, vector<128x128xf32>, vector<32x128xf32> -> vector<32x128xf32>
    %33 = arith.addf %27, %32 : vector<32x128xf32>
    %c0_44 = arith.constant 0 : index
    %c4 = arith.constant 4 : index
    %c0_45 = arith.constant 0 : index
    %34 = vector.load %arg7[%c0_44, %c4, %c0_45] : memref<8x12x128xf32, #tpu.memory_space<vmem>>, vector<4x8x128xf32>
    %35 = vector.shape_cast %34 : vector<4x8x128xf32> to vector<32x128xf32>
    %c4_46 = arith.constant 4 : index
    %c0_47 = arith.constant 0 : index
    %c0_48 = arith.constant 0 : index
    %36 = vector.load %arg2[%c4_46, %c0_47, %c0_48] : memref<25x128x128xf32, #tpu.memory_space<vmem>>, vector<1x128x128xf32>
    %37 = vector.shape_cast %36 : vector<1x128x128xf32> to vector<128x128xf32>
    %cst_49 = arith.constant dense<0.000000e+00> : vector<32x128xf32>
    %38 = tpu.matmul %35, %37, %cst_49 {dimension_numbers = #tpu.dot_dimension_numbers<[1], [0], [0], [1], [0, 0, 1, 1], [], []>} : vector<32x128xf32>, vector<128x128xf32>, vector<32x128xf32> -> vector<32x128xf32>
    %39 = arith.addf %33, %38 : vector<32x128xf32>
    %c1_50 = arith.constant 1 : index
    %c0_51 = arith.constant 0 : index
    %c0_52 = arith.constant 0 : index
    %40 = vector.load %arg7[%c1_50, %c0_51, %c0_52] : memref<8x12x128xf32, #tpu.memory_space<vmem>>, vector<4x8x128xf32>
    %41 = vector.shape_cast %40 : vector<4x8x128xf32> to vector<32x128xf32>
    %c5 = arith.constant 5 : index
    %c0_53 = arith.constant 0 : index
    %c0_54 = arith.constant 0 : index
    %42 = vector.load %arg2[%c5, %c0_53, %c0_54] : memref<25x128x128xf32, #tpu.memory_space<vmem>>, vector<1x128x128xf32>
    %43 = vector.shape_cast %42 : vector<1x128x128xf32> to vector<128x128xf32>
    %cst_55 = arith.constant dense<0.000000e+00> : vector<32x128xf32>
    %44 = tpu.matmul %41, %43, %cst_55 {dimension_numbers = #tpu.dot_dimension_numbers<[1], [0], [0], [1], [0, 0, 1, 1], [], []>} : vector<32x128xf32>, vector<128x128xf32>, vector<32x128xf32> -> vector<32x128xf32>
    %45 = arith.addf %39, %44 : vector<32x128xf32>
    %c1_56 = arith.constant 1 : index
    %c1_57 = arith.constant 1 : index
    %c0_58 = arith.constant 0 : index
    %46 = vector.load %arg7[%c1_56, %c1_57, %c0_58] : memref<8x12x128xf32, #tpu.memory_space<vmem>>, vector<4x8x128xf32>
    %47 = vector.shape_cast %46 : vector<4x8x128xf32> to vector<32x128xf32>
    %c6_59 = arith.constant 6 : index
    %c0_60 = arith.constant 0 : index
    %c0_61 = arith.constant 0 : index
    %48 = vector.load %arg2[%c6_59, %c0_60, %c0_61] : memref<25x128x128xf32, #tpu.memory_space<vmem>>, vector<1x128x128xf32>
    %49 = vector.shape_cast %48 : vector<1x128x128xf32> to vector<128x128xf32>
    %cst_62 = arith.constant dense<0.000000e+00> : vector<32x128xf32>
    %50 = tpu.matmul %47, %49, %cst_62 {dimension_numbers = #tpu.dot_dimension_numbers<[1], [0], [0], [1], [0, 0, 1, 1], [], []>} : vector<32x128xf32>, vector<128x128xf32>, vector<32x128xf32> -> vector<32x128xf32>
    %51 = arith.addf %45, %50 : vector<32x128xf32>
    %c1_63 = arith.constant 1 : index
    %c2_64 = arith.constant 2 : index
    %c0_65 = arith.constant 0 : index
    %52 = vector.load %arg7[%c1_63, %c2_64, %c0_65] : memref<8x12x128xf32, #tpu.memory_space<vmem>>, vector<4x8x128xf32>
    %53 = vector.shape_cast %52 : vector<4x8x128xf32> to vector<32x128xf32>
    %c7 = arith.constant 7 : index
    %c0_66 = arith.constant 0 : index
    %c0_67 = arith.constant 0 : index
    %54 = vector.load %arg2[%c7, %c0_66, %c0_67] : memref<25x128x128xf32, #tpu.memory_space<vmem>>, vector<1x128x128xf32>
    %55 = vector.shape_cast %54 : vector<1x128x128xf32> to vector<128x128xf32>
    %cst_68 = arith.constant dense<0.000000e+00> : vector<32x128xf32>
    %56 = tpu.matmul %53, %55, %cst_68 {dimension_numbers = #tpu.dot_dimension_numbers<[1], [0], [0], [1], [0, 0, 1, 1], [], []>} : vector<32x128xf32>, vector<128x128xf32>, vector<32x128xf32> -> vector<32x128xf32>
    %57 = arith.addf %51, %56 : vector<32x128xf32>
    %c1_69 = arith.constant 1 : index
    %c3_70 = arith.constant 3 : index
    %c0_71 = arith.constant 0 : index
    %58 = vector.load %arg7[%c1_69, %c3_70, %c0_71] : memref<8x12x128xf32, #tpu.memory_space<vmem>>, vector<4x8x128xf32>
    %59 = vector.shape_cast %58 : vector<4x8x128xf32> to vector<32x128xf32>
    %c8 = arith.constant 8 : index
    %c0_72 = arith.constant 0 : index
    %c0_73 = arith.constant 0 : index
    %60 = vector.load %arg2[%c8, %c0_72, %c0_73] : memref<25x128x128xf32, #tpu.memory_space<vmem>>, vector<1x128x128xf32>
    %61 = vector.shape_cast %60 : vector<1x128x128xf32> to vector<128x128xf32>
    %cst_74 = arith.constant dense<0.000000e+00> : vector<32x128xf32>
    %62 = tpu.matmul %59, %61, %cst_74 {dimension_numbers = #tpu.dot_dimension_numbers<[1], [0], [0], [1], [0, 0, 1, 1], [], []>} : vector<32x128xf32>, vector<128x128xf32>, vector<32x128xf32> -> vector<32x128xf32>
    %63 = arith.addf %57, %62 : vector<32x128xf32>
    %c1_75 = arith.constant 1 : index
    %c4_76 = arith.constant 4 : index
    %c0_77 = arith.constant 0 : index
    %64 = vector.load %arg7[%c1_75, %c4_76, %c0_77] : memref<8x12x128xf32, #tpu.memory_space<vmem>>, vector<4x8x128xf32>
    %65 = vector.shape_cast %64 : vector<4x8x128xf32> to vector<32x128xf32>
    %c9 = arith.constant 9 : index
    %c0_78 = arith.constant 0 : index
    %c0_79 = arith.constant 0 : index
    %66 = vector.load %arg2[%c9, %c0_78, %c0_79] : memref<25x128x128xf32, #tpu.memory_space<vmem>>, vector<1x128x128xf32>
    %67 = vector.shape_cast %66 : vector<1x128x128xf32> to vector<128x128xf32>
    %cst_80 = arith.constant dense<0.000000e+00> : vector<32x128xf32>
    %68 = tpu.matmul %65, %67, %cst_80 {dimension_numbers = #tpu.dot_dimension_numbers<[1], [0], [0], [1], [0, 0, 1, 1], [], []>} : vector<32x128xf32>, vector<128x128xf32>, vector<32x128xf32> -> vector<32x128xf32>
    %69 = arith.addf %63, %68 : vector<32x128xf32>
    %c2_81 = arith.constant 2 : index
    %c0_82 = arith.constant 0 : index
    %c0_83 = arith.constant 0 : index
    %70 = vector.load %arg7[%c2_81, %c0_82, %c0_83] : memref<8x12x128xf32, #tpu.memory_space<vmem>>, vector<4x8x128xf32>
    %71 = vector.shape_cast %70 : vector<4x8x128xf32> to vector<32x128xf32>
    %c10_84 = arith.constant 10 : index
    %c0_85 = arith.constant 0 : index
    %c0_86 = arith.constant 0 : index
    %72 = vector.load %arg2[%c10_84, %c0_85, %c0_86] : memref<25x128x128xf32, #tpu.memory_space<vmem>>, vector<1x128x128xf32>
    %73 = vector.shape_cast %72 : vector<1x128x128xf32> to vector<128x128xf32>
    %cst_87 = arith.constant dense<0.000000e+00> : vector<32x128xf32>
    %74 = tpu.matmul %71, %73, %cst_87 {dimension_numbers = #tpu.dot_dimension_numbers<[1], [0], [0], [1], [0, 0, 1, 1], [], []>} : vector<32x128xf32>, vector<128x128xf32>, vector<32x128xf32> -> vector<32x128xf32>
    %75 = arith.addf %69, %74 : vector<32x128xf32>
    %c2_88 = arith.constant 2 : index
    %c1_89 = arith.constant 1 : index
    %c0_90 = arith.constant 0 : index
    %76 = vector.load %arg7[%c2_88, %c1_89, %c0_90] : memref<8x12x128xf32, #tpu.memory_space<vmem>>, vector<4x8x128xf32>
    %77 = vector.shape_cast %76 : vector<4x8x128xf32> to vector<32x128xf32>
    %c11 = arith.constant 11 : index
    %c0_91 = arith.constant 0 : index
    %c0_92 = arith.constant 0 : index
    %78 = vector.load %arg2[%c11, %c0_91, %c0_92] : memref<25x128x128xf32, #tpu.memory_space<vmem>>, vector<1x128x128xf32>
    %79 = vector.shape_cast %78 : vector<1x128x128xf32> to vector<128x128xf32>
    %cst_93 = arith.constant dense<0.000000e+00> : vector<32x128xf32>
    %80 = tpu.matmul %77, %79, %cst_93 {dimension_numbers = #tpu.dot_dimension_numbers<[1], [0], [0], [1], [0, 0, 1, 1], [], []>} : vector<32x128xf32>, vector<128x128xf32>, vector<32x128xf32> -> vector<32x128xf32>
    %81 = arith.addf %75, %80 : vector<32x128xf32>
    %c2_94 = arith.constant 2 : index
    %c2_95 = arith.constant 2 : index
    %c0_96 = arith.constant 0 : index
    %82 = vector.load %arg7[%c2_94, %c2_95, %c0_96] : memref<8x12x128xf32, #tpu.memory_space<vmem>>, vector<4x8x128xf32>
    %83 = vector.shape_cast %82 : vector<4x8x128xf32> to vector<32x128xf32>
    %c12 = arith.constant 12 : index
    %c0_97 = arith.constant 0 : index
    %c0_98 = arith.constant 0 : index
    %84 = vector.load %arg2[%c12, %c0_97, %c0_98] : memref<25x128x128xf32, #tpu.memory_space<vmem>>, vector<1x128x128xf32>
    %85 = vector.shape_cast %84 : vector<1x128x128xf32> to vector<128x128xf32>
    %cst_99 = arith.constant dense<0.000000e+00> : vector<32x128xf32>
    %86 = tpu.matmul %83, %85, %cst_99 {dimension_numbers = #tpu.dot_dimension_numbers<[1], [0], [0], [1], [0, 0, 1, 1], [], []>} : vector<32x128xf32>, vector<128x128xf32>, vector<32x128xf32> -> vector<32x128xf32>
    %87 = arith.addf %81, %86 : vector<32x128xf32>
    %c2_100 = arith.constant 2 : index
    %c3_101 = arith.constant 3 : index
    %c0_102 = arith.constant 0 : index
    %88 = vector.load %arg7[%c2_100, %c3_101, %c0_102] : memref<8x12x128xf32, #tpu.memory_space<vmem>>, vector<4x8x128xf32>
    %89 = vector.shape_cast %88 : vector<4x8x128xf32> to vector<32x128xf32>
    %c13 = arith.constant 13 : index
    %c0_103 = arith.constant 0 : index
    %c0_104 = arith.constant 0 : index
    %90 = vector.load %arg2[%c13, %c0_103, %c0_104] : memref<25x128x128xf32, #tpu.memory_space<vmem>>, vector<1x128x128xf32>
    %91 = vector.shape_cast %90 : vector<1x128x128xf32> to vector<128x128xf32>
    %cst_105 = arith.constant dense<0.000000e+00> : vector<32x128xf32>
    %92 = tpu.matmul %89, %91, %cst_105 {dimension_numbers = #tpu.dot_dimension_numbers<[1], [0], [0], [1], [0, 0, 1, 1], [], []>} : vector<32x128xf32>, vector<128x128xf32>, vector<32x128xf32> -> vector<32x128xf32>
    %93 = arith.addf %87, %92 : vector<32x128xf32>
    %c2_106 = arith.constant 2 : index
    %c4_107 = arith.constant 4 : index
    %c0_108 = arith.constant 0 : index
    %94 = vector.load %arg7[%c2_106, %c4_107, %c0_108] : memref<8x12x128xf32, #tpu.memory_space<vmem>>, vector<4x8x128xf32>
    %95 = vector.shape_cast %94 : vector<4x8x128xf32> to vector<32x128xf32>
    %c14 = arith.constant 14 : index
    %c0_109 = arith.constant 0 : index
    %c0_110 = arith.constant 0 : index
    %96 = vector.load %arg2[%c14, %c0_109, %c0_110] : memref<25x128x128xf32, #tpu.memory_space<vmem>>, vector<1x128x128xf32>
    %97 = vector.shape_cast %96 : vector<1x128x128xf32> to vector<128x128xf32>
    %cst_111 = arith.constant dense<0.000000e+00> : vector<32x128xf32>
    %98 = tpu.matmul %95, %97, %cst_111 {dimension_numbers = #tpu.dot_dimension_numbers<[1], [0], [0], [1], [0, 0, 1, 1], [], []>} : vector<32x128xf32>, vector<128x128xf32>, vector<32x128xf32> -> vector<32x128xf32>
    %99 = arith.addf %93, %98 : vector<32x128xf32>
    %c3_112 = arith.constant 3 : index
    %c0_113 = arith.constant 0 : index
    %c0_114 = arith.constant 0 : index
    %100 = vector.load %arg7[%c3_112, %c0_113, %c0_114] : memref<8x12x128xf32, #tpu.memory_space<vmem>>, vector<4x8x128xf32>
    %101 = vector.shape_cast %100 : vector<4x8x128xf32> to vector<32x128xf32>
    %c15 = arith.constant 15 : index
    %c0_115 = arith.constant 0 : index
    %c0_116 = arith.constant 0 : index
    %102 = vector.load %arg2[%c15, %c0_115, %c0_116] : memref<25x128x128xf32, #tpu.memory_space<vmem>>, vector<1x128x128xf32>
    %103 = vector.shape_cast %102 : vector<1x128x128xf32> to vector<128x128xf32>
    %cst_117 = arith.constant dense<0.000000e+00> : vector<32x128xf32>
    %104 = tpu.matmul %101, %103, %cst_117 {dimension_numbers = #tpu.dot_dimension_numbers<[1], [0], [0], [1], [0, 0, 1, 1], [], []>} : vector<32x128xf32>, vector<128x128xf32>, vector<32x128xf32> -> vector<32x128xf32>
    %105 = arith.addf %99, %104 : vector<32x128xf32>
    %c3_118 = arith.constant 3 : index
    %c1_119 = arith.constant 1 : index
    %c0_120 = arith.constant 0 : index
    %106 = vector.load %arg7[%c3_118, %c1_119, %c0_120] : memref<8x12x128xf32, #tpu.memory_space<vmem>>, vector<4x8x128xf32>
    %107 = vector.shape_cast %106 : vector<4x8x128xf32> to vector<32x128xf32>
    %c16 = arith.constant 16 : index
    %c0_121 = arith.constant 0 : index
    %c0_122 = arith.constant 0 : index
    %108 = vector.load %arg2[%c16, %c0_121, %c0_122] : memref<25x128x128xf32, #tpu.memory_space<vmem>>, vector<1x128x128xf32>
    %109 = vector.shape_cast %108 : vector<1x128x128xf32> to vector<128x128xf32>
    %cst_123 = arith.constant dense<0.000000e+00> : vector<32x128xf32>
    %110 = tpu.matmul %107, %109, %cst_123 {dimension_numbers = #tpu.dot_dimension_numbers<[1], [0], [0], [1], [0, 0, 1, 1], [], []>} : vector<32x128xf32>, vector<128x128xf32>, vector<32x128xf32> -> vector<32x128xf32>
    %111 = arith.addf %105, %110 : vector<32x128xf32>
    %c3_124 = arith.constant 3 : index
    %c2_125 = arith.constant 2 : index
    %c0_126 = arith.constant 0 : index
    %112 = vector.load %arg7[%c3_124, %c2_125, %c0_126] : memref<8x12x128xf32, #tpu.memory_space<vmem>>, vector<4x8x128xf32>
    %113 = vector.shape_cast %112 : vector<4x8x128xf32> to vector<32x128xf32>
    %c17 = arith.constant 17 : index
    %c0_127 = arith.constant 0 : index
    %c0_128 = arith.constant 0 : index
    %114 = vector.load %arg2[%c17, %c0_127, %c0_128] : memref<25x128x128xf32, #tpu.memory_space<vmem>>, vector<1x128x128xf32>
    %115 = vector.shape_cast %114 : vector<1x128x128xf32> to vector<128x128xf32>
    %cst_129 = arith.constant dense<0.000000e+00> : vector<32x128xf32>
    %116 = tpu.matmul %113, %115, %cst_129 {dimension_numbers = #tpu.dot_dimension_numbers<[1], [0], [0], [1], [0, 0, 1, 1], [], []>} : vector<32x128xf32>, vector<128x128xf32>, vector<32x128xf32> -> vector<32x128xf32>
    %117 = arith.addf %111, %116 : vector<32x128xf32>
    %c3_130 = arith.constant 3 : index
    %c3_131 = arith.constant 3 : index
    %c0_132 = arith.constant 0 : index
    %118 = vector.load %arg7[%c3_130, %c3_131, %c0_132] : memref<8x12x128xf32, #tpu.memory_space<vmem>>, vector<4x8x128xf32>
    %119 = vector.shape_cast %118 : vector<4x8x128xf32> to vector<32x128xf32>
    %c18 = arith.constant 18 : index
    %c0_133 = arith.constant 0 : index
    %c0_134 = arith.constant 0 : index
    %120 = vector.load %arg2[%c18, %c0_133, %c0_134] : memref<25x128x128xf32, #tpu.memory_space<vmem>>, vector<1x128x128xf32>
    %121 = vector.shape_cast %120 : vector<1x128x128xf32> to vector<128x128xf32>
    %cst_135 = arith.constant dense<0.000000e+00> : vector<32x128xf32>
    %122 = tpu.matmul %119, %121, %cst_135 {dimension_numbers = #tpu.dot_dimension_numbers<[1], [0], [0], [1], [0, 0, 1, 1], [], []>} : vector<32x128xf32>, vector<128x128xf32>, vector<32x128xf32> -> vector<32x128xf32>
    %123 = arith.addf %117, %122 : vector<32x128xf32>
    %c3_136 = arith.constant 3 : index
    %c4_137 = arith.constant 4 : index
    %c0_138 = arith.constant 0 : index
    %124 = vector.load %arg7[%c3_136, %c4_137, %c0_138] : memref<8x12x128xf32, #tpu.memory_space<vmem>>, vector<4x8x128xf32>
    %125 = vector.shape_cast %124 : vector<4x8x128xf32> to vector<32x128xf32>
    %c19 = arith.constant 19 : index
    %c0_139 = arith.constant 0 : index
    %c0_140 = arith.constant 0 : index
    %126 = vector.load %arg2[%c19, %c0_139, %c0_140] : memref<25x128x128xf32, #tpu.memory_space<vmem>>, vector<1x128x128xf32>
    %127 = vector.shape_cast %126 : vector<1x128x128xf32> to vector<128x128xf32>
    %cst_141 = arith.constant dense<0.000000e+00> : vector<32x128xf32>
    %128 = tpu.matmul %125, %127, %cst_141 {dimension_numbers = #tpu.dot_dimension_numbers<[1], [0], [0], [1], [0, 0, 1, 1], [], []>} : vector<32x128xf32>, vector<128x128xf32>, vector<32x128xf32> -> vector<32x128xf32>
    %129 = arith.addf %123, %128 : vector<32x128xf32>
    %c4_142 = arith.constant 4 : index
    %c0_143 = arith.constant 0 : index
    %c0_144 = arith.constant 0 : index
    %130 = vector.load %arg7[%c4_142, %c0_143, %c0_144] : memref<8x12x128xf32, #tpu.memory_space<vmem>>, vector<4x8x128xf32>
    %131 = vector.shape_cast %130 : vector<4x8x128xf32> to vector<32x128xf32>
    %c20 = arith.constant 20 : index
    %c0_145 = arith.constant 0 : index
    %c0_146 = arith.constant 0 : index
    %132 = vector.load %arg2[%c20, %c0_145, %c0_146] : memref<25x128x128xf32, #tpu.memory_space<vmem>>, vector<1x128x128xf32>
    %133 = vector.shape_cast %132 : vector<1x128x128xf32> to vector<128x128xf32>
    %cst_147 = arith.constant dense<0.000000e+00> : vector<32x128xf32>
    %134 = tpu.matmul %131, %133, %cst_147 {dimension_numbers = #tpu.dot_dimension_numbers<[1], [0], [0], [1], [0, 0, 1, 1], [], []>} : vector<32x128xf32>, vector<128x128xf32>, vector<32x128xf32> -> vector<32x128xf32>
    %135 = arith.addf %129, %134 : vector<32x128xf32>
    %c4_148 = arith.constant 4 : index
    %c1_149 = arith.constant 1 : index
    %c0_150 = arith.constant 0 : index
    %136 = vector.load %arg7[%c4_148, %c1_149, %c0_150] : memref<8x12x128xf32, #tpu.memory_space<vmem>>, vector<4x8x128xf32>
    %137 = vector.shape_cast %136 : vector<4x8x128xf32> to vector<32x128xf32>
    %c21 = arith.constant 21 : index
    %c0_151 = arith.constant 0 : index
    %c0_152 = arith.constant 0 : index
    %138 = vector.load %arg2[%c21, %c0_151, %c0_152] : memref<25x128x128xf32, #tpu.memory_space<vmem>>, vector<1x128x128xf32>
    %139 = vector.shape_cast %138 : vector<1x128x128xf32> to vector<128x128xf32>
    %cst_153 = arith.constant dense<0.000000e+00> : vector<32x128xf32>
    %140 = tpu.matmul %137, %139, %cst_153 {dimension_numbers = #tpu.dot_dimension_numbers<[1], [0], [0], [1], [0, 0, 1, 1], [], []>} : vector<32x128xf32>, vector<128x128xf32>, vector<32x128xf32> -> vector<32x128xf32>
    %141 = arith.addf %135, %140 : vector<32x128xf32>
    %c4_154 = arith.constant 4 : index
    %c2_155 = arith.constant 2 : index
    %c0_156 = arith.constant 0 : index
    %142 = vector.load %arg7[%c4_154, %c2_155, %c0_156] : memref<8x12x128xf32, #tpu.memory_space<vmem>>, vector<4x8x128xf32>
    %143 = vector.shape_cast %142 : vector<4x8x128xf32> to vector<32x128xf32>
    %c22 = arith.constant 22 : index
    %c0_157 = arith.constant 0 : index
    %c0_158 = arith.constant 0 : index
    %144 = vector.load %arg2[%c22, %c0_157, %c0_158] : memref<25x128x128xf32, #tpu.memory_space<vmem>>, vector<1x128x128xf32>
    %145 = vector.shape_cast %144 : vector<1x128x128xf32> to vector<128x128xf32>
    %cst_159 = arith.constant dense<0.000000e+00> : vector<32x128xf32>
    %146 = tpu.matmul %143, %145, %cst_159 {dimension_numbers = #tpu.dot_dimension_numbers<[1], [0], [0], [1], [0, 0, 1, 1], [], []>} : vector<32x128xf32>, vector<128x128xf32>, vector<32x128xf32> -> vector<32x128xf32>
    %147 = arith.addf %141, %146 : vector<32x128xf32>
    %c4_160 = arith.constant 4 : index
    %c3_161 = arith.constant 3 : index
    %c0_162 = arith.constant 0 : index
    %148 = vector.load %arg7[%c4_160, %c3_161, %c0_162] : memref<8x12x128xf32, #tpu.memory_space<vmem>>, vector<4x8x128xf32>
    %149 = vector.shape_cast %148 : vector<4x8x128xf32> to vector<32x128xf32>
    %c23 = arith.constant 23 : index
    %c0_163 = arith.constant 0 : index
    %c0_164 = arith.constant 0 : index
    %150 = vector.load %arg2[%c23, %c0_163, %c0_164] : memref<25x128x128xf32, #tpu.memory_space<vmem>>, vector<1x128x128xf32>
    %151 = vector.shape_cast %150 : vector<1x128x128xf32> to vector<128x128xf32>
    %cst_165 = arith.constant dense<0.000000e+00> : vector<32x128xf32>
    %152 = tpu.matmul %149, %151, %cst_165 {dimension_numbers = #tpu.dot_dimension_numbers<[1], [0], [0], [1], [0, 0, 1, 1], [], []>} : vector<32x128xf32>, vector<128x128xf32>, vector<32x128xf32> -> vector<32x128xf32>
    %153 = arith.addf %147, %152 : vector<32x128xf32>
    %c4_166 = arith.constant 4 : index
    %c4_167 = arith.constant 4 : index
    %c0_168 = arith.constant 0 : index
    %154 = vector.load %arg7[%c4_166, %c4_167, %c0_168] : memref<8x12x128xf32, #tpu.memory_space<vmem>>, vector<4x8x128xf32>
    %155 = vector.shape_cast %154 : vector<4x8x128xf32> to vector<32x128xf32>
    %c24 = arith.constant 24 : index
    %c0_169 = arith.constant 0 : index
    %c0_170 = arith.constant 0 : index
    %156 = vector.load %arg2[%c24, %c0_169, %c0_170] : memref<25x128x128xf32, #tpu.memory_space<vmem>>, vector<1x128x128xf32>
    %157 = vector.shape_cast %156 : vector<1x128x128xf32> to vector<128x128xf32>
    %cst_171 = arith.constant dense<0.000000e+00> : vector<32x128xf32>
    %158 = tpu.matmul %155, %157, %cst_171 {dimension_numbers = #tpu.dot_dimension_numbers<[1], [0], [0], [1], [0, 0, 1, 1], [], []>} : vector<32x128xf32>, vector<128x128xf32>, vector<32x128xf32> -> vector<32x128xf32>
    %159 = arith.addf %153, %158 : vector<32x128xf32>
    %c0_172 = arith.constant 0 : index
    %c0_173 = arith.constant 0 : index
    %160 = vector.load %arg5[%c0_172, %c0_173] : memref<17x128xf32, #tpu.memory_space<vmem>>, vector<1x128xf32>
    %161 = vector.broadcast %160 : vector<1x128xf32> to vector<32x128xf32>
    %162 = arith.addf %159, %161 : vector<32x128xf32>
    %cst_174 = arith.constant dense<0.000000e+00> : vector<128xf32>
    %163 = vector.multi_reduction <add>, %162, %cst_174 [0] : vector<32x128xf32> to vector<128xf32>
    %164 = vector.shape_cast %163 : vector<128xf32> to vector<1x128xf32>
    %165 = arith.mulf %162, %162 : vector<32x128xf32>
    %cst_175 = arith.constant dense<0.000000e+00> : vector<128xf32>
    %166 = vector.multi_reduction <add>, %165, %cst_175 [0] : vector<32x128xf32> to vector<128xf32>
    %167 = vector.shape_cast %166 : vector<128xf32> to vector<1x128xf32>
    %168 = tpu.concatenate %164, %167 in 0 : vector<1x128xf32>, vector<1x128xf32> -> vector<2x128xf32>
    %c0_176 = arith.constant 0 : index
    %c0_177 = arith.constant 0 : index
    %169 = vector.load %arg3[%c0_176, %c0_177] : memref<128x8xf32, #tpu.memory_space<vmem>>, vector<128x8xf32>
    %cst_178 = arith.constant dense<0.000000e+00> : vector<2x8xf32>
    %170 = tpu.matmul %168, %169, %cst_178 {dimension_numbers = #tpu.dot_dimension_numbers<[1], [0], [0], [1], [0, 0, 1, 1], [], []>} : vector<2x128xf32>, vector<128x8xf32>, vector<2x8xf32> -> vector<2x8xf32>
    %c0_179 = arith.constant 0 : index
    %c0_180 = arith.constant 0 : index
    %171 = vector.load %arg4[%c0_179, %c0_180] : memref<8x128xf32, #tpu.memory_space<vmem>>, vector<8x128xf32>
    %cst_181 = arith.constant dense<0.000000e+00> : vector<2x128xf32>
    %172 = tpu.matmul %170, %171, %cst_181 {dimension_numbers = #tpu.dot_dimension_numbers<[1], [0], [0], [1], [0, 0, 1, 1], [], []>} : vector<2x8xf32>, vector<8x128xf32>, vector<2x128xf32> -> vector<2x128xf32>
    %173 = vector.extract_strided_slice %172 {offsets = [0, 0], sizes = [1, 128], strides = [1, 1]} : vector<2x128xf32> to vector<1x128xf32>
    %174 = vector.extract_strided_slice %172 {offsets = [1, 0], sizes = [1, 128], strides = [1, 1]} : vector<2x128xf32> to vector<1x128xf32>
    %175 = arith.mulf %173, %173 : vector<1x128xf32>
    %176 = arith.subf %174, %175 : vector<1x128xf32>
    %177 = vector.broadcast %173 : vector<1x128xf32> to vector<32x128xf32>
    %178 = arith.subf %162, %177 : vector<32x128xf32>
    %cst_182 = arith.constant 9.99999974E-6 : f32
    %179 = vector.broadcast %cst_182 : f32 to vector<1x128xf32>
    %180 = arith.addf %176, %179 : vector<1x128xf32>
    %181 = math.rsqrt %180 : vector<1x128xf32>
    %182 = vector.broadcast %181 : vector<1x128xf32> to vector<32x128xf32>
    %183 = arith.mulf %178, %182 : vector<32x128xf32>
    %c1_183 = arith.constant 1 : index
    %c0_184 = arith.constant 0 : index
    %184 = vector.load %arg5[%c1_183, %c0_184] : memref<17x128xf32, #tpu.memory_space<vmem>>, vector<1x128xf32>
    %185 = vector.broadcast %184 : vector<1x128xf32> to vector<32x128xf32>
    %186 = arith.mulf %183, %185 : vector<32x128xf32>
    %c2_185 = arith.constant 2 : index
    %c0_186 = arith.constant 0 : index
    %187 = vector.load %arg5[%c2_185, %c0_186] : memref<17x128xf32, #tpu.memory_space<vmem>>, vector<1x128xf32>
    %188 = vector.broadcast %187 : vector<1x128xf32> to vector<32x128xf32>
    %189 = arith.addf %186, %188 : vector<32x128xf32>
    %c3_187 = arith.constant 3 : index
    %c0_188 = arith.constant 0 : index
    %190 = vector.load %arg5[%c3_187, %c0_188] : memref<17x128xf32, #tpu.memory_space<vmem>>, vector<1x128xf32>
    %191 = vector.broadcast %190 : vector<1x128xf32> to vector<32x128xf32>
    %192 = arith.mulf %189, %191 : vector<32x128xf32>
    %c7_189 = arith.constant 7 : index
    %c0_190 = arith.constant 0 : index
    %193 = vector.load %arg5[%c7_189, %c0_190] : memref<17x128xf32, #tpu.memory_space<vmem>>, vector<1x128xf32>
    %194 = vector.broadcast %193 : vector<1x128xf32> to vector<32x128xf32>
    %195 = arith.addf %192, %194 : vector<32x128xf32>
    %cst_191 = arith.constant 3.000000e+00 : f32
    %196 = vector.broadcast %cst_191 : f32 to vector<32x128xf32>
    %197 = arith.addf %195, %196 : vector<32x128xf32>
    %cst_192 = arith.constant 0.000000e+00 : f32
    %cst_193 = arith.constant 6.000000e+00 : f32
    %198 = vector.broadcast %cst_192 : f32 to vector<32x128xf32>
    %199 = arith.maximumf %198, %197 : vector<32x128xf32>
    %200 = vector.broadcast %cst_193 : f32 to vector<32x128xf32>
    %201 = arith.minimumf %200, %199 : vector<32x128xf32>
    %202 = arith.mulf %195, %201 : vector<32x128xf32>
    %cst_194 = arith.constant 0.166666672 : f32
    %203 = vector.broadcast %cst_194 : f32 to vector<32x128xf32>
    %204 = arith.mulf %202, %203 : vector<32x128xf32>
    %c11_195 = arith.constant 11 : index
    %c0_196 = arith.constant 0 : index
    %205 = vector.load %arg5[%c11_195, %c0_196] : memref<17x128xf32, #tpu.memory_space<vmem>>, vector<1x128xf32>
    %206 = vector.broadcast %205 : vector<1x128xf32> to vector<32x128xf32>
    %207 = arith.mulf %204, %206 : vector<32x128xf32>
    %c4_197 = arith.constant 4 : index
    %c0_198 = arith.constant 0 : index
    %208 = vector.load %arg5[%c4_197, %c0_198] : memref<17x128xf32, #tpu.memory_space<vmem>>, vector<1x128xf32>
    %209 = vector.broadcast %208 : vector<1x128xf32> to vector<32x128xf32>
    %210 = arith.mulf %189, %209 : vector<32x128xf32>
    %c8_199 = arith.constant 8 : index
    %c0_200 = arith.constant 0 : index
    %211 = vector.load %arg5[%c8_199, %c0_200] : memref<17x128xf32, #tpu.memory_space<vmem>>, vector<1x128xf32>
    %212 = vector.broadcast %211 : vector<1x128xf32> to vector<32x128xf32>
    %213 = arith.addf %210, %212 : vector<32x128xf32>
    %cst_201 = arith.constant 3.000000e+00 : f32
    %214 = vector.broadcast %cst_201 : f32 to vector<32x128xf32>
    %215 = arith.addf %213, %214 : vector<32x128xf32>
    %cst_202 = arith.constant 0.000000e+00 : f32
    %cst_203 = arith.constant 6.000000e+00 : f32
    %216 = vector.broadcast %cst_202 : f32 to vector<32x128xf32>
    %217 = arith.maximumf %216, %215 : vector<32x128xf32>
    %218 = vector.broadcast %cst_203 : f32 to vector<32x128xf32>
    %219 = arith.minimumf %218, %217 : vector<32x128xf32>
    %220 = arith.mulf %213, %219 : vector<32x128xf32>
    %cst_204 = arith.constant 0.166666672 : f32
    %221 = vector.broadcast %cst_204 : f32 to vector<32x128xf32>
    %222 = arith.mulf %220, %221 : vector<32x128xf32>
    %c12_205 = arith.constant 12 : index
    %c0_206 = arith.constant 0 : index
    %223 = vector.load %arg5[%c12_205, %c0_206] : memref<17x128xf32, #tpu.memory_space<vmem>>, vector<1x128xf32>
    %224 = vector.broadcast %223 : vector<1x128xf32> to vector<32x128xf32>
    %225 = arith.mulf %222, %224 : vector<32x128xf32>
    %226 = arith.addf %207, %225 : vector<32x128xf32>
    %c5_207 = arith.constant 5 : index
    %c0_208 = arith.constant 0 : index
    %227 = vector.load %arg5[%c5_207, %c0_208] : memref<17x128xf32, #tpu.memory_space<vmem>>, vector<1x128xf32>
    %228 = vector.broadcast %227 : vector<1x128xf32> to vector<32x128xf32>
    %229 = arith.mulf %189, %228 : vector<32x128xf32>
    %c9_209 = arith.constant 9 : index
    %c0_210 = arith.constant 0 : index
    %230 = vector.load %arg5[%c9_209, %c0_210] : memref<17x128xf32, #tpu.memory_space<vmem>>, vector<1x128xf32>
    %231 = vector.broadcast %230 : vector<1x128xf32> to vector<32x128xf32>
    %232 = arith.addf %229, %231 : vector<32x128xf32>
    %cst_211 = arith.constant 3.000000e+00 : f32
    %233 = vector.broadcast %cst_211 : f32 to vector<32x128xf32>
    %234 = arith.addf %232, %233 : vector<32x128xf32>
    %cst_212 = arith.constant 0.000000e+00 : f32
    %cst_213 = arith.constant 6.000000e+00 : f32
    %235 = vector.broadcast %cst_212 : f32 to vector<32x128xf32>
    %236 = arith.maximumf %235, %234 : vector<32x128xf32>
    %237 = vector.broadcast %cst_213 : f32 to vector<32x128xf32>
    %238 = arith.minimumf %237, %236 : vector<32x128xf32>
    %239 = arith.mulf %232, %238 : vector<32x128xf32>
    %cst_214 = arith.constant 0.166666672 : f32
    %240 = vector.broadcast %cst_214 : f32 to vector<32x128xf32>
    %241 = arith.mulf %239, %240 : vector<32x128xf32>
    %c13_215 = arith.constant 13 : index
    %c0_216 = arith.constant 0 : index
    %242 = vector.load %arg5[%c13_215, %c0_216] : memref<17x128xf32, #tpu.memory_space<vmem>>, vector<1x128xf32>
    %243 = vector.broadcast %242 : vector<1x128xf32> to vector<32x128xf32>
    %244 = arith.mulf %241, %243 : vector<32x128xf32>
    %245 = arith.addf %226, %244 : vector<32x128xf32>
    %c6_217 = arith.constant 6 : index
    %c0_218 = arith.constant 0 : index
    %246 = vector.load %arg5[%c6_217, %c0_218] : memref<17x128xf32, #tpu.memory_space<vmem>>, vector<1x128xf32>
    %247 = vector.broadcast %246 : vector<1x128xf32> to vector<32x128xf32>
    %248 = arith.mulf %189, %247 : vector<32x128xf32>
    %c10_219 = arith.constant 10 : index
    %c0_220 = arith.constant 0 : index
    %249 = vector.load %arg5[%c10_219, %c0_220] : memref<17x128xf32, #tpu.memory_space<vmem>>, vector<1x128xf32>
    %250 = vector.broadcast %249 : vector<1x128xf32> to vector<32x128xf32>
    %251 = arith.addf %248, %250 : vector<32x128xf32>
    %cst_221 = arith.constant 3.000000e+00 : f32
    %252 = vector.broadcast %cst_221 : f32 to vector<32x128xf32>
    %253 = arith.addf %251, %252 : vector<32x128xf32>
    %cst_222 = arith.constant 0.000000e+00 : f32
    %cst_223 = arith.constant 6.000000e+00 : f32
    %254 = vector.broadcast %cst_222 : f32 to vector<32x128xf32>
    %255 = arith.maximumf %254, %253 : vector<32x128xf32>
    %256 = vector.broadcast %cst_223 : f32 to vector<32x128xf32>
    %257 = arith.minimumf %256, %255 : vector<32x128xf32>
    %258 = arith.mulf %251, %257 : vector<32x128xf32>
    %cst_224 = arith.constant 0.166666672 : f32
    %259 = vector.broadcast %cst_224 : f32 to vector<32x128xf32>
    %260 = arith.mulf %258, %259 : vector<32x128xf32>
    %c14_225 = arith.constant 14 : index
    %c0_226 = arith.constant 0 : index
    %261 = vector.load %arg5[%c14_225, %c0_226] : memref<17x128xf32, #tpu.memory_space<vmem>>, vector<1x128xf32>
    %262 = vector.broadcast %261 : vector<1x128xf32> to vector<32x128xf32>
    %263 = arith.mulf %260, %262 : vector<32x128xf32>
    %264 = arith.addf %245, %263 : vector<32x128xf32>
    %c15_227 = arith.constant 15 : index
    %c0_228 = arith.constant 0 : index
    %265 = vector.load %arg5[%c15_227, %c0_228] : memref<17x128xf32, #tpu.memory_space<vmem>>, vector<1x128xf32>
    %266 = vector.broadcast %265 : vector<1x128xf32> to vector<32x128xf32>
    %267 = arith.addf %264, %266 : vector<32x128xf32>
    %c0_229 = arith.constant 0 : index
    %c0_230 = arith.constant 0 : index
    %c0_231 = arith.constant 0 : index
    %c0_232 = arith.constant 0 : index
    %268 = vector.load %arg1[%c0_229, %c0_230, %c0_231, %c0_232] : memref<1x4x8x128xf32, #tpu.memory_space<vmem>>, vector<1x4x8x128xf32>
    %269 = vector.shape_cast %268 : vector<1x4x8x128xf32> to vector<4x8x128xf32>
    %270 = vector.shape_cast %269 : vector<4x8x128xf32> to vector<32x128xf32>
    %c16_233 = arith.constant 16 : index
    %c0_234 = arith.constant 0 : index
    %271 = vector.load %arg5[%c16_233, %c0_234] : memref<17x128xf32, #tpu.memory_space<vmem>>, vector<1x128xf32>
    %272 = vector.broadcast %271 : vector<1x128xf32> to vector<32x128xf32>
    %273 = arith.mulf %272, %267 : vector<32x128xf32>
    %274 = arith.addf %270, %273 : vector<32x128xf32>
    %275 = vector.shape_cast %274 : vector<32x128xf32> to vector<4x8x128xf32>
    %c0_235 = arith.constant 0 : index
    %c0_236 = arith.constant 0 : index
    %c0_237 = arith.constant 0 : index
    %c0_238 = arith.constant 0 : index
    %276 = vector.load %arg6[%c0_235, %c0_236, %c0_237, %c0_238] : memref<1x4x8x128xf32, #tpu.memory_space<vmem>>, vector<1x4x8x128xf32>
    %277 = vector.shape_cast %276 : vector<1x4x8x128xf32> to vector<4x8x128xf32>
    %278 = vector.shape_cast %275 : vector<4x8x128xf32> to vector<1x4x8x128xf32>
    tpu.vector_store %arg6[%c0_235, %c0_236, %c0_237, %c0_238], %278 {strides = array<i32>} : memref<1x4x8x128xf32, #tpu.memory_space<vmem>>, vector<1x4x8x128xf32>,
    return
  }
  func.func @transform_0(%arg0: i32) -> (i32, i32, i32, i32) {
    %c0_i32 = arith.constant 0 : i32
    %c0_i32_0 = arith.constant 0 : i32
    %c0_i32_1 = arith.constant 0 : i32
    %c0_i32_2 = arith.constant 0 : i32
    return %arg0, %c0_i32, %c0_i32_0, %c0_i32_1 : i32, i32, i32, i32
  }
  func.func @transform_1(%arg0: i32) -> (i32, i32, i32) {
    %c0_i32 = arith.constant 0 : i32
    %c0_i32_0 = arith.constant 0 : i32
    %c0_i32_1 = arith.constant 0 : i32
    %c0_i32_2 = arith.constant 0 : i32
    return %c0_i32, %c0_i32_0, %c0_i32_1 : i32, i32, i32
  }
  func.func @transform_2(%arg0: i32) -> (i32, i32) {
    %c0_i32 = arith.constant 0 : i32
    %c0_i32_0 = arith.constant 0 : i32
    %c0_i32_1 = arith.constant 0 : i32
    return %c0_i32, %c0_i32_0 : i32, i32
  }
  func.func @transform_3(%arg0: i32) -> (i32, i32) {
    %c0_i32 = arith.constant 0 : i32
    %c0_i32_0 = arith.constant 0 : i32
    %c0_i32_1 = arith.constant 0 : i32
    return %c0_i32, %c0_i32_0 : i32, i32
  }
  func.func @transform_4(%arg0: i32) -> (i32, i32) {
    %c0_i32 = arith.constant 0 : i32
    %c0_i32_0 = arith.constant 0 : i32
    %c0_i32_1 = arith.constant 0 : i32
    return %c0_i32, %c0_i32_0 : i32, i32
  }
  func.func @transform_5(%arg0: i32) -> (i32, i32, i32, i32) {
    %c0_i32 = arith.constant 0 : i32
    %c0_i32_0 = arith.constant 0 : i32
    %c0_i32_1 = arith.constant 0 : i32
    %c0_i32_2 = arith.constant 0 : i32
    return %arg0, %c0_i32, %c0_i32_0, %c0_i32_1 : i32, i32, i32, i32
  }
}

</mosaic_0001>

<bundles_post_ra>
// kernel: tpu_custom_call.1
= control target key start
LH: loop header
LB: loop body
LE: loop exit
PB: predicated region body
PF: predicated region fallthrough
CT: control target
= control target key end

     0   :  { %10 = vsyncpa [#allocation4], 0  ;;  %s2938_s0 = inlined_call_operand.hbm [shape: f32[2,4,8,128], index: 0, kind: input, shape index: {}]   ;;  %s2939_s1 = inlined_call_operand.hbm [shape: f32[25,128,128], index: 1, kind: input, shape index: {}]   ;;  %s2940_s2 = inlined_call_operand.vmem [shape: f32[128,8], index: 2, kind: input, shape index: {}]   ;;  %s2941_s3 = inlined_call_operand.hbm [shape: f32[8,128], index: 3, kind: input, shape index: {}]   ;;  %s2942_s4 = inlined_call_operand.hbm [shape: f32[17,128], index: 4, kind: input, shape index: {}]   ;;  %s2943_s5 = inlined_call_operand.hbm [shape: f32[2,4,8,128], index: 5, kind: output, shape index: {}]  }
   0x1   :  { %12 = vsyncpa [#allocation4 + $0x1], 0 }
   0x2   :  { %13 = vsyncpa [#allocation7], 0 }
   0x3   :  { %14 = vsyncpa [#allocation10], 0 }
   0x4   :  { %15 = vsyncpa [#allocation5], 0 }
   0x5   :  { %17 = vsyncpa [#allocation5 + $0x1], 0  ;;  %s2475_s18 = smov 0   ;;  %s2477_s19 = smov 0  }
   0x6   :  { %s2479_s20 = smov 0   ;;  %s2481_s21 = smov 0  }
   0x7 LB: > { %s2496_s22 = sadd.s32 4294967295, %s2435_s21   ;;  %s2098_s23 = sadd.s32 4294967294, %s2435_s21   ;;  %s2435_s21 = sphi %s2481_s21, %s2956_s21   ;;  %s2431_s20 = sphi %s2479_s20, %s2955_s20   ;;  %s2427_s19 = sphi %s2477_s19, %s2954_s19   ;;  %s2423_s18 = sphi %s2475_s18, %s2953_s18  }
   0x8   : > { %p43_p0 = scmp.ne.s32.totalorder %s2427_s19, %s2423_s18  ;;  %p44_p1 = scmp.eq.s32.totalorder %s2496_s22, 0 }
   0x9   : > { %p151_p2 = scmp.eq.s32.totalorder %s2496_s22, 1  ;;  %p157_p3 = scmp.eq.s32.totalorder %s2098_s23, 1 }
   0xa   : > { %p2505_p4 = por %p44_p1, %p43_p0  ;;  %p2099_p5 = scmp.ge.s32.totalorder %s2435_s21, 1 }
   0xb   : > { %p2510_p6 = por %p157_p3, %p43_p0  ;;  %p164_p7 = scmp.lt.s32.totalorder %s2435_s21, 3 }
   0xc   : > { %s175_s28 = sshll.u32 %s2939_s1, 4  ;;  %s2437_s30 = smov [#allocation6]   ;;  %s176_s28 = int_to_ptr.hbm [resolvable:$true] %s175_s28 }
   0xd   : > { %p2518_p8 = pnand %p2099_p5, %p164_p7  ;;  %s177_s6 = sshll.u32 %s2437_s30, 4  ;;  %s178_s6 = int_to_ptr.vmem [resolvable:$true] %s177_s6 }
   0xe   : > { %s193_s10 = sshll.u32 %s2941_s3, 4  ;;  %s2944_s11 = smov 128   ;;  %s194_s10 = int_to_ptr.hbm [resolvable:$true] %s193_s10 }
   0xf   : > { %p2153_p9 = pneg %p2518_p8  ;;  %s2439_s12 = smov 8  }
  0x10   : > { %s2440_s13 = smov [#allocation8]   ;;  %s204_s17 = sshll.u32 %s2942_s4, 4  ;;  %s205_s17 = int_to_ptr.hbm [resolvable:$true] %s204_s17 }
  0x11   : > { %p2526_p10 = pnand %p2153_p9, %p44_p1  ;;  %s195_s14 = sshll.u32 %s2440_s13, 4  ;;  %s196_s14 = int_to_ptr.vmem [resolvable:$true] %s195_s14 }
  0x12   : > { %s2441_s23 = smov [#allocation9]   ;;  %s2545_s27 = sadd.s32 1, %s2435_s21  }
  0x13   : > { %2156 = dma.hbm_to_vmem [thread:$0]  (!%p2526_p10), %s176_s28, 51200, %s178_s6, [#allocation7], %s2944_s11, %s2944_s11, %s2439_s12  }
  0x14   : > { %2159 = dma.hbm_to_vmem [thread:$0]  (!%p2526_p10), %s194_s10, 128, %s196_s14, [#allocation7]  }
  0x15   : > { %s206_s26 = sshll.u32 %s2441_s23, 4  ;;  %s27_s28 = ssub.s32 %s2435_s21, %s2545_s27  ;;  %s207_s26 = int_to_ptr.vmem [resolvable:$true] %s206_s26 }
  0x16   : > { %2162 = dma.hbm_to_vmem [thread:$0]  (!%p2526_p10), %s205_s17, 384, %s207_s26, [#allocation10], %s2944_s11, %s2944_s11, %s2439_s12  }
  0x17   : > { %s30_s30 = sadd.s32 1, %s2431_s20  ;;  %p28_p12 = scmp.eq.s32.totalorder %s27_s28, 0 }
  0x18   : > { %p37_p13 = scmp.ne.s32.totalorder %s2431_s20, %s2427_s19  ;;  %p38_p0 = scmp.eq.s32.totalorder %s2435_s21, 0 }
  0x19   : > { %s2559_s6 = scalar_select %p28_p12, %s2431_s20, %s30_s30  }
  0x1a   : > { %p2563_p3 = por %p151_p2, %p37_p13  ;;  %p2174_p5 = scmp.lt.s32.totalorder %s2435_s21, 2 }
  0x1b   : > { %s220_s9 = sand.u32 1, %s2431_s20   ;;  %s2119_s7 = sshll.u32 %s2435_s21, 5 }
  0x1c   : > { %p39_p7 = por %p38_p0, %p37_p13  ;;  %s2104_s10 = sshll.u32 %s220_s9, 5 }
  0x1d   : > { %s229_s15 = scalar_lea.hbm %s2938_s0, %s2119_s7  ;;  %s224_s17 = scalar_lea.vmem [#allocation3], %s2104_s10 }
  0x1e   : > { %s230_s16 = sshll.u32 %s229_s15, 4  ;;  %s232_s23 = sshll.u32 %s224_s17, 4  ;;  %s231_s16 = int_to_ptr.hbm [resolvable:$true] %s230_s16  ;;  %s233_s23 = int_to_ptr.vmem [resolvable:$true] %s232_s23 }
  0x1f   : > { %p2573_p9 = pnand %p2174_p5, %p39_p7  ;;  %s221_s28 = scalar_lea.sflag [#allocation4], %s220_s9 }
  0x20   : > { %s2331_s30 = sshra.s32 %s231_s16, 4  ;;  %s2338_s10 = scalar_lea.hbm %s2938_s0, 64  ;;  %s2332_s30 = int_to_ptr.hbm [resolvable:$true] %s2331_s30 }
  0x21   : > { %s2333_s11 = scalar_lea.hbm %s2332_s30, 32  ;;  %p2335_p10 = pneg %p2573_p9 }
  0x22   : > { %p2334_p2 = scmp.ne.s32.totalorder %s2332_s30, %s2333_s11  ;;  %p2339_p0 = scmp.lt.s32.totalorder %s2332_s30, %s2938_s0 }
  0x23   : > { %p2340_p5 = scmp.lt.s32.totalorder %s2338_s10, %s2333_s11 }
  0x24   : > { %p2336_p12 = pnand %p2335_p10, %p2334_p2 }
  0x25   : > { %p2341_p7 = por %p2340_p5, %p2339_p0 }
  0x26   : > { %p2337_p13 = pneg %p2336_p12 }
  0x28   : > { %p2342_p11 = pnand %p2341_p7, %p2337_p13 }
  0x2a   : > { %2345 = shalt.err (!%p2342_p11)
}
  0x2b   : > { %s2951_s9 = smov 128   ;;  %244 = sbr.rel (%p2518_p8) target bundleno = 823 (0x337), region = 40 }
  0x2c   : > { %2166 = dma.hbm_to_vmem [thread:$0]  (!%p2573_p9), %s231_s16, 512, %s233_s23, %s221_s28, %s2951_s9, %s2951_s9, %s2439_s12  }
  0x2d   : > { %s2593_s17 = sand.u32 (!%p2518_p8), 1, %s2427_s19  }
  0x2e   : > { %s2108_s11 = sshll.u32 (!%p2518_p8), %s2593_s17, 5  ;;  %s247_s30 = scalar_lea.sflag (!%p2518_p8), [#allocation4], %s2593_s17 }
  0x2f   : > { %s2599_s7 = scalar_lea.vmem (!%p2518_p8), [#allocation3], %s2108_s11 }
  0x30   : > { %2406 = dma.done.wait (%p2505_p4), %s247_s30, 512  }
  0x31   : > { %2408 = vsyncadd (%p2505_p4), %s247_s30, 4294966784 }
  0x32   : > { %2410 = dma.done.wait (%p44_p1), [#allocation7], 51328  }
  0x33   : > { %2412 = vsyncadd (%p44_p1), [#allocation7], 4294915968 }
  0x34   : > { %2414 = dma.done.wait (%p44_p1), [#allocation10], 384  }
  0x35   : > { %2416 = vsyncadd (%p44_p1), [#allocation10], 4294966912  ;;  %v2442_v0 = vmov 0.0   ;;  %v359_v1 = vld [vmem:[#allocation6 + $0xf8] sm:$0xff]  ;;  %v358_v4 = vld [vmem:[#allocation6 + $0xf0] sm:$0xff]  ;;  %vm1691_vm0 = vcmask 1040384  }
  0x36   : > { %293 = vst [vmem:[#allocation2] sm:$0xff] %v2442_v0  ;;  %v438_v2 = vld [vmem:[#allocation6 + $0x178] sm:$0xff]  ;;  %360 = vmatpush.msra.mxu0 %v359_v1  ;;  %v437_v6 = vld [vmem:[#allocation6 + $0x170] sm:$0xff]  ;;  %v357_v8 = vld [vmem:[#allocation6 + $0xe8] sm:$0xff]  ;;  %vm1730_vm1 = vcmask 64512   ;;  %s2120_s28 = sshll.u32 %s2496_s22, 5 }
  0x37   : > { %294 = vst [vmem:[#allocation2 + $0x8] sm:$0xf] %v2442_v0  ;;  %v492_v3 = vld [vmem:[#allocation6 + $0x1f8] sm:$0xff]  ;;  %439 = vmatpush.msra.mxu2 %v438_v2  ;;  %v491_v7 = vld [vmem:[#allocation6 + $0x1f0] sm:$0xff]  ;;  %v436_v10 = vld [vmem:[#allocation6 + $0x168] sm:$0xff]  ;;  %s1992_s14 = scalar_lea.hbm %s2943_s5, %s2120_s28  ;;  %s292_s22 = scalar_lea.vmem [#allocation11], %s2108_s11 }
  0x38   : > { %295 = vst [vmem:[#allocation2 + $0x10] sm:$0xff] %v2442_v0  ;;  %v338_v5 = vld [vmem:[#allocation6 + $0x78] sm:$0xff]  ;;  %493 = vmatpush.msra.mxu3 %v492_v3  ;;  %v337_v9 = vld [vmem:[#allocation6 + $0x70] sm:$0xff]  ;;  %361 = vmatpush.msra.mxu0 %v358_v4  ;;  %v490_v11 = vld [vmem:[#allocation6 + $0x1e8] sm:$0xff]  ;;  %s1993_s15 = sshll.u32 %s292_s22, 4  ;;  %s1995_s9 = sshll.u32 %s1992_s14, 4  ;;  %s1994_s15 = int_to_ptr.vmem [resolvable:$true] %s1993_s15  ;;  %s1996_s9 = int_to_ptr.hbm [resolvable:$true] %s1995_s9 }
  0x39   : > { %296 = vst [vmem:[#allocation2 + $0x18] sm:$0xf] %v2442_v0  ;;  %389 = vmatpush.msra.mxu1 %v338_v5  ;;  %440 = vmatpush.msra.mxu2 %v437_v6  ;;  %v356_v12 = vld [vmem:[#allocation6 + $0xe0] sm:$0xff]  ;;  %v336_v13 = vld [vmem:[#allocation6 + $0x68] sm:$0xff]  ;;  %v355_v17 = vld [vmem:[#allocation6 + $0xd8] sm:$0xff]  ;;  %s1981_s30 = scalar_lea.sflag [#allocation5], %s2593_s17 }
  0x3a   : > { %298 = vst [vmem:[#allocation2 + $0x60] sm:$0xff] %v2442_v0  ;;  %494 = vmatpush.msra.mxu3 %v491_v7  ;;  %v435_v14 = vld [vmem:[#allocation6 + $0x160] sm:$0xff]  ;;  %362 = vmatpush.msra.mxu0 %v357_v8  ;;  %v434_v18 = vld [vmem:[#allocation6 + $0x158] sm:$0xff]  ;;  %v354_v21 = vld [vmem:[#allocation6 + $0xd0] sm:$0xff]  ;;  %s2381_s12 = scalar_lea.hbm %s2943_s5, 64 }
  0x3b   : > { %299 = vst [vmem:[#allocation2 + $0x68] sm:$0xf] %v2442_v0  ;;  %390 = vmatpush.msra.mxu1 %v337_v9  ;;  %441 = vmatpush.msra.mxu2 %v436_v10  ;;  %v489_v15 = vld [vmem:[#allocation6 + $0x1e0] sm:$0xff]  ;;  %v488_v19 = vld [vmem:[#allocation6 + $0x1d8] sm:$0xff]  ;;  %v433_v22 = vld [vmem:[#allocation6 + $0x150] sm:$0xff] }
  0x3c   : > { %300 = vst [vmem:[#allocation2 + $0x70] sm:$0xff] %v2442_v0  ;;  %v335_v16 = vld [vmem:[#allocation6 + $0x60] sm:$0xff]  ;;  %495 = vmatpush.msra.mxu3 %v490_v11  ;;  %363 = vmatpush.msra.mxu0 %v356_v12  ;;  %v334_v20 = vld [vmem:[#allocation6 + $0x58] sm:$0xff]  ;;  %v487_v23 = vld [vmem:[#allocation6 + $0x1d0] sm:$0xff] }
  0x3d   : > { %301 = vst [vmem:[#allocation2 + $0x78] sm:$0xf] %v2442_v0  ;;  %391 = vmatpush.msra.mxu1 %v336_v13  ;;  %442 = vmatpush.msra.mxu2 %v435_v14  ;;  %v333_v24 = vld [vmem:[#allocation6 + $0x50] sm:$0xff]  ;;  %v353_v25 = vld [vmem:[#allocation6 + $0xc8] sm:$0xff]  ;;  %v352_v29 = vld [vmem:[#allocation6 + $0xc0] sm:$0xff] }
  0x3e   : > { %303 = vst [vmem:[#allocation2 + $0x20] sm:$0x3] %v2442_v0  ;;  %496 = vmatpush.msra.mxu3 %v489_v15  ;;  %364 = vmatpush.msra.mxu0 %v355_v17  ;;  %v432_v26 = vld [vmem:[#allocation6 + $0x148] sm:$0xff]  ;;  %v431_v30 = vld [vmem:[#allocation6 + $0x140] sm:$0xff]  ;;  %v351_v33 = vld [vmem:[#allocation6 + $0xb8] sm:$0xff] }
  0x3f   : > { %304 = vst [vmem:[#allocation2 + $0x30] sm:$0x3] %v2442_v0  ;;  %392 = vmatpush.msra.mxu1 %v335_v16  ;;  %443 = vmatpush.msra.mxu2 %v434_v18  ;;  %v486_v27 = vld [vmem:[#allocation6 + $0x1c8] sm:$0xff]  ;;  %v485_v31 = vld [vmem:[#allocation6 + $0x1c0] sm:$0xff]  ;;  %v430_v34 = vld [vmem:[#allocation6 + $0x138] sm:$0xff] }
  0x40   : > { %305 = vst [vmem:[#allocation2 + $0x40] sm:$0x3] %v2442_v0  ;;  %497 = vmatpush.msra.mxu3 %v488_v19  ;;  %365 = vmatpush.msra.mxu0 %v354_v21  ;;  %v332_v28 = vld [vmem:[#allocation6 + $0x48] sm:$0xff]  ;;  %v331_v32 = vld [vmem:[#allocation6 + $0x40] sm:$0xff]  ;;  %v484_v35 = vld [vmem:[#allocation6 + $0x1b8] sm:$0xff] }
  0x41   : > { %306 = vst [vmem:[#allocation2 + $0x50] sm:$0x3] %v2442_v0  ;;  %393 = vmatpush.msra.mxu1 %v334_v20  ;;  %444 = vmatpush.msra.mxu2 %v433_v22  ;;  %v330_v36 = vld [vmem:[#allocation6 + $0x38] sm:$0xff]  ;;  %v350_v37 = vld [vmem:[#allocation6 + $0xb0] sm:$0xff]  ;;  %v349_v41 = vld [vmem:[#allocation6 + $0xa8] sm:$0xff] }
  0x42   : > { %307 = vst [vmem:[#allocation2 + $0x2a] sm:$0x3] %v2442_v0  ;;  %498 = vmatpush.msra.mxu3 %v487_v23  ;;  %366 = vmatpush.msra.mxu0 %v353_v25  ;;  %v429_v38 = vld [vmem:[#allocation6 + $0x130] sm:$0xff]  ;;  %v428_v42 = vld [vmem:[#allocation6 + $0x128] sm:$0xff]  ;;  %v348_v45 = vld [vmem:[#allocation6 + $0xa0] sm:$0xff] }
  0x43   : > { %308 = vst [vmem:[#allocation2 + $0x3a] sm:$0x3] %v2442_v0  ;;  %394 = vmatpush.msra.mxu1 %v333_v24  ;;  %445 = vmatpush.msra.mxu2 %v432_v26  ;;  %v483_v39 = vld [vmem:[#allocation6 + $0x1b0] sm:$0xff]  ;;  %v482_v43 = vld [vmem:[#allocation6 + $0x1a8] sm:$0xff]  ;;  %v427_v46 = vld [vmem:[#allocation6 + $0x120] sm:$0xff] }
  0x44   : > { %309 = vst [vmem:[#allocation2 + $0x4a] sm:$0x3] %v2442_v0  ;;  %499 = vmatpush.msra.mxu3 %v486_v27  ;;  %367 = vmatpush.msra.mxu0 %v352_v29  ;;  %v329_v40 = vld [vmem:[#allocation6 + $0x30] sm:$0xff]  ;;  %v328_v44 = vld [vmem:[#allocation6 + $0x28] sm:$0xff]  ;;  %v481_v47 = vld [vmem:[#allocation6 + $0x1a0] sm:$0xff] }
  0x45   : > { %310 = vst [vmem:[#allocation2 + $0x5a] sm:$0x3] %v2442_v0  ;;  %395 = vmatpush.msra.mxu1 %v332_v28  ;;  %446 = vmatpush.msra.mxu2 %v431_v30  ;;  %v327_v48 = vld [vmem:[#allocation6 + $0x20] sm:$0xff]  ;;  %v347_v49 = vld [vmem:[#allocation6 + $0x98] sm:$0xff]  ;;  %v346_v53 = vld [vmem:[#allocation6 + $0x90] sm:$0xff] }
  0x46   : > { %500 = vmatpush.msra.mxu3 %v485_v31  ;;  %368 = vmatpush.msra.mxu0 %v351_v33  ;;  %v426_v50 = vld [vmem:[#allocation6 + $0x118] sm:$0xff]  ;;  %v425_v54 = vld [vmem:[#allocation6 + $0x110] sm:$0xff]  ;;  %v345_v57 = vld [vmem:[#allocation6 + $0x88] sm:$0xff] }
  0x47   : > { %396 = vmatpush.msra.mxu1 %v331_v32  ;;  %447 = vmatpush.msra.mxu2 %v430_v34  ;;  %v480_v51 = vld [vmem:[#allocation6 + $0x198] sm:$0xff]  ;;  %v479_v55 = vld [vmem:[#allocation6 + $0x190] sm:$0xff]  ;;  %v424_v58 = vld [vmem:[#allocation6 + $0x108] sm:$0xff] }
  0x48   : > { %501 = vmatpush.msra.mxu3 %v484_v35  ;;  %369 = vmatpush.msra.mxu0 %v350_v37  ;;  %v326_v52 = vld [vmem:[#allocation6 + $0x18] sm:$0xff]  ;;  %v325_v56 = vld [vmem:[#allocation6 + $0x10] sm:$0xff]  ;;  %v478_v59 = vld [vmem:[#allocation6 + $0x188] sm:$0xff] }
  0x49   : > { %397 = vmatpush.msra.mxu1 %v330_v36  ;;  %448 = vmatpush.msra.mxu2 %v429_v38  ;;  %v324_v60 = vld [vmem:[#allocation6 + $0x8] sm:$0xff]  ;;  %v344_v61 = vld [vmem:[#allocation6 + $0x80] sm:$0xff]  ;;  %v709_v4 = vld [vmem:[#allocation6 + $0x3f8] sm:$0xff] }
  0x4a   : > { %502 = vmatpush.msra.mxu3 %v483_v39  ;;  %370 = vmatpush.msra.mxu0 %v349_v41  ;;  %v423_v62 = vld [vmem:[#allocation6 + $0x100] sm:$0xff]  ;;  %v546_v6 = vld [vmem:[#allocation6 + $0x278] sm:$0xff]  ;;  %v708_v8 = vld [vmem:[#allocation6 + $0x3f0] sm:$0xff] }
  0x4b   : > { %398 = vmatpush.msra.mxu1 %v329_v40  ;;  %449 = vmatpush.msra.mxu2 %v428_v42  ;;  %v477_v63 = vld [vmem:[#allocation6 + $0x180] sm:$0xff]  ;;  %v655_v7 = vld [vmem:[#allocation6 + $0x378] sm:$0xff]  ;;  %v545_v10 = vld [vmem:[#allocation6 + $0x270] sm:$0xff] }
  0x4c   : > { %503 = vmatpush.msra.mxu3 %v482_v43  ;;  %371 = vmatpush.msra.mxu0 %v348_v45  ;;  %v339_v1 = vld [vmem:[#allocation2 + $0x1] sm:$0xff]  ;;  %v601_v11 = vld [vmem:[#allocation6 + $0x2f8] sm:$0xff]  ;;  %v654_v12 = vld [vmem:[#allocation6 + $0x370] sm:$0xff] }
  0x4d   : > { %399 = vmatpush.msra.mxu1 %v328_v44  ;;  %450 = vmatpush.msra.mxu2 %v427_v46  ;;  %v418_v2 = vld [vmem:[#allocation2 + $0x2] sm:$0xff]  ;;  %v600_v15 = vld [vmem:[#allocation6 + $0x2f0] sm:$0xff]  ;;  %v705_v25 = vld [vmem:[#allocation6 + $0x3d8] sm:$0xff] }
  0x4e   : > { %504 = vmatpush.msra.mxu3 %v481_v47  ;;  %372 = vmatpush.msra.mxu0 %v347_v49  ;;  %v472_v3 = vld [vmem:[#allocation2 + $0x3] sm:$0xff]  ;;  %v2634_v21 = vld [vmem:[#allocation2 + $0x11] sm:$0xff] }
  0x4f   : > { %400 = vmatpush.msra.mxu1 %v327_v48  ;;  %451 = vmatpush.msra.mxu2 %v426_v50  ;;  %v323_v5 = vld [vmem:[#allocation6] sm:$0xff]  ;;  %v707_v13 = vld [vmem:[#allocation6 + $0x3e8] sm:$0xff]  ;;  %v2639_v23 = vld [vmem:[#allocation2 + $0x12] sm:$0xff] }
  0x50   : > { %505 = vmatpush.msra.mxu3 %v480_v51  ;;  %373 = vmatpush.msra.mxu0 %v346_v53  ;;  %v2630_v9 = vld [vmem:[%s2599_s7] sm:$0xff]  ;;  %v544_v14 = vld [vmem:[#allocation6 + $0x268] sm:$0xff]  ;;  %v2641_v24 = vld [vmem:[#allocation2 + $0x13] sm:$0xff] }
  0x51   : > { %401 = vmatpush.msra.mxu1 %v326_v52  ;;  %452 = vmatpush.msra.mxu2 %v425_v54  ;;  %315 = vst [vmem:[#allocation2 + $0x22] sm:$0xff] %v2630_v9  ;;  %v653_v16 = vld [vmem:[#allocation6 + $0x368] sm:$0xff]  ;;  %v706_v17 = vld [vmem:[#allocation6 + $0x3e0] sm:$0xff]  ;;  %v542_v26 = vld [vmem:[#allocation6 + $0x258] sm:$0xff] }
  0x52   : > { %506 = vmatpush.msra.mxu3 %v479_v55  ;;  %374 = vmatpush.msra.mxu0 %v345_v57  ;;  %v543_v18 = vld [vmem:[#allocation6 + $0x260] sm:$0xff]  ;;  %v599_v19 = vld [vmem:[#allocation6 + $0x2e8] sm:$0xff]  ;;  %v651_v28 = vld [vmem:[#allocation6 + $0x358] sm:$0xff] }
  0x53   : > { %402 = vmatpush.msra.mxu1 %v325_v56  ;;  %453 = vmatpush.msra.mxu2 %v424_v58  ;;  %v652_v20 = vld [vmem:[#allocation6 + $0x360] sm:$0xff]  ;;  %v2637_v22 = vld [vmem:[%s2599_s7 + $0x8] sm:$0xff]  ;;  %v704_v29 = vld [vmem:[#allocation6 + $0x3d0] sm:$0xff] }
  0x54   : > { %507 = vmatpush.msra.mxu3 %v478_v59  ;;  %375 = vmatpush.msra.mxu0 %v344_v61  ;;  %316 = vst [vmem:[#allocation2 + $0x32] sm:$0xff] %v2637_v22  ;;  %v598_v27 = vld [vmem:[#allocation6 + $0x2e0] sm:$0xff]  ;;  %v541_v30 = vld [vmem:[#allocation6 + $0x250] sm:$0xff]  ;;  %v597_v31 = vld [vmem:[#allocation6 + $0x2d8] sm:$0xff] }
  0x55   : > { %403 = vmatpush.msra.mxu1 %v324_v60  ;;  %454 = vmatpush.msra.mxu2 %v423_v62  ;;  %v650_v32 = vld [vmem:[#allocation6 + $0x350] sm:$0xff]  ;;  %v703_v33 = vld [vmem:[#allocation6 + $0x3c8] sm:$0xff]  ;;  %v702_v37 = vld [vmem:[#allocation6 + $0x3c0] sm:$0xff] }
  0x56   : > { %508 = vmatpush.msra.mxu3 %v477_v63  ;;  %376 = vmatmul.f32.vlgmr.msra.gmra.mxu0 %v339_v1  ;;  %v540_v34 = vld [vmem:[#allocation6 + $0x248] sm:$0xff]  ;;  %v596_v35 = vld [vmem:[#allocation6 + $0x2d0] sm:$0xff]  ;;  %v539_v38 = vld [vmem:[#allocation6 + $0x240] sm:$0xff] }
  0x57   : > { %455 = vmatmul.f32.vlgmr.msra.gmra.mxu2 %v418_v2  ;;  %509 = vmatmul.f32.vlgmr.msra.gmra.mxu3 %v472_v3  ;;  %v649_v36 = vld [vmem:[#allocation6 + $0x348] sm:$0xff]  ;;  %v648_v40 = vld [vmem:[#allocation6 + $0x340] sm:$0xff]  ;;  %v701_v43 = vld [vmem:[#allocation6 + $0x3b8] sm:$0xff] }
  0x58   : > { %710 = vmatpush.msrb.mxu3 %v709_v4  ;;  %404 = vmatpush.msra.mxu1 %v323_v5  ;;  %v595_v39 = vld [vmem:[#allocation6 + $0x2c8] sm:$0xff]  ;;  %v538_v44 = vld [vmem:[#allocation6 + $0x238] sm:$0xff]  ;;  %v594_v45 = vld [vmem:[#allocation6 + $0x2c0] sm:$0xff] }
  0x59   : > { %547 = vmatpush.msrb.mxu0 %v546_v6  ;;  %656 = vmatpush.msrb.mxu2 %v655_v7  ;;  %v2648_v41 = vld [vmem:[#allocation2 + $0x21] sm:$0xff]  ;;  %v647_v46 = vld [vmem:[#allocation6 + $0x338] sm:$0xff]  ;;  %v700_v48 = vld [vmem:[#allocation6 + $0x3b0] sm:$0xff] }
  0x5a   : > { %405 = vmatmul.f32.vlgmr.msra.gmra.mxu1 %v2442_v0  ;;  %711 = vmatpush.msrb.mxu3 %v708_v8  ;;  %v2650_v42 = vld [vmem:[#allocation2 + $0x23] sm:$0xff]  ;;  %v537_v49 = vld [vmem:[#allocation6 + $0x230] sm:$0xff]  ;;  %v593_v50 = vld [vmem:[#allocation6 + $0x2b8] sm:$0xff] }
  0x5b   : > { %548 = vmatpush.msrb.mxu0 %v545_v10  ;;  %602 = vmatpush.msrb.mxu1 %v601_v11  ;;  %v2655_v47 = vld [vmem:[#allocation2 + $0x20] sm:$0xff]  ;;  %v646_v51 = vld [vmem:[#allocation6 + $0x330] sm:$0xff]  ;;  %v699_v52 = vld [vmem:[#allocation6 + $0x3a8] sm:$0xff] }
  0x5c   : > { %657 = vmatpush.msrb.mxu2 %v654_v12  ;;  %712 = vmatpush.msrb.mxu3 %v707_v13  ;;  %v536_v53 = vld [vmem:[#allocation6 + $0x228] sm:$0xff]  ;;  %v592_v54 = vld [vmem:[#allocation6 + $0x2b0] sm:$0xff]  ;;  %v698_v56 = vld [vmem:[#allocation6 + $0x3a0] sm:$0xff] }
  0x5d   : > { %549 = vmatpush.msrb.mxu0 %v544_v14  ;;  %603 = vmatpush.msrb.mxu1 %v600_v15  ;;  %v645_v55 = vld [vmem:[#allocation6 + $0x328] sm:$0xff]  ;;  %v535_v57 = vld [vmem:[#allocation6 + $0x220] sm:$0xff]  ;;  %v2658_v60 = vld [vmem:[#allocation2 + $0x31] sm:$0xff] }
  0x5e   : > { %658 = vmatpush.msrb.mxu2 %v653_v16  ;;  %713 = vmatpush.msrb.mxu3 %v706_v17  ;;  %v591_v58 = vld [vmem:[#allocation6 + $0x2a8] sm:$0xff]  ;;  %v644_v59 = vld [vmem:[#allocation6 + $0x320] sm:$0xff]  ;;  %v697_v61 = vld [vmem:[#allocation6 + $0x398] sm:$0xff] }
  0x5f   : > { %550 = vmatpush.msrb.mxu0 %v543_v18  ;;  %604 = vmatpush.msrb.mxu1 %v599_v19  ;;  %v2660_v62 = vld [vmem:[#allocation2 + $0x33] sm:$0xff]  ;;  %v590_v1 = vld [vmem:[#allocation6 + $0x2a0] sm:$0xff]  ;;  %v695_v10 = vld [vmem:[#allocation6 + $0x388] sm:$0xff] }
  0x60   : > { %659 = vmatpush.msrb.mxu2 %v652_v20  ;;  %379 = vmatmul.f32.gmra.mxu0 %v2634_v21  ;;  %v534_v63 = vld [vmem:[#allocation6 + $0x218] sm:$0xff]  ;;  %v696_v3 = vld [vmem:[#allocation6 + $0x390] sm:$0xff]  ;;  %v532_v11 = vld [vmem:[#allocation6 + $0x208] sm:$0xff] }
  0x61   : > { %458 = vmatmul.f32.gmra.mxu2 %v2639_v23  ;;  %512 = vmatmul.f32.gmra.mxu3 %v2641_v24  ;;  %v643_v2 = vld [vmem:[#allocation6 + $0x318] sm:$0xff]  ;;  %v2664_v4 = vld [vmem:[%s2599_s7 + $0x10] sm:$0xff]  ;;  %v641_v13 = vld [vmem:[#allocation6 + $0x308] sm:$0xff] }
  0x62   : > { %714 = vmatpush.msrb.mxu3 %v705_v25  ;;  %551 = vmatpush.msrb.mxu0 %v542_v26  ;;  %v2668_v5 = vld [vmem:[#allocation2 + $0x30] sm:$0xff]  ;;  %317 = vst [vmem:[#allocation2 + $0x42] sm:$0xff] %v2664_v4  ;;  %v589_v7 = vld [vmem:[#allocation6 + $0x298] sm:$0xff]  ;;  %v694_v14 = vld [vmem:[#allocation6 + $0x380] sm:$0xff] }
  0x63   : > { %605 = vmatpush.msrb.mxu1 %v598_v27  ;;  %660 = vmatpush.msrb.mxu2 %v651_v28  ;;  %v533_v6 = vld [vmem:[#allocation6 + $0x210] sm:$0xff]  ;;  %v531_v15 = vld [vmem:[#allocation6 + $0x200] sm:$0xff]  ;;  %v587_v16 = vld [vmem:[#allocation6 + $0x288] sm:$0xff] }
  0x64   : > { %408 = vmatmul.f32.gmra.mxu1 %v2442_v0  ;;  %715 = vmatpush.msrb.mxu3 %v704_v29  ;;  %v642_v8 = vld [vmem:[#allocation6 + $0x310] sm:$0xff]  ;;  %v640_v17 = vld [vmem:[#allocation6 + $0x300] sm:$0xff]  ;;  %v925_v19 = vld [vmem:[#allocation6 + $0x5f8] sm:$0xff] }
  0x65   : > { %552 = vmatpush.msrb.mxu0 %v541_v30  ;;  %606 = vmatpush.msrb.mxu1 %v597_v31  ;;  %v588_v12 = vld [vmem:[#allocation6 + $0x290] sm:$0xff]  ;;  %v526_v18 = vld [vmem:[#allocation2 + $0x4] sm:$0xff]  ;;  %v763_v25 = vld [vmem:[#allocation6 + $0x478] sm:$0xff] }
  0x66   : > { %661 = vmatpush.msrb.mxu2 %v650_v32  ;;  %716 = vmatpush.msrb.mxu3 %v703_v33  ;;  %v586_v20 = vld [vmem:[#allocation6 + $0x280] sm:$0xff]  ;;  %v871_v26 = vld [vmem:[#allocation6 + $0x578] sm:$0xff]  ;;  %v924_v27 = vld [vmem:[#allocation6 + $0x5f0] sm:$0xff] }
  0x67   : > { %553 = vmatpush.msrb.mxu0 %v540_v34  ;;  %607 = vmatpush.msrb.mxu1 %v596_v35  ;;  %v762_v28 = vld [vmem:[#allocation6 + $0x470] sm:$0xff]  ;;  %v817_v29 = vld [vmem:[#allocation6 + $0x4f8] sm:$0xff]  ;;  %v923_v31 = vld [vmem:[#allocation6 + $0x5e8] sm:$0xff] }
  0x68   : > { %662 = vmatpush.msrb.mxu2 %v649_v36  ;;  %717 = vmatpush.msrb.mxu3 %v702_v37  ;;  %v870_v30 = vld [vmem:[#allocation6 + $0x570] sm:$0xff]  ;;  %v761_v32 = vld [vmem:[#allocation6 + $0x468] sm:$0xff]  ;;  %v868_v36 = vld [vmem:[#allocation6 + $0x560] sm:$0xff] }
  0x69   : > { %554 = vmatpush.msrb.mxu0 %v539_v38  ;;  %608 = vmatpush.msrb.mxu1 %v595_v39  ;;  %v816_v33 = vld [vmem:[#allocation6 + $0x4f0] sm:$0xff]  ;;  %v869_v34 = vld [vmem:[#allocation6 + $0x568] sm:$0xff]  ;;  %v759_v38 = vld [vmem:[#allocation6 + $0x458] sm:$0xff] }
  0x6a   : > { %663 = vmatpush.msrb.mxu2 %v648_v40  ;;  %382 = vmatmul.f32.gmra.mxu0 %v2648_v41  ;;  %v815_v35 = vld [vmem:[#allocation6 + $0x4e8] sm:$0xff]  ;;  %v2675_v37 = vld [vmem:[#allocation2 + $0x14] sm:$0xff]  ;;  %v814_v39 = vld [vmem:[#allocation6 + $0x4e0] sm:$0xff] }
  0x6b   : > { %461 = vmatmul.f32.gmra.mxu2 %v2630_v9  ;;  %515 = vmatmul.f32.gmra.mxu3 %v2650_v42  ;;  %v867_v40 = vld [vmem:[#allocation6 + $0x558] sm:$0xff] }
  0x6c   : > { %718 = vmatpush.msrb.mxu3 %v701_v43  ;;  %555 = vmatpush.msrb.mxu0 %v538_v44  ;;  %v920_v43 = vld [vmem:[#allocation6 + $0x5d0] sm:$0xff] }
  0x6d   : > { %609 = vmatpush.msrb.mxu1 %v594_v45  ;;  %664 = vmatpush.msrb.mxu2 %v647_v46  ;;  %v758_v44 = vld [vmem:[#allocation6 + $0x450] sm:$0xff]  ;;  %v813_v45 = vld [vmem:[#allocation6 + $0x4d8] sm:$0xff] }
  0x6e   : > { %411 = vmatmul.f32.gmra.mxu1 %v2655_v47  ;;  %719 = vmatpush.msrb.mxu3 %v700_v48  ;;  %v866_v46 = vld [vmem:[#allocation6 + $0x550] sm:$0xff]  ;;  %v919_v48 = vld [vmem:[#allocation6 + $0x5c8] sm:$0xff] }
  0x6f   : > { %556 = vmatpush.msrb.mxu0 %v537_v49  ;;  %610 = vmatpush.msrb.mxu1 %v593_v50  ;;  %v757_v49 = vld [vmem:[#allocation6 + $0x448] sm:$0xff]  ;;  %v812_v50 = vld [vmem:[#allocation6 + $0x4d0] sm:$0xff] }
  0x70   : > { %665 = vmatpush.msrb.mxu2 %v646_v51  ;;  %720 = vmatpush.msrb.mxu3 %v699_v52  ;;  %v865_v51 = vld [vmem:[#allocation6 + $0x548] sm:$0xff]  ;;  %v918_v52 = vld [vmem:[#allocation6 + $0x5c0] sm:$0xff] }
  0x71   : > { %557 = vmatpush.msrb.mxu0 %v536_v53  ;;  %611 = vmatpush.msrb.mxu1 %v592_v54  ;;  %v756_v53 = vld [vmem:[#allocation6 + $0x440] sm:$0xff]  ;;  %v811_v54 = vld [vmem:[#allocation6 + $0x4c8] sm:$0xff] }
  0x72   : > { %666 = vmatpush.msrb.mxu2 %v645_v55  ;;  %721 = vmatpush.msrb.mxu3 %v698_v56  ;;  %v864_v55 = vld [vmem:[#allocation6 + $0x540] sm:$0xff] }
  0x73   : > { %558 = vmatpush.msrb.mxu0 %v535_v57  ;;  %612 = vmatpush.msrb.mxu1 %v591_v58  ;;  %v2681_v56 = vld [vmem:[#allocation2 + $0x24] sm:$0xff]  ;;  %v917_v57 = vld [vmem:[#allocation6 + $0x5b8] sm:$0xff] }
  0x74   : > { %667 = vmatpush.msrb.mxu2 %v644_v59  ;;  %385 = vmatmul.f32.gmra.mxu0 %v2658_v60  ;;  %v755_v58 = vld [vmem:[#allocation6 + $0x438] sm:$0xff]  ;;  %v810_v59 = vld [vmem:[#allocation6 + $0x4c0] sm:$0xff] }
  0x75   : > { %464 = vmatmul.f32.gmra.mxu2 %v2637_v22  ;;  %518 = vmatmul.f32.gmra.mxu3 %v2660_v62 }
  0x76   : > { %722 = vmatpush.msrb.mxu3 %v697_v61  ;;  %559 = vmatpush.msrb.mxu0 %v534_v63  ;;  %v863_v61 = vld [vmem:[#allocation6 + $0x538] sm:$0xff]  ;;  %v916_v63 = vld [vmem:[#allocation6 + $0x5b0] sm:$0xff] }
  0x77   : > { %613 = vmatpush.msrb.mxu1 %v590_v1  ;;  %668 = vmatpush.msrb.mxu2 %v643_v2  ;;  %v754_v1 = vld [vmem:[#allocation6 + $0x430] sm:$0xff]  ;;  %v809_v2 = vld [vmem:[#allocation6 + $0x4b8] sm:$0xff] }
  0x78   : > { %414 = vmatmul.f32.gmra.mxu1 %v2668_v5  ;;  %723 = vmatpush.msrb.mxu3 %v696_v3  ;;  %v862_v3 = vld [vmem:[#allocation6 + $0x530] sm:$0xff] }
  0x79   : > { %560 = vmatpush.msrb.mxu0 %v533_v6  ;;  %614 = vmatpush.msrb.mxu1 %v589_v7  ;;  %v915_v6 = vld [vmem:[#allocation6 + $0x5a8] sm:$0xff] }
  0x7a   : > { %669 = vmatpush.msrb.mxu2 %v642_v8  ;;  %724 = vmatpush.msrb.mxu3 %v695_v10  ;;  %v753_v7 = vld [vmem:[#allocation6 + $0x428] sm:$0xff]  ;;  %v808_v8 = vld [vmem:[#allocation6 + $0x4b0] sm:$0xff] }
  0x7b   : > { %561 = vmatpush.msrb.mxu0 %v532_v11  ;;  %615 = vmatpush.msrb.mxu1 %v588_v12  ;;  %v861_v10 = vld [vmem:[#allocation6 + $0x528] sm:$0xff]  ;;  %v914_v11 = vld [vmem:[#allocation6 + $0x5a0] sm:$0xff] }
  0x7c   : > { %670 = vmatpush.msrb.mxu2 %v641_v13  ;;  %725 = vmatpush.msrb.mxu3 %v694_v14  ;;  %v752_v12 = vld [vmem:[#allocation6 + $0x420] sm:$0xff]  ;;  %v807_v13 = vld [vmem:[#allocation6 + $0x4a8] sm:$0xff] }
  0x7d   : > { %562 = vmatpush.msrb.mxu0 %v531_v15  ;;  %616 = vmatpush.msrb.mxu1 %v587_v16  ;;  %v860_v14 = vld [vmem:[#allocation6 + $0x520] sm:$0xff]  ;;  %v2687_v15 = vld [vmem:[#allocation2 + $0x34] sm:$0xff] }
  0x7e   : > { %671 = vmatpush.msrb.mxu2 %v640_v17  ;;  %563 = vmatmul.f32.vlgmr.msrb.gmra.mxu0 %v526_v18  ;;  %v2689_v16 = vld [vmem:[#allocation2 + $0x41] sm:$0xff]  ;;  %v913_v17 = vld [vmem:[#allocation6 + $0x598] sm:$0xff] }
  0x7f   : > { %672 = vmatmul.f32.vlgmr.msrb.gmra.mxu2 %v2634_v21  ;;  %726 = vmatmul.f32.vlgmr.msrb.gmra.mxu3 %v2639_v23  ;;  %v922_v21 = vld [vmem:[#allocation6 + $0x5e0] sm:$0xff]  ;;  %v751_v18 = vld [vmem:[#allocation6 + $0x418] sm:$0xff] }
  0x80   : > { %926 = vmatpush.msra.mxu3 %v925_v19  ;;  %617 = vmatpush.msrb.mxu1 %v586_v20  ;;  %v760_v23 = vld [vmem:[#allocation6 + $0x460] sm:$0xff]  ;;  %v859_v20 = vld [vmem:[#allocation6 + $0x518] sm:$0xff] }
  0x81   : > { %764 = vmatpush.msra.mxu0 %v763_v25  ;;  %872 = vmatpush.msra.mxu2 %v871_v26  ;;  %v806_v19 = vld [vmem:[#allocation6 + $0x4a0] sm:$0xff]  ;;  %v2693_v25 = vld [vmem:[%s2599_s7 + $0x18] sm:$0xff] }
  0x82   : > { %618 = vmatmul.f32.vlgmr.msrb.gmra.mxu1 %v2442_v0  ;;  %927 = vmatpush.msra.mxu3 %v924_v27  ;;  %v921_v0 = vld [vmem:[#allocation6 + $0x5d8] sm:$0xff]  ;;  %v2697_v26 = vld [vmem:[#allocation2 + $0x40] sm:$0xff]  ;;  %v912_v27 = vld [vmem:[#allocation6 + $0x590] sm:$0xff]  ;;  %318 = vst [vmem:[#allocation2 + $0x52] sm:$0xff] %v2693_v25 }
  0x83   : > { %765 = vmatpush.msra.mxu0 %v762_v28  ;;  %818 = vmatpush.msra.mxu1 %v817_v29  ;;  %v750_v28 = vld [vmem:[#allocation6 + $0x410] sm:$0xff]  ;;  %v805_v29 = vld [vmem:[#allocation6 + $0x498] sm:$0xff] }
  0x84   : > { %873 = vmatpush.msra.mxu2 %v870_v30  ;;  %928 = vmatpush.msra.mxu3 %v923_v31  ;;  %v858_v30 = vld [vmem:[#allocation6 + $0x510] sm:$0xff]  ;;  %v911_v31 = vld [vmem:[#allocation6 + $0x588] sm:$0xff] }
  0x85   : > { %766 = vmatpush.msra.mxu0 %v761_v32  ;;  %819 = vmatpush.msra.mxu1 %v816_v33  ;;  %v749_v32 = vld [vmem:[#allocation6 + $0x408] sm:$0xff]  ;;  %v804_v33 = vld [vmem:[#allocation6 + $0x490] sm:$0xff] }
  0x86   : > { %874 = vmatpush.msra.mxu2 %v869_v34  ;;  %929 = vmatpush.msra.mxu3 %v922_v21  ;;  %v857_v34 = vld [vmem:[#allocation6 + $0x508] sm:$0xff]  ;;  %v910_v21 = vld [vmem:[#allocation6 + $0x580] sm:$0xff] }
  0x87   : > { %767 = vmatpush.msra.mxu0 %v760_v23  ;;  %820 = vmatpush.msra.mxu1 %v815_v35  ;;  %v748_v23 = vld [vmem:[#allocation6 + $0x400] sm:$0xff]  ;;  %v803_v35 = vld [vmem:[#allocation6 + $0x488] sm:$0xff] }
  0x88   : > { %875 = vmatpush.msra.mxu2 %v868_v36  ;;  %566 = vmatmul.f32.gmra.mxu0 %v2675_v37  ;;  %v856_v36 = vld [vmem:[#allocation6 + $0x500] sm:$0xff] }
  0x89   : > { %675 = vmatmul.f32.gmra.mxu2 %v2648_v41  ;;  %729 = vmatmul.f32.gmra.mxu3 %v2630_v9 }
  0x8a   : > { %930 = vmatpush.msra.mxu3 %v921_v0  ;;  %768 = vmatpush.msra.mxu0 %v759_v38  ;;  %v1142_v0 = vld [vmem:[#allocation6 + $0x7f8] sm:$0xff]  ;;  %v802_v38 = vld [vmem:[#allocation6 + $0x480] sm:$0xff] }
  0x8b   : > { %821 = vmatpush.msra.mxu1 %v814_v39  ;;  %876 = vmatpush.msra.mxu2 %v867_v40  ;;  %v979_v39 = vld [vmem:[#allocation6 + $0x678] sm:$0xff] }
  0x8c   : > { %621 = vmatmul.f32.gmra.mxu1 %v2655_v47  ;;  %931 = vmatpush.msra.mxu3 %v920_v43  ;;  %v1087_v40 = vld [vmem:[#allocation6 + $0x778] sm:$0xff]  ;;  %v1141_v43 = vld [vmem:[#allocation6 + $0x7f0] sm:$0xff] }
  0x8d   : > { %769 = vmatpush.msra.mxu0 %v758_v44  ;;  %822 = vmatpush.msra.mxu1 %v813_v45  ;;  %v978_v44 = vld [vmem:[#allocation6 + $0x670] sm:$0xff]  ;;  %v1033_v45 = vld [vmem:[#allocation6 + $0x6f8] sm:$0xff] }
  0x8e   : > { %877 = vmatpush.msra.mxu2 %v866_v46  ;;  %932 = vmatpush.msra.mxu3 %v919_v48  ;;  %v1086_v46 = vld [vmem:[#allocation6 + $0x770] sm:$0xff]  ;;  %v1140_v48 = vld [vmem:[#allocation6 + $0x7e8] sm:$0xff] }
  0x8f   : > { %770 = vmatpush.msra.mxu0 %v757_v49  ;;  %823 = vmatpush.msra.mxu1 %v812_v50  ;;  %v977_v49 = vld [vmem:[#allocation6 + $0x668] sm:$0xff] }
  0x90   : > { %878 = vmatpush.msra.mxu2 %v865_v51  ;;  %933 = vmatpush.msra.mxu3 %v918_v52  ;;  %v1085_v50 = vld [vmem:[#allocation6 + $0x768] sm:$0xff]  ;;  %v1084_v52 = vld [vmem:[#allocation6 + $0x760] sm:$0xff] }
  0x91   : > { %771 = vmatpush.msra.mxu0 %v756_v53  ;;  %824 = vmatpush.msra.mxu1 %v811_v54  ;;  %v1031_v51 = vld [vmem:[#allocation6 + $0x6e8] sm:$0xff]  ;;  %v1138_v53 = vld [vmem:[#allocation6 + $0x7d8] sm:$0xff]  ;;  %v1030_v54 = vld [vmem:[#allocation6 + $0x6e0] sm:$0xff] }
  0x92   : > { %879 = vmatpush.msra.mxu2 %v864_v55  ;;  %569 = vmatmul.f32.gmra.mxu0 %v2681_v56  ;;  %v1083_v55 = vld [vmem:[#allocation6 + $0x758] sm:$0xff] }
  0x93   : > { %678 = vmatmul.f32.gmra.mxu2 %v2658_v60  ;;  %732 = vmatmul.f32.gmra.mxu3 %v2637_v22 }
  0x94   : > { %934 = vmatpush.msra.mxu3 %v917_v57  ;;  %772 = vmatpush.msra.mxu0 %v755_v58  ;;  %v1137_v57 = vld [vmem:[#allocation6 + $0x7d0] sm:$0xff] }
  0x95   : > { %825 = vmatpush.msra.mxu1 %v810_v59  ;;  %880 = vmatpush.msra.mxu2 %v863_v61  ;;  %v974_v58 = vld [vmem:[#allocation6 + $0x650] sm:$0xff]  ;;  %v1029_v59 = vld [vmem:[#allocation6 + $0x6d8] sm:$0xff] }
  0x96   : > { %624 = vmatmul.f32.gmra.mxu1 %v2668_v5  ;;  %935 = vmatpush.msra.mxu3 %v916_v63  ;;  %v1082_v61 = vld [vmem:[#allocation6 + $0x750] sm:$0xff]  ;;  %v1136_v63 = vld [vmem:[#allocation6 + $0x7c8] sm:$0xff] }
  0x97   : > { %773 = vmatpush.msra.mxu0 %v754_v1  ;;  %826 = vmatpush.msra.mxu1 %v809_v2  ;;  %v973_v1 = vld [vmem:[#allocation6 + $0x648] sm:$0xff]  ;;  %v1028_v2 = vld [vmem:[#allocation6 + $0x6d0] sm:$0xff] }
  0x98   : > { %881 = vmatpush.msra.mxu2 %v862_v3  ;;  %936 = vmatpush.msra.mxu3 %v915_v6  ;;  %v1081_v3 = vld [vmem:[#allocation6 + $0x748] sm:$0xff]  ;;  %v1135_v6 = vld [vmem:[#allocation6 + $0x7c0] sm:$0xff] }
  0x99   : > { %774 = vmatpush.msra.mxu0 %v753_v7  ;;  %827 = vmatpush.msra.mxu1 %v808_v8  ;;  %v1027_v7 = vld [vmem:[#allocation6 + $0x6c8] sm:$0xff]  ;;  %v1080_v8 = vld [vmem:[#allocation6 + $0x740] sm:$0xff] }
  0x9a   : > { %882 = vmatpush.msra.mxu2 %v861_v10  ;;  %937 = vmatpush.msra.mxu3 %v914_v11  ;;  %v1134_v10 = vld [vmem:[#allocation6 + $0x7b8] sm:$0xff] }
  0x9b   : > { %775 = vmatpush.msra.mxu0 %v752_v12  ;;  %828 = vmatpush.msra.mxu1 %v807_v13  ;;  %v971_v11 = vld [vmem:[#allocation6 + $0x638] sm:$0xff]  ;;  %v1026_v12 = vld [vmem:[#allocation6 + $0x6c0] sm:$0xff] }
  0x9c   : > { %883 = vmatpush.msra.mxu2 %v860_v14  ;;  %572 = vmatmul.f32.gmra.mxu0 %v2687_v15  ;;  %v1079_v13 = vld [vmem:[#allocation6 + $0x738] sm:$0xff]  ;;  %v1133_v14 = vld [vmem:[#allocation6 + $0x7b0] sm:$0xff] }
  0x9d   : > { %681 = vmatmul.f32.gmra.mxu2 %v2689_v16  ;;  %735 = vmatmul.f32.gmra.mxu3 %v2664_v4 }
  0x9e   : > { %938 = vmatpush.msra.mxu3 %v913_v17  ;;  %776 = vmatpush.msra.mxu0 %v751_v18  ;;  %v970_v17 = vld [vmem:[#allocation6 + $0x630] sm:$0xff]  ;;  %v1025_v18 = vld [vmem:[#allocation6 + $0x6b8] sm:$0xff] }
  0x9f   : > { %829 = vmatpush.msra.mxu1 %v806_v19  ;;  %884 = vmatpush.msra.mxu2 %v859_v20  ;;  %v1078_v19 = vld [vmem:[#allocation6 + $0x730] sm:$0xff]  ;;  %v1132_v20 = vld [vmem:[#allocation6 + $0x7a8] sm:$0xff] }
  0xa0   : > { %627 = vmatmul.f32.gmra.mxu1 %v2697_v26  ;;  %939 = vmatpush.msra.mxu3 %v912_v27  ;;  %v969_v27 = vld [vmem:[#allocation6 + $0x628] sm:$0xff] }
  0xa1   : > { %777 = vmatpush.msra.mxu0 %v750_v28  ;;  %830 = vmatpush.msra.mxu1 %v805_v29  ;;  %v1024_v28 = vld [vmem:[#allocation6 + $0x6b0] sm:$0xff]  ;;  %v1077_v29 = vld [vmem:[#allocation6 + $0x728] sm:$0xff] }
  0xa2   : > { %885 = vmatpush.msra.mxu2 %v858_v30  ;;  %940 = vmatpush.msra.mxu3 %v911_v31  ;;  %v1131_v30 = vld [vmem:[#allocation6 + $0x7a0] sm:$0xff] }
  0xa3   : > { %778 = vmatpush.msra.mxu0 %v749_v32  ;;  %831 = vmatpush.msra.mxu1 %v804_v33  ;;  %v968_v31 = vld [vmem:[#allocation6 + $0x620] sm:$0xff]  ;;  %v1023_v32 = vld [vmem:[#allocation6 + $0x6a8] sm:$0xff] }
  0xa4   : > { %886 = vmatpush.msra.mxu2 %v857_v34  ;;  %941 = vmatpush.msra.mxu3 %v910_v21  ;;  %v1076_v33 = vld [vmem:[#allocation6 + $0x720] sm:$0xff]  ;;  %v2715_v21 = vld [vmem:[#allocation2 + $0x50] sm:$0xff] }
  0xa5   : > { %779 = vmatpush.msra.mxu0 %v748_v23  ;;  %832 = vmatpush.msra.mxu1 %v803_v35  ;;  %v2713_v34 = vld [vmem:[#allocation2 + $0x43] sm:$0xff]  ;;  %v2717_v23 = vld [vmem:[#allocation2 + $0x51] sm:$0xff] }
  0xa6   : > { %887 = vmatpush.msra.mxu2 %v856_v36  ;;  %780 = vmatmul.f32.vlgmr.msra.gmra.mxu0 %v2641_v24  ;;  %v1032_v24 = vld [vmem:[#allocation6 + $0x6f0] sm:$0xff]  ;;  %v1130_v35 = vld [vmem:[#allocation6 + $0x798] sm:$0xff] }
  0xa7   : > { %888 = vmatmul.f32.vlgmr.msra.gmra.mxu2 %v2655_v47  ;;  %942 = vmatmul.f32.vlgmr.msra.gmra.mxu3 %v2648_v41  ;;  %v1139_v47 = vld [vmem:[#allocation6 + $0x7e0] sm:$0xff]  ;;  %v967_v36 = vld [vmem:[#allocation6 + $0x618] sm:$0xff] }
  0xa8   : > { %1143 = vmatpush.msrb.mxu3 %v1142_v0  ;;  %833 = vmatpush.msra.mxu1 %v802_v38  ;;  %v976_v41 = vld [vmem:[#allocation6 + $0x660] sm:$0xff]  ;;  %v1075_v38 = vld [vmem:[#allocation6 + $0x718] sm:$0xff] }
  0xa9   : > { %980 = vmatpush.msrb.mxu0 %v979_v39  ;;  %1088 = vmatpush.msrb.mxu2 %v1087_v40  ;;  %v1022_v0 = vld [vmem:[#allocation6 + $0x6a0] sm:$0xff]  ;;  %v1129_v40 = vld [vmem:[#allocation6 + $0x790] sm:$0xff] }
  0xaa   : > { %834 = vmatmul.f32.vlgmr.msra.gmra.mxu1 %v2675_v37  ;;  %1144 = vmatpush.msrb.mxu3 %v1141_v43  ;;  %v975_v37 = vld [vmem:[#allocation6 + $0x658] sm:$0xff]  ;;  %v2722_v39 = vld [vmem:[#allocation2 + $0x44] sm:$0xff]  ;;  %v966_v43 = vld [vmem:[#allocation6 + $0x610] sm:$0xff] }
  0xab   : > { %981 = vmatpush.msrb.mxu0 %v978_v44  ;;  %1034 = vmatpush.msrb.mxu1 %v1033_v45  ;;  %v1021_v44 = vld [vmem:[#allocation6 + $0x698] sm:$0xff]  ;;  %v1074_v45 = vld [vmem:[#allocation6 + $0x710] sm:$0xff] }
  0xac   : > { %1089 = vmatpush.msrb.mxu2 %v1086_v46  ;;  %1145 = vmatpush.msrb.mxu3 %v1140_v48  ;;  %v1128_v46 = vld [vmem:[#allocation6 + $0x788] sm:$0xff] }
  0xad   : > { %982 = vmatpush.msrb.mxu0 %v977_v49  ;;  %1035 = vmatpush.msrb.mxu1 %v1032_v24  ;;  %v965_v48 = vld [vmem:[#allocation6 + $0x608] sm:$0xff]  ;;  %v1020_v49 = vld [vmem:[#allocation6 + $0x690] sm:$0xff] }
  0xae   : > { %1090 = vmatpush.msrb.mxu2 %v1085_v50  ;;  %1146 = vmatpush.msrb.mxu3 %v1139_v47  ;;  %v1073_v24 = vld [vmem:[#allocation6 + $0x708] sm:$0xff]  ;;  %v1127_v50 = vld [vmem:[#allocation6 + $0x780] sm:$0xff] }
  0xaf   : > { %983 = vmatpush.msrb.mxu0 %v976_v41  ;;  %1036 = vmatpush.msrb.mxu1 %v1031_v51  ;;  %v964_v47 = vld [vmem:[#allocation6 + $0x600] sm:$0xff]  ;;  %v1019_v41 = vld [vmem:[#allocation6 + $0x688] sm:$0xff] }
  0xb0   : > { %1091 = vmatpush.msrb.mxu2 %v1084_v52  ;;  %783 = vmatmul.f32.gmra.mxu0 %v2650_v42  ;;  %v1072_v51 = vld [vmem:[#allocation6 + $0x700] sm:$0xff]  ;;  %v1358_v52 = vld [vmem:[#allocation6 + $0x9f8] sm:$0xff] }
  0xb1   : > { %891 = vmatmul.f32.gmra.mxu2 %v2668_v5  ;;  %945 = vmatmul.f32.gmra.mxu3 %v2658_v60  ;;  %v972_v60 = vld [vmem:[#allocation6 + $0x640] sm:$0xff] }
  0xb2   : > { %1147 = vmatpush.msrb.mxu3 %v1138_v53  ;;  %984 = vmatpush.msrb.mxu0 %v975_v37  ;;  %v1018_v53 = vld [vmem:[#allocation6 + $0x680] sm:$0xff]  ;;  %v1196_v37 = vld [vmem:[#allocation6 + $0x878] sm:$0xff] }
  0xb3   : > { %1037 = vmatpush.msrb.mxu1 %v1030_v54  ;;  %1092 = vmatpush.msrb.mxu2 %v1083_v55  ;;  %v1304_v54 = vld [vmem:[#allocation6 + $0x978] sm:$0xff]  ;;  %v1357_v55 = vld [vmem:[#allocation6 + $0x9f0] sm:$0xff] }
  0xb4   : > { %837 = vmatmul.f32.gmra.mxu1 %v2681_v56  ;;  %1148 = vmatpush.msrb.mxu3 %v1137_v57  ;;  %v1195_v57 = vld [vmem:[#allocation6 + $0x870] sm:$0xff] }
  0xb5   : > { %985 = vmatpush.msrb.mxu0 %v974_v58  ;;  %1038 = vmatpush.msrb.mxu1 %v1029_v59  ;;  %v1250_v58 = vld [vmem:[#allocation6 + $0x8f8] sm:$0xff]  ;;  %v1303_v59 = vld [vmem:[#allocation6 + $0x970] sm:$0xff] }
  0xb6   : > { %1093 = vmatpush.msrb.mxu2 %v1082_v61  ;;  %1149 = vmatpush.msrb.mxu3 %v1136_v63  ;;  %v1356_v61 = vld [vmem:[#allocation6 + $0x9e8] sm:$0xff] }
  0xb7   : > { %986 = vmatpush.msrb.mxu0 %v973_v1  ;;  %1039 = vmatpush.msrb.mxu1 %v1028_v2  ;;  %v1194_v63 = vld [vmem:[#allocation6 + $0x868] sm:$0xff] }
  0xb8   : > { %1094 = vmatpush.msrb.mxu2 %v1081_v3  ;;  %1150 = vmatpush.msrb.mxu3 %v1135_v6  ;;  %v1302_v1 = vld [vmem:[#allocation6 + $0x968] sm:$0xff]  ;;  %v1301_v6 = vld [vmem:[#allocation6 + $0x960] sm:$0xff] }
  0xb9   : > { %987 = vmatpush.msrb.mxu0 %v972_v60  ;;  %1040 = vmatpush.msrb.mxu1 %v1027_v7  ;;  %v1248_v3 = vld [vmem:[#allocation6 + $0x8e8] sm:$0xff]  ;;  %v1192_v60 = vld [vmem:[#allocation6 + $0x858] sm:$0xff] }
  0xba   : > { %1095 = vmatpush.msrb.mxu2 %v1080_v8  ;;  %786 = vmatmul.f32.gmra.mxu0 %v2660_v62  ;;  %v1247_v8 = vld [vmem:[#allocation6 + $0x8e0] sm:$0xff] }
  0xbb   : > { %894 = vmatmul.f32.gmra.mxu2 %v2697_v26  ;;  %948 = vmatmul.f32.gmra.mxu3 %v2689_v16 }
  0xbc   : > { %1151 = vmatpush.msrb.mxu3 %v1134_v10  ;;  %988 = vmatpush.msrb.mxu0 %v971_v11  ;;  %v1300_v10 = vld [vmem:[#allocation6 + $0x958] sm:$0xff]  ;;  %v1353_v11 = vld [vmem:[#allocation6 + $0x9d0] sm:$0xff] }
  0xbd   : > { %1041 = vmatpush.msrb.mxu1 %v1026_v12  ;;  %1096 = vmatpush.msrb.mxu2 %v1079_v13  ;;  %v1191_v12 = vld [vmem:[#allocation6 + $0x850] sm:$0xff]  ;;  %v1246_v13 = vld [vmem:[#allocation6 + $0x8d8] sm:$0xff] }
  0xbe   : > { %840 = vmatmul.f32.gmra.mxu1 %v2687_v15  ;;  %1152 = vmatpush.msrb.mxu3 %v1133_v14 }
  0xbf   : > { %989 = vmatpush.msrb.mxu0 %v970_v17  ;;  %1042 = vmatpush.msrb.mxu1 %v1025_v18  ;;  %v1299_v18 = vld [vmem:[#allocation6 + $0x950] sm:$0xff] }
  0xc0   : > { %1097 = vmatpush.msrb.mxu2 %v1078_v19  ;;  %1153 = vmatpush.msrb.mxu3 %v1132_v20  ;;  %v1352_v19 = vld [vmem:[#allocation6 + $0x9c8] sm:$0xff]  ;;  %v1245_v20 = vld [vmem:[#allocation6 + $0x8d0] sm:$0xff] }
  0xc1   : > { %990 = vmatpush.msrb.mxu0 %v969_v27  ;;  %1043 = vmatpush.msrb.mxu1 %v1024_v28  ;;  %v1351_v27 = vld [vmem:[#allocation6 + $0x9c0] sm:$0xff] }
  0xc2   : > { %1098 = vmatpush.msrb.mxu2 %v1077_v29  ;;  %1154 = vmatpush.msrb.mxu3 %v1131_v30  ;;  %v1189_v29 = vld [vmem:[#allocation6 + $0x840] sm:$0xff]  ;;  %v1244_v30 = vld [vmem:[#allocation6 + $0x8c8] sm:$0xff] }
  0xc3   : > { %991 = vmatpush.msrb.mxu0 %v968_v31  ;;  %1044 = vmatpush.msrb.mxu1 %v1023_v32  ;;  %v1297_v31 = vld [vmem:[#allocation6 + $0x940] sm:$0xff]  ;;  %v1188_v32 = vld [vmem:[#allocation6 + $0x838] sm:$0xff] }
  0xc4   : > { %1099 = vmatpush.msrb.mxu2 %v1076_v33  ;;  %789 = vmatmul.f32.gmra.mxu0 %v2713_v34 }
  0xc5   : > { %897 = vmatmul.f32.gmra.mxu2 %v2715_v21  ;;  %951 = vmatmul.f32.gmra.mxu3 %v2717_v23 }
  0xc6   : > { %1155 = vmatpush.msrb.mxu3 %v1130_v35  ;;  %992 = vmatpush.msrb.mxu0 %v967_v36  ;;  %v1243_v35 = vld [vmem:[#allocation6 + $0x8c0] sm:$0xff]  ;;  %v1296_v36 = vld [vmem:[#allocation6 + $0x938] sm:$0xff] }
  0xc7   : > { %1045 = vmatpush.msrb.mxu1 %v1022_v0  ;;  %1100 = vmatpush.msrb.mxu2 %v1075_v38  ;;  %v1349_v0 = vld [vmem:[#allocation6 + $0x9b0] sm:$0xff] }
  0xc8   : > { %843 = vmatmul.f32.gmra.mxu1 %v2722_v39  ;;  %1156 = vmatpush.msrb.mxu3 %v1129_v40  ;;  %v1187_v40 = vld [vmem:[#allocation6 + $0x830] sm:$0xff] }
  0xc9   : > { %993 = vmatpush.msrb.mxu0 %v966_v43  ;;  %1046 = vmatpush.msrb.mxu1 %v1021_v44  ;;  %v1242_v43 = vld [vmem:[#allocation6 + $0x8b8] sm:$0xff] }
  0xca   : > { %1101 = vmatpush.msrb.mxu2 %v1074_v45  ;;  %1157 = vmatpush.msrb.mxu3 %v1128_v46  ;;  %v1295_v46 = vld [vmem:[#allocation6 + $0x930] sm:$0xff] }
  0xcb   : > { %994 = vmatpush.msrb.mxu0 %v965_v48  ;;  %1047 = vmatpush.msrb.mxu1 %v1020_v49  ;;  %v1348_v48 = vld [vmem:[#allocation6 + $0x9a8] sm:$0xff] }
  0xcc   : > { %1102 = vmatpush.msrb.mxu2 %v1073_v24  ;;  %1158 = vmatpush.msrb.mxu3 %v1127_v50  ;;  %v1186_v49 = vld [vmem:[#allocation6 + $0x828] sm:$0xff]  ;;  %v1241_v24 = vld [vmem:[#allocation6 + $0x8b0] sm:$0xff] }
  0xcd   : > { %995 = vmatpush.msrb.mxu0 %v964_v47  ;;  %1048 = vmatpush.msrb.mxu1 %v1019_v41  ;;  %v1294_v50 = vld [vmem:[#allocation6 + $0x928] sm:$0xff]  ;;  %v1347_v47 = vld [vmem:[#allocation6 + $0x9a0] sm:$0xff] }
  0xce   : > { %1103 = vmatpush.msrb.mxu2 %v1072_v51  ;;  %996 = vmatmul.f32.vlgmr.msrb.gmra.mxu0 %v2630_v9  ;;  %v1249_v9 = vld [vmem:[#allocation6 + $0x8f0] sm:$0xff]  ;;  %v1185_v51 = vld [vmem:[#allocation6 + $0x820] sm:$0xff] }
  0xcf   : > { %1104 = vmatmul.f32.vlgmr.msrb.gmra.mxu2 %v2681_v56  ;;  %1159 = vmatmul.f32.vlgmr.msrb.gmra.mxu3 %v2668_v5  ;;  %v1355_v56 = vld [vmem:[#allocation6 + $0x9e0] sm:$0xff] }
  0xd0   : > { %1359 = vmatpush.msra.mxu3 %v1358_v52  ;;  %1049 = vmatpush.msrb.mxu1 %v1018_v53  ;;  %v1193_v5 = vld [vmem:[#allocation6 + $0x860] sm:$0xff]  ;;  %v1240_v52 = vld [vmem:[#allocation6 + $0x8a8] sm:$0xff] }
  0xd1   : > { %1197 = vmatpush.msra.mxu0 %v1196_v37  ;;  %1305 = vmatpush.msra.mxu2 %v1304_v54  ;;  %v1293_v53 = vld [vmem:[#allocation6 + $0x920] sm:$0xff]  ;;  %v2749_v37 = vld [vmem:[#allocation2 + $0x54] sm:$0xff] }
  0xd2   : > { %1050 = vmatmul.f32.vlgmr.msrb.gmra.mxu1 %v2650_v42  ;;  %1360 = vmatpush.msra.mxu3 %v1357_v55  ;;  %v1354_v42 = vld [vmem:[#allocation6 + $0x9d8] sm:$0xff] }
  0xd3   : > { %1198 = vmatpush.msra.mxu0 %v1195_v57  ;;  %1251 = vmatpush.msra.mxu1 %v1250_v58  ;;  %v2729_v2 = vpop.f32.mrf.mxu0  ;;  %v1346_v54 = vld [vmem:[#allocation6 + $0x998] sm:$0xff]  ;;  %v1239_v58 = vld [vmem:[#allocation6 + $0x8a0] sm:$0xff] }
  0xd4   : > { %1306 = vmatpush.msra.mxu2 %v1303_v59  ;;  %1361 = vmatpush.msra.mxu3 %v1356_v61  ;;  %v1184_v55 = vld [vmem:[#allocation6 + $0x818] sm:$0xff] }
  0xd5   : > { %1199 = vmatpush.msra.mxu0 %v1194_v63  ;;  %1252 = vmatpush.msra.mxu1 %v1249_v9  ;;  %v1292_v59 = vld [vmem:[#allocation6 + $0x918] sm:$0xff]  ;;  %v2753_v63 = vld [vmem:[#allocation2] sm:$0xff] }
  0xd6   : > { %1307 = vmatpush.msra.mxu2 %v1302_v1  ;;  %1362 = vmatpush.msra.mxu3 %v1355_v56  ;;  %v2756_v9 = vld [vmem:[#allocation2 + $0x53] sm:$0xff] }
  0xd7   : > { %1200 = vmatpush.msra.mxu0 %v1193_v5  ;;  %1253 = vmatpush.msra.mxu1 %v1248_v3  ;;  %v2731_v7 = vpop.f32.mrf.mxu1  ;;  %v1345_v1 = vld [vmem:[#allocation6 + $0x990] sm:$0xff]  ;;  %v1238_v5 = vld [vmem:[#allocation6 + $0x898] sm:$0xff] }
  0xd8   : > { %1308 = vmatpush.msra.mxu2 %v1301_v6  ;;  %999 = vmatmul.f32.gmra.mxu0 %v2637_v22  ;;  %v1190_v22 = vld [vmem:[#allocation6 + $0x848] sm:$0xff]  ;;  %v1183_v56 = vld [vmem:[#allocation6 + $0x810] sm:$0xff] }
  0xd9   : > { %1107 = vmatmul.f32.gmra.mxu2 %v2687_v15  ;;  %1162 = vmatmul.f32.gmra.mxu3 %v2697_v26  ;;  %v1298_v26 = vld [vmem:[#allocation6 + $0x948] sm:$0xff] }
  0xda   : > { %1363 = vmatpush.msra.mxu3 %v1354_v42  ;;  %1201 = vmatpush.msra.mxu0 %v1192_v60  ;;  %v2736_v14 = vpop.f32.mrf.mxu2  ;;  %v2738_v17 = vpop.f32.mrf.mxu3  ;;  %v1291_v42 = vld [vmem:[#allocation6 + $0x910] sm:$0xff]  ;;  %v1344_v60 = vld [vmem:[#allocation6 + $0x988] sm:$0xff] }
  0xdb   : > { %1254 = vmatpush.msra.mxu1 %v1247_v8  ;;  %1309 = vmatpush.msra.mxu2 %v1300_v10  ;;  %v1182_v10 = vld [vmem:[#allocation6 + $0x808] sm:$0xff] }
  0xdc   : > { %1053 = vmatmul.f32.gmra.mxu1 %v2660_v62  ;;  %1364 = vmatpush.msra.mxu3 %v1353_v11  ;;  %v1350_v62 = vld [vmem:[#allocation6 + $0x9b8] sm:$0xff]  ;;  %v1237_v11 = vld [vmem:[#allocation6 + $0x890] sm:$0xff] }
  0xdd   : > { %1202 = vmatpush.msra.mxu0 %v1191_v12  ;;  %1255 = vmatpush.msra.mxu1 %v1246_v13  ;;  %v380_v28 = vpop.f32.mrf.mxu0  ;;  %v1290_v12 = vld [vmem:[#allocation6 + $0x908] sm:$0xff]  ;;  %v1343_v13 = vld [vmem:[#allocation6 + $0x980] sm:$0xff] }
  0xde   : > { %1310 = vmatpush.msra.mxu2 %v1299_v18  ;;  %1365 = vmatpush.msra.mxu3 %v1352_v19 }
  0xdf   : > { %1203 = vmatpush.msra.mxu0 %v1190_v22  ;;  %1256 = vmatpush.msra.mxu1 %v1245_v20  ;;  %v1181_v22 = vld [vmem:[#allocation6 + $0x800] sm:$0xff]  ;;  %v1236_v20 = vld [vmem:[#allocation6 + $0x888] sm:$0xff] }
  0xe0   : > { %1311 = vmatpush.msra.mxu2 %v1298_v26  ;;  %1366 = vmatpush.msra.mxu3 %v1351_v27  ;;  %v1289_v26 = vld [vmem:[#allocation6 + $0x900] sm:$0xff]  ;;  %v1176_v27 = vld [vmem:[#allocation2 + $0x31] sm:$0xff] }
  0xe1   : > { %1204 = vmatpush.msra.mxu0 %v1189_v29  ;;  %1257 = vmatpush.msra.mxu1 %v1244_v30  ;;  %v409_v33 = vpop.f32.mrf.mxu1  ;;  %v1284_v29 = vld [vmem:[#allocation2 + $0x33] sm:$0xff] }
  0xe2   : > { %1312 = vmatpush.msra.mxu2 %v1297_v31  ;;  %1002 = vmatmul.f32.gmra.mxu0 %v2664_v4  ;;  %v410_v38 = vadd.f32 %v409_v33, %v380_v28  ;;  %v407_v28 = vadd.f32 %v2731_v7, %v2729_v2  ;;  %v1575_v30 = vld [vmem:[#allocation6 + $0xbf8] sm:$0xff]  ;;  %v1235_v31 = vld [vmem:[#allocation6 + $0x880] sm:$0xff]  ;;  %v1412_v2 = vld [vmem:[#allocation6 + $0xa70] sm:$0xff] }
  0xe3   : > { %1110 = vmatmul.f32.gmra.mxu2 %v2722_v39  ;;  %1165 = vmatmul.f32.gmra.mxu3 %v2715_v21  ;;  %v1521_v33 = vld [vmem:[#allocation6 + $0xb78] sm:$0xff] }
  0xe4   : > { %1367 = vmatpush.msra.mxu3 %v1350_v62  ;;  %1205 = vmatpush.msra.mxu0 %v1188_v32  ;;  %v459_v44 = vpop.f32.mrf.mxu2  ;;  %v2744_v45 = vpop.f32.mrf.mxu3  ;;  %v1413_v32 = vld [vmem:[#allocation6 + $0xa78] sm:$0xff] }
  0xe5   : > { %1258 = vmatpush.msra.mxu1 %v1243_v35  ;;  %1313 = vmatpush.msra.mxu2 %v1296_v36  ;;  %v2746_v4 = vadd.f32 %v459_v44, %v410_v38  ;;  %v468_v35 = vadd.f32 %v2736_v14, %v407_v28  ;;  %v1574_v38 = vld [vmem:[#allocation6 + $0xbf0] sm:$0xff]  ;;  %v1467_v7 = vld [vmem:[#allocation6 + $0xaf8] sm:$0xff] }
  0xe6   : > { %1056 = vmatmul.f32.gmra.mxu1 %v2713_v34  ;;  %1368 = vmatpush.msra.mxu3 %v1349_v0  ;;  %v1230_v0 = vld [vmem:[#allocation2 + $0x32] sm:$0xff] }
  0xe7   : > { %1206 = vmatpush.msra.mxu0 %v1187_v40  ;;  %1259 = vmatpush.msra.mxu1 %v1242_v43  ;;  %v383_v41 = vpop.f32.mrf.mxu0  ;;  %v1520_v44 = vld [vmem:[#allocation6 + $0xb70] sm:$0xff]  ;;  %v522_v14 = vadd.f32 %v2738_v17, %v468_v35  ;;  %v1571_v17 = vld [vmem:[#allocation6 + $0xbd8] sm:$0xff] }
  0xe8   : > { %1314 = vmatpush.msra.mxu2 %v1295_v46  ;;  %1369 = vmatpush.msra.mxu3 %v1348_v48  ;;  %v1573_v46 = vld [vmem:[#allocation6 + $0xbe8] sm:$0xff]  ;;  %v1404_v35 = vld [vmem:[#allocation6 + $0xa30] sm:$0xff] }
  0xe9   : > { %1207 = vmatpush.msra.mxu0 %v1186_v49  ;;  %1260 = vmatpush.msra.mxu1 %v1241_v24  ;;  %v1411_v49 = vld [vmem:[#allocation6 + $0xa68] sm:$0xff]  ;;  %v1466_v24 = vld [vmem:[#allocation6 + $0xaf0] sm:$0xff] }
  0xea   : > { %1315 = vmatpush.msra.mxu2 %v1294_v50  ;;  %1370 = vmatpush.msra.mxu3 %v1347_v47  ;;  %v1572_v50 = vld [vmem:[#allocation6 + $0xbe0] sm:$0xff] }
  0xeb   : > { %1208 = vmatpush.msra.mxu0 %v1185_v51  ;;  %1261 = vmatpush.msra.mxu1 %v1240_v52  ;;  %v412_v57 = vpop.f32.mrf.mxu1  ;;  %v1410_v51 = vld [vmem:[#allocation6 + $0xa60] sm:$0xff]  ;;  %v1465_v52 = vld [vmem:[#allocation6 + $0xae8] sm:$0xff] }
  0xec   : > { %1316 = vmatpush.msra.mxu2 %v1293_v53  ;;  %1005 = vmatmul.f32.gmra.mxu0 %v2693_v25  ;;  %v413_v61 = vadd.f32 %v412_v57, %v383_v41 }
  0xed   : > { %1113 = vmatmul.f32.gmra.mxu2 %v2749_v37  ;;  %1168 = vmatmul.f32.gmra.mxu3 %v2753_v63 }
  0xee   : > { %1371 = vmatpush.msra.mxu3 %v1346_v54  ;;  %1209 = vmatpush.msra.mxu0 %v1184_v55  ;;  %v462_v3 = vpop.f32.mrf.mxu2  ;;  %v516_v6 = vpop.f32.mrf.mxu3  ;;  %v1518_v54 = vld [vmem:[#allocation6 + $0xb60] sm:$0xff]  ;;  %v1409_v55 = vld [vmem:[#allocation6 + $0xa58] sm:$0xff] }
  0xef   : > { %1262 = vmatpush.msra.mxu1 %v1239_v58  ;;  %1317 = vmatpush.msra.mxu2 %v1292_v59  ;;  %v470_v8 = vadd.f32 %v462_v3, %v413_v61  ;;  %v1464_v58 = vld [vmem:[#allocation6 + $0xae0] sm:$0xff]  ;;  %v1517_v59 = vld [vmem:[#allocation6 + $0xb58] sm:$0xff] }
  0xf0   : > { %1059 = vmatmul.f32.gmra.mxu1 %v2756_v9  ;;  %1372 = vmatpush.msra.mxu3 %v1345_v1  ;;  %v1570_v1 = vld [vmem:[#allocation6 + $0xbd0] sm:$0xff] }
  0xf1   : > { %1210 = vmatpush.msra.mxu0 %v1183_v56  ;;  %1263 = vmatpush.msra.mxu1 %v1238_v5  ;;  %v2759_v18 = vadd.f32 %v516_v6, %v470_v8  ;;  %v386_v19 = vpop.f32.mrf.mxu0  ;;  %v1408_v56 = vld [vmem:[#allocation6 + $0xa50] sm:$0xff]  ;;  %v1463_v5 = vld [vmem:[#allocation6 + $0xad8] sm:$0xff] }
  0xf2   : > { %1318 = vmatpush.msra.mxu2 %v1291_v42  ;;  %1373 = vmatpush.msra.mxu3 %v1344_v60  ;;  %v1516_v42 = vld [vmem:[#allocation6 + $0xb50] sm:$0xff]  ;;  %v1569_v60 = vld [vmem:[#allocation6 + $0xbc8] sm:$0xff] }
  0xf3   : > { %1211 = vmatpush.msra.mxu0 %v1182_v10  ;;  %1264 = vmatpush.msra.mxu1 %v1237_v11  ;;  %v523_v10 = vadd.f32 %v2744_v45, %v2746_v4  ;;  %v1407_v11 = vld [vmem:[#allocation6 + $0xa48] sm:$0xff]  ;;  %v1567_v45 = vld [vmem:[#allocation6 + $0xbb8] sm:$0xff] }
  0xf4   : > { %1319 = vmatpush.msra.mxu2 %v1290_v12  ;;  %1374 = vmatpush.msra.mxu3 %v1343_v13  ;;  %v1462_v12 = vld [vmem:[#allocation6 + $0xad0] sm:$0xff]  ;;  %v1515_v13 = vld [vmem:[#allocation6 + $0xb48] sm:$0xff]  ;;  %v1405_v4 = vld [vmem:[#allocation6 + $0xa38] sm:$0xff] }
  0xf5   : > { %1212 = vmatpush.msra.mxu0 %v1181_v22  ;;  %1265 = vmatpush.msra.mxu1 %v1236_v20  ;;  %v415_v62 = vpop.f32.mrf.mxu1 }
  0xf6   : > { %1320 = vmatpush.msra.mxu2 %v1289_v26  ;;  %1213 = vmatmul.f32.vlgmr.msra.gmra.mxu0 %v1176_v27  ;;  %v416_v36 = vadd.f32 %v415_v62, %v386_v19  ;;  %v1568_v19 = vld [vmem:[#allocation6 + $0xbc0] sm:$0xff]  ;;  %v1461_v27 = vld [vmem:[#allocation6 + $0xac8] sm:$0xff]  ;;  %v1513_v62 = vld [vmem:[#allocation6 + $0xb38] sm:$0xff] }
  0xf7   : > { %1321 = vmatmul.f32.vlgmr.msra.gmra.mxu2 %v1284_v29  ;;  %1375 = vmatmul.f32.vlgmr.msra.gmra.mxu3 %v2687_v15  ;;  %v1519_v15 = vld [vmem:[#allocation6 + $0xb68] sm:$0xff]  ;;  %v1406_v26 = vld [vmem:[#allocation6 + $0xa40] sm:$0xff] }
  0xf8   : > { %1576 = vmatpush.msrb.mxu3 %v1575_v30  ;;  %1266 = vmatpush.msra.mxu1 %v1235_v31  ;;  %v465_v40 = vpop.f32.mrf.mxu2  ;;  %v519_v43 = vpop.f32.mrf.mxu3  ;;  %v1514_v29 = vld [vmem:[#allocation6 + $0xb40] sm:$0xff] }
  0xf9   : > { %1414 = vmatpush.msrb.mxu0 %v1413_v32  ;;  %1522 = vmatpush.msrb.mxu2 %v1521_v33  ;;  %v471_v48 = vadd.f32 %v465_v40, %v416_v36  ;;  %v1460_v31 = vld [vmem:[#allocation6 + $0xac0] sm:$0xff]  ;;  %v1566_v33 = vld [vmem:[#allocation6 + $0xbb0] sm:$0xff]  ;;  %v1459_v36 = vld [vmem:[#allocation6 + $0xab8] sm:$0xff] }
  0xfa   : > { %1267 = vmatmul.f32.vlgmr.msra.gmra.mxu1 %v1230_v0  ;;  %1577 = vmatpush.msrb.mxu3 %v1574_v38 }
  0xfb   : > { %1415 = vmatpush.msrb.mxu0 %v1412_v2  ;;  %1468 = vmatpush.msrb.mxu1 %v1467_v7  ;;  %v2766_v47 = vadd.f32 %v519_v43, %v471_v48  ;;  %v564_v41 = vpop.f32.mrf.mxu0  ;;  %v1512_v2 = vld [vmem:[#allocation6 + $0xb30] sm:$0xff]  ;;  %v1565_v7 = vld [vmem:[#allocation6 + $0xba8] sm:$0xff]  ;;  %v1564_v48 = vld [vmem:[#allocation6 + $0xba0] sm:$0xff] }
  0xfc   : > { %1523 = vmatpush.msrb.mxu2 %v1520_v44  ;;  %1578 = vmatpush.msrb.mxu3 %v1573_v46  ;;  %v576_v53 = vadd.f32 %v564_v41, %v522_v14  ;;  %v1403_v43 = vld [vmem:[#allocation6 + $0xa28] sm:$0xff]  ;;  %v1458_v44 = vld [vmem:[#allocation6 + $0xab0] sm:$0xff]  ;;  %v1510_v41 = vld [vmem:[#allocation6 + $0xb20] sm:$0xff] }
  0xfd   : > { %1416 = vmatpush.msrb.mxu0 %v1411_v49  ;;  %1469 = vmatpush.msrb.mxu1 %v1466_v24  ;;  %v1511_v46 = vld [vmem:[#allocation6 + $0xb28] sm:$0xff]  ;;  %v1402_v24 = vld [vmem:[#allocation6 + $0xa20] sm:$0xff] }
  0xfe   : > { %1524 = vmatpush.msrb.mxu2 %v1519_v15  ;;  %1579 = vmatpush.msrb.mxu3 %v1572_v50  ;;  %v1457_v15 = vld [vmem:[#allocation6 + $0xaa8] sm:$0xff] }
  0xff   : > { %1417 = vmatpush.msrb.mxu0 %v1410_v51  ;;  %1470 = vmatpush.msrb.mxu1 %v1465_v52  ;;  %v619_v57 = vpop.f32.mrf.mxu1  ;;  %v2784_v51 = vld [vmem:[#allocation2 + $0x63] sm:$0xff] }
 0x100   : > { %1525 = vmatpush.msrb.mxu2 %v1518_v54  ;;  %1216 = vmatmul.f32.gmra.mxu0 %v2689_v16  ;;  %v631_v61 = vadd.f32 %v619_v57, %v576_v53  ;;  %v2239_v16 = vld [vmem:[#allocation2 + $0x42] sm:$0xff]  ;;  %v1563_v53 = vld [vmem:[#allocation6 + $0xb98] sm:$0xff] }
 0x101   : > { %1324 = vmatmul.f32.gmra.mxu2 %v2713_v34  ;;  %1378 = vmatmul.f32.gmra.mxu3 %v2722_v39  ;;  %v2786_v52 = vld [vmem:[#allocation2 + $0x64] sm:$0xff]  ;;  %v1401_v54 = vld [vmem:[#allocation6 + $0xa18] sm:$0xff] }
 0x102   : > { %1580 = vmatpush.msrb.mxu3 %v1571_v17  ;;  %1418 = vmatpush.msrb.mxu0 %v1409_v55  ;;  %v673_v3 = vpop.f32.mrf.mxu2  ;;  %v727_v6 = vpop.f32.mrf.mxu3  ;;  %v1509_v55 = vld [vmem:[#allocation6 + $0xb18] sm:$0xff] }
 0x103   : > { %1471 = vmatpush.msrb.mxu1 %v1464_v58  ;;  %1526 = vmatpush.msrb.mxu2 %v1517_v59  ;;  %v685_v8 = vadd.f32 %v673_v3, %v631_v61  ;;  %v2791_v58 = vld [vmem:[#allocation2 + $0x62] sm:$0xff]  ;;  %v1562_v59 = vld [vmem:[#allocation6 + $0xb90] sm:$0xff] }
 0x104   : > { %1270 = vmatmul.f32.gmra.mxu1 %v2239_v16  ;;  %1581 = vmatpush.msrb.mxu3 %v1570_v1  ;;  %v1400_v61 = vld [vmem:[#allocation6 + $0xa10] sm:$0xff]  ;;  %v1455_v1 = vld [vmem:[#allocation6 + $0xa98] sm:$0xff]  ;;  %v1507_v16 = vld [vmem:[#allocation6 + $0xb08] sm:$0xff] }
 0x105   : > { %1419 = vmatpush.msrb.mxu0 %v1408_v56  ;;  %1472 = vmatpush.msrb.mxu1 %v1463_v5  ;;  %v2773_v22 = vadd.f32 %v727_v6, %v685_v8  ;;  %v567_v20 = vpop.f32.mrf.mxu0  ;;  %v1508_v3 = vld [vmem:[#allocation6 + $0xb10] sm:$0xff]  ;;  %v1561_v6 = vld [vmem:[#allocation6 + $0xb88] sm:$0xff] }
 0x106   : > { %1527 = vmatpush.msrb.mxu2 %v1516_v42  ;;  %1582 = vmatpush.msrb.mxu3 %v1569_v60  ;;  %v577_v28 = vadd.f32 %v567_v20, %v523_v10  ;;  %v1399_v60 = vld [vmem:[#allocation6 + $0xa08] sm:$0xff]  ;;  %v1454_v8 = vld [vmem:[#allocation6 + $0xa90] sm:$0xff]  ;;  %v1560_v10 = vld [vmem:[#allocation6 + $0xb80] sm:$0xff] }
 0x107   : > { %1420 = vmatpush.msrb.mxu0 %v1407_v11  ;;  %1473 = vmatpush.msrb.mxu1 %v1462_v12 }
 0x108   : > { %1528 = vmatpush.msrb.mxu2 %v1515_v13  ;;  %1583 = vmatpush.msrb.mxu3 %v1568_v19  ;;  %v1398_v13 = vld [vmem:[#allocation6 + $0xa00] sm:$0xff]  ;;  %v1453_v19 = vld [vmem:[#allocation6 + $0xa88] sm:$0xff] }
 0x109   : > { %1421 = vmatpush.msrb.mxu0 %v1406_v26  ;;  %1474 = vmatpush.msrb.mxu1 %v1461_v27  ;;  %v622_v30 = vpop.f32.mrf.mxu1  ;;  %v1506_v26 = vld [vmem:[#allocation6 + $0xb00] sm:$0xff] }
 0x10a   : > { %1529 = vmatpush.msrb.mxu2 %v1514_v29  ;;  %1219 = vmatmul.f32.gmra.mxu0 %v2717_v23  ;;  %v632_v32 = vadd.f32 %v622_v30, %v577_v28  ;;  %v1393_v27 = vld [vmem:[#allocation2 + $0x40] sm:$0xff]  ;;  %v1629_v29 = vld [vmem:[#allocation6 + $0xc78] sm:$0xff] }
 0x10b   : > { %1327 = vmatmul.f32.gmra.mxu2 %v2756_v9  ;;  %1381 = vmatmul.f32.gmra.mxu3 %v2749_v37  ;;  %v1501_v28 = vld [vmem:[#allocation2 + $0x42] sm:$0xff] }
 0x10c   : > { %1584 = vmatpush.msrb.mxu3 %v1567_v45  ;;  %1422 = vmatpush.msrb.mxu0 %v1405_v4  ;;  %v676_v0 = vpop.f32.mrf.mxu2  ;;  %v730_v38 = vpop.f32.mrf.mxu3  ;;  %v1452_v45 = vld [vmem:[#allocation6 + $0xa80] sm:$0xff] }
 0x10d   : > { %1475 = vmatpush.msrb.mxu1 %v1460_v31  ;;  %1530 = vmatpush.msrb.mxu2 %v1513_v62  ;;  %v686_v40 = vadd.f32 %v676_v0, %v632_v32  ;;  %v1447_v30 = vld [vmem:[#allocation2 + $0x41] sm:$0xff] }
 0x10e   : > { %1273 = vmatmul.f32.gmra.mxu1 %v2693_v25  ;;  %1585 = vmatpush.msrb.mxu3 %v1566_v33  ;;  %v2782_v25 = vld [vmem:[#allocation2 + $0x61] sm:$0xff] }
 0x10f   : > { %1423 = vmatpush.msrb.mxu0 %v1404_v35  ;;  %1476 = vmatpush.msrb.mxu1 %v1459_v36  ;;  %v2779_v14 = vadd.f32 %v730_v38, %v686_v40  ;;  %v570_v49 = vpop.f32.mrf.mxu0  ;;  %v1627_v33 = vld [vmem:[#allocation6 + $0xc68] sm:$0xff]  ;;  %v1626_v36 = vld [vmem:[#allocation6 + $0xc60] sm:$0xff] }
 0x110   : > { %1531 = vmatpush.msrb.mxu2 %v1512_v2  ;;  %1586 = vmatpush.msrb.mxu3 %v1565_v7  ;;  %v578_v50 = vadd.f32 %v570_v49, %v2759_v18  ;;  %v1456_v18 = vld [vmem:[#allocation6 + $0xaa0] sm:$0xff]  ;;  %v2240_v7 = vld [vmem:[#allocation2 + $0x52] sm:$0xff] }
 0x111   : > { %1424 = vmatpush.msrb.mxu0 %v1403_v43  ;;  %1477 = vmatpush.msrb.mxu1 %v1458_v44  ;;  %v1624_v43 = vld [vmem:[#allocation6 + $0xc50] sm:$0xff] }
 0x112   : > { %1532 = vmatpush.msrb.mxu2 %v1511_v46  ;;  %1587 = vmatpush.msrb.mxu3 %v1564_v48  ;;  %v1623_v46 = vld [vmem:[#allocation6 + $0xc48] sm:$0xff] }
 0x113   : > { %1425 = vmatpush.msrb.mxu0 %v1402_v24  ;;  %1478 = vmatpush.msrb.mxu1 %v1457_v15  ;;  %v625_v17 = vpop.f32.mrf.mxu1 }
 0x114   : > { %1533 = vmatpush.msrb.mxu2 %v1510_v41  ;;  %1222 = vmatmul.f32.gmra.mxu0 %v2782_v25  ;;  %v633_v57 = vadd.f32 %v625_v17, %v578_v50  ;;  %v1618_v17 = vld [vmem:[#allocation6 + $0xc20] sm:$0xff] }
 0x115   : > { %1330 = vmatmul.f32.gmra.mxu2 %v2784_v51  ;;  %1384 = vmatmul.f32.gmra.mxu3 %v2786_v52 }
 0x116   : > { %1588 = vmatpush.msrb.mxu3 %v1563_v53  ;;  %1426 = vmatpush.msrb.mxu0 %v1401_v54  ;;  %v679_v56 = vpop.f32.mrf.mxu2  ;;  %v733_v5 = vpop.f32.mrf.mxu3  ;;  %v1619_v53 = vld [vmem:[#allocation6 + $0xc28] sm:$0xff] }
 0x117   : > { %1479 = vmatpush.msrb.mxu1 %v1456_v18  ;;  %1534 = vmatpush.msrb.mxu2 %v1509_v55  ;;  %v687_v42 = vadd.f32 %v679_v56, %v633_v57  ;;  %v1558_v57 = vld [vmem:[#allocation2 + $0x73] sm:$0xff] }
 0x118   : > { %1276 = vmatmul.f32.gmra.mxu1 %v2791_v58  ;;  %1589 = vmatpush.msrb.mxu3 %v1562_v59  ;;  %v1450_v59 = vld [vmem:[#allocation2 + $0x71] sm:$0xff] }
 0x119   : > { %1427 = vmatpush.msrb.mxu0 %v1400_v61  ;;  %1480 = vmatpush.msrb.mxu1 %v1455_v1  ;;  %v2794_v11 = vadd.f32 %v733_v5, %v687_v42  ;;  %v573_v12 = vpop.f32.mrf.mxu0  ;;  %v1616_v1 = vld [vmem:[#allocation6 + $0xc10] sm:$0xff]  ;;  %v1615_v5 = vld [vmem:[#allocation6 + $0xc08] sm:$0xff] }
 0x11a   : > { %1535 = vmatpush.msrb.mxu2 %v1508_v3  ;;  %1590 = vmatpush.msrb.mxu3 %v1561_v6  ;;  %v579_v20 = vadd.f32 %v573_v12, %v2766_v47  ;;  %v1628_v47 = vld [vmem:[#allocation6 + $0xc70] sm:$0xff]  ;;  %v1614_v6 = vld [vmem:[#allocation6 + $0xc00] sm:$0xff] }
 0x11b   : > { %1428 = vmatpush.msrb.mxu0 %v1399_v60  ;;  %1481 = vmatpush.msrb.mxu1 %v1454_v8  ;;  %v1612_v12 = vld [vmem:[#allocation2 + $0x74] sm:$0xff] }
 0x11c   : > { %1536 = vmatpush.msrb.mxu2 %v1507_v16  ;;  %1591 = vmatpush.msrb.mxu3 %v1560_v10 }
 0x11d   : > { %1429 = vmatpush.msrb.mxu0 %v1398_v13  ;;  %1482 = vmatpush.msrb.mxu1 %v1453_v19  ;;  %v628_v4 = vpop.f32.mrf.mxu1 }
 0x11e   : > { %1537 = vmatpush.msrb.mxu2 %v1506_v26  ;;  %1430 = vmatmul.f32.vlgmr.msrb.gmra.mxu0 %v1393_v27  ;;  %v634_v31 = vadd.f32 %v628_v4, %v579_v20 }
 0x11f   : > { %1538 = vmatmul.f32.vlgmr.msrb.gmra.mxu2 %v1501_v28  ;;  %1592 = vmatmul.f32.vlgmr.msrb.gmra.mxu3 %v2713_v34  ;;  %v1625_v34 = vld [vmem:[#allocation6 + $0xc58] sm:$0xff] }
 0x120   : > { %2121 = vmatpush.msra.mxu3 %v1629_v29  ;;  %1483 = vmatpush.msrb.mxu1 %v1452_v45  ;;  %v682_v62 = vpop.f32.mrf.mxu2  ;;  %v736_v32 = vpop.f32.mrf.mxu3 }
 0x121   : > { %1630 = vmatpush.msra.mxu0 %v1629_v29  ;;  %1484 = vmatmul.f32.vlgmr.msrb.gmra.mxu1 %v1447_v30  ;;  %v688_v35 = vadd.f32 %v682_v62, %v634_v31 }
 0x122   : > { %2122 = vmatpush.msra.mxu3 %v1628_v47 }
 0x123   : > { %1631 = vmatpush.msra.mxu0 %v1628_v47  ;;  %v2798_v0 = vadd.f32 %v736_v32, %v688_v35  ;;  %v781_v38 = vpop.f32.mrf.mxu0 }
 0x124   : > { %2123 = vmatpush.msra.mxu3 %v1627_v33  ;;  %v793_v2 = vadd.f32 %v781_v38, %v2773_v22 }
 0x125   : > { %1632 = vmatpush.msra.mxu0 %v1627_v33 }
 0x126   : > { %2124 = vmatpush.msra.mxu3 %v1626_v36  ;;  %1433 = vmatmul.f32.gmra.mxu0 %v2715_v21  ;;  %v1622_v21 = vld [vmem:[#allocation6 + $0xc40] sm:$0xff] }
 0x127   : > { %1633 = vmatpush.msra.mxu0 %v1626_v36  ;;  %1541 = vmatmul.f32.gmra.mxu2 %v2240_v7  ;;  %v835_v40 = vpop.f32.mrf.mxu1 }
 0x128   : > { %1595 = vmatmul.f32.gmra.mxu3 %v2756_v9  ;;  %v847_v44 = vadd.f32 %v835_v40, %v793_v2  ;;  %v1621_v9 = vld [vmem:[#allocation6 + $0xc38] sm:$0xff] }
 0x129   : > { %2125 = vmatpush.msra.mxu3 %v1625_v34  ;;  %1634 = vmatpush.msra.mxu0 %v1625_v34 }
 0x12a   : > { %1487 = vmatmul.f32.gmra.mxu1 %v2717_v23  ;;  %v889_v48 = vpop.f32.mrf.mxu2  ;;  %v943_v22 = vpop.f32.mrf.mxu3  ;;  %v1620_v23 = vld [vmem:[#allocation6 + $0xc30] sm:$0xff] }
 0x12b   : > { %2126 = vmatpush.msra.mxu3 %v1624_v43  ;;  %1635 = vmatpush.msra.mxu0 %v1624_v43  ;;  %v901_v49 = vadd.f32 %v889_v48, %v847_v44 }
 0x12d   : > { %2127 = vmatpush.msra.mxu3 %v1623_v46  ;;  %1636 = vmatpush.msra.mxu0 %v1623_v46  ;;  %v2804_v24 = vadd.f32 %v943_v22, %v901_v49  ;;  %v784_v15 = vpop.f32.mrf.mxu0 }
 0x12e   : > { %1436 = vmatmul.f32.gmra.mxu0 %v2753_v63  ;;  %v794_v50 = vadd.f32 %v784_v15, %v2779_v14  ;;  %v1504_v14 = vld [vmem:[#allocation2 + $0x72] sm:$0xff] }
 0x12f   : > { %2128 = vmatpush.msra.mxu3 %v1622_v21  ;;  %1637 = vmatpush.msra.mxu0 %v1622_v21 }
 0x130   : > { %1544 = vmatmul.f32.gmra.mxu2 %v2791_v58  ;;  %1598 = vmatmul.f32.gmra.mxu3 %v2784_v51  ;;  %v1617_v51 = vld [vmem:[#allocation6 + $0xc18] sm:$0xff] }
 0x131   : > { %2129 = vmatpush.msra.mxu3 %v1621_v9  ;;  %1638 = vmatpush.msra.mxu0 %v1621_v9  ;;  %v838_v41 = vpop.f32.mrf.mxu1 }
 0x132   : > { %1490 = vmatmul.f32.gmra.mxu1 %v2782_v25  ;;  %v848_v54 = vadd.f32 %v838_v41, %v794_v50 }
 0x133   : > { %2130 = vmatpush.msra.mxu3 %v1620_v23  ;;  %1639 = vmatpush.msra.mxu0 %v1620_v23 }
 0x134   : > { %v892_v18 = vpop.f32.mrf.mxu2  ;;  %v946_v55 = vpop.f32.mrf.mxu3 }
 0x135   : > { %2131 = vmatpush.msra.mxu3 %v1619_v53  ;;  %1640 = vmatpush.msra.mxu0 %v1619_v53  ;;  %v902_v58 = vadd.f32 %v892_v18, %v848_v54 }
 0x136   : > { %1439 = vmatmul.f32.gmra.mxu0 %v2753_v63 }
 0x137   : > { %2132 = vmatpush.msra.mxu3 %v1618_v17  ;;  %1641 = vmatpush.msra.mxu0 %v1618_v17  ;;  %v956_v61 = vadd.f32 %v946_v55, %v902_v58  ;;  %v787_v25 = vpop.f32.mrf.mxu0 }
 0x138   : > { %1547 = vmatmul.f32.gmra.mxu2 %v1504_v14  ;;  %1601 = vmatmul.f32.gmra.mxu3 %v1558_v57  ;;  %v795_v56 = vadd.f32 %v787_v25, %v2794_v11 }
 0x139   : > { %2133 = vmatpush.msra.mxu3 %v1617_v51  ;;  %1642 = vmatpush.msra.mxu0 %v1617_v51 }
 0x13a   : > { %1493 = vmatmul.f32.gmra.mxu1 %v1450_v59 }
 0x13b   : > { %2134 = vmatpush.msra.mxu3 %v1616_v1  ;;  %1643 = vmatpush.msra.mxu0 %v1616_v1  ;;  %v841_v3 = vpop.f32.mrf.mxu1  ;;  %v1708_v1 = vld [vmem:[%s2940_s2 + $0x78] sm:$0xff] }
 0x13c   : > { %v849_v63 = vadd.f32 %v841_v3, %v795_v56  ;;  %1709 = vmatpush.msra.mxu1 %v1708_v1 }
 0x13d   : > { %2135 = vmatpush.msra.mxu3 %v1615_v5  ;;  %1644 = vmatpush.msra.mxu0 %v1615_v5 }
 0x13e   : > { %v895_v42 = vpop.f32.mrf.mxu2  ;;  %v949_v60 = vpop.f32.mrf.mxu3 }
 0x13f   : > { %2136 = vmatpush.msra.mxu3 %v1614_v6  ;;  %1645 = vmatpush.msra.mxu0 %v1614_v6  ;;  %v903_v8 = vadd.f32 %v895_v42, %v849_v63  ;;  %v1707_v6 = vld [vmem:[%s2940_s2 + $0x70] sm:$0xff]  ;;  %v1706_v42 = vld [vmem:[%s2940_s2 + $0x68] sm:$0xff] }
 0x140   : > { %1646 = vmatmul.f32.vlgmr.msra.gmra.mxu0 %v2722_v39  ;;  %1652 = vmatmul.f32.vlgmr.msra.gmra.mxu3 %v2786_v52 }
 0x141   : > { %v957_v16 = vadd.f32 %v949_v60, %v903_v8  ;;  %v790_v10 = vpop.f32.mrf.mxu0  ;;  %1710 = vmatpush.msra.mxu1 %v1707_v6  ;;  %v1705_v8 = vld [vmem:[%s2940_s2 + $0x60] sm:$0xff] }
 0x142   : > { %v796_v11 = vadd.f32 %v790_v10, %v2798_v0 }
 0x143   : > { %1711 = vmatpush.msra.mxu1 %v1706_v42 }
 0x145   : > { %v844_v13 = vpop.f32.mrf.mxu1  ;;  %1712 = vmatpush.msra.mxu1 %v1705_v8 }
 0x146   : > { %v850_v19 = vadd.f32 %v844_v13, %v796_v11 }
 0x148   : > { %1649 = vmatmul.f32.gmra.mxu0 %v2749_v37  ;;  %1655 = vmatmul.f32.gmra.mxu3 %v1612_v12  ;;  %v898_v20 = vpop.f32.mrf.mxu2  ;;  %v952_v26 = vpop.f32.mrf.mxu3 }
 0x149   : > { %v904_v27 = vadd.f32 %v898_v20, %v850_v19  ;;  %v1703_v19 = vld [vmem:[%s2940_s2 + $0x50] sm:$0xff] }
 0x14b   : > { %v958_v28 = vadd.f32 %v952_v26, %v904_v27  ;;  %v997_v29 = vpop.f32.mrf.mxu0  ;;  %v1702_v27 = vld [vmem:[%s2940_s2 + $0x48] sm:$0xff] }
 0x14c   : > { %v1009_v45 = vadd.f32 %v997_v29, %v2804_v24 }
 0x14f   : > { %v1051_v39 = vpop.f32.mrf.mxu1 }
 0x150   : > { %v1063_v4 = vadd.f32 %v1051_v39, %v1009_v45 }
 0x152   : > { %v1105_v52 = vpop.f32.mrf.mxu2  ;;  %v1160_v30 = vpop.f32.mrf.mxu3 }
 0x153   : > { %v1117_v31 = vadd.f32 %v1105_v52, %v1063_v4  ;;  %v1701_v4 = vld [vmem:[%s2940_s2 + $0x40] sm:$0xff] }
 0x155   : > { %v1172_v47 = vadd.f32 %v1160_v30, %v1117_v31  ;;  %v1000_v62 = vpop.f32.mrf.mxu0  ;;  %v1700_v31 = vld [vmem:[%s2940_s2 + $0x38] sm:$0xff] }
 0x156   : > { %v1010_v32 = vadd.f32 %v1000_v62, %v956_v61 }
 0x159   : > { %v1054_v33 = vpop.f32.mrf.mxu1 }
 0x15a   : > { %v1064_v35 = vadd.f32 %v1054_v33, %v1010_v32 }
 0x15c   : > { %v1108_v36 = vpop.f32.mrf.mxu2  ;;  %v1163_v37 = vpop.f32.mrf.mxu3 }
 0x15d   : > { %v1118_v0 = vadd.f32 %v1108_v36, %v1064_v35  ;;  %v1699_v35 = vld [vmem:[%s2940_s2 + $0x30] sm:$0xff] }
 0x15f   : > { %v1173_v38 = vadd.f32 %v1163_v37, %v1118_v0  ;;  %v1003_v2 = vpop.f32.mrf.mxu0 }
 0x160   : > { %v1011_v34 = vadd.f32 %v1003_v2, %v957_v16  ;;  %v1704_v16 = vld [vmem:[%s2940_s2 + $0x58] sm:$0xff]  ;;  %v1698_v2 = vld [vmem:[%s2940_s2 + $0x28] sm:$0xff] }
 0x161   : > { %1713 = vmatpush.msra.mxu1 %v1704_v16 }
 0x163   : > { %v1057_v7 = vpop.f32.mrf.mxu1  ;;  %1714 = vmatpush.msra.mxu1 %v1703_v19 }
 0x164   : > { %v1065_v40 = vadd.f32 %v1057_v7, %v1011_v34 }
 0x165   : > { %1715 = vmatpush.msra.mxu1 %v1702_v27 }
 0x166   : > { %v1111_v43 = vpop.f32.mrf.mxu2  ;;  %v1166_v44 = vpop.f32.mrf.mxu3 }
 0x167   : > { %v1119_v46 = vadd.f32 %v1111_v43, %v1065_v40  ;;  %1716 = vmatpush.msra.mxu1 %v1701_v4  ;;  %v1697_v43 = vld [vmem:[%s2940_s2 + $0x20] sm:$0xff] }
 0x169   : > { %v1174_v48 = vadd.f32 %v1166_v44, %v1119_v46  ;;  %v1006_v22 = vpop.f32.mrf.mxu0  ;;  %1717 = vmatpush.msra.mxu1 %v1700_v31 }
 0x16a   : > { %v1012_v60 = vadd.f32 %v1006_v22, %v958_v28  ;;  %v1696_v22 = vld [vmem:[%s2940_s2 + $0x18] sm:$0xff] }
 0x16b   : > { %1718 = vmatpush.msra.mxu1 %v1699_v35 }
 0x16d   : > { %v1060_v49 = vpop.f32.mrf.mxu1  ;;  %1719 = vmatpush.msra.mxu1 %v1698_v2 }
 0x16e   : > { %v1066_v11 = vadd.f32 %v1060_v49, %v1012_v60 }
 0x16f   : > { %1720 = vmatpush.msra.mxu1 %v1697_v43 }
 0x170   : > { %v1169_v21 = vpop.f32.mrf.mxu3  ;;  %v1114_v24 = vpop.f32.mrf.mxu2 }
 0x171   : > { %v1120_v26 = vadd.f32 %v1114_v24, %v1066_v11  ;;  %1721 = vmatpush.msra.mxu1 %v1696_v22 }
 0x173   : > { %v1214_v15 = vpop.f32.mrf.mxu0  ;;  %v1175_v30 = vadd.f32 %v1169_v21, %v1120_v26  ;;  %v1695_v21 = vld [vmem:[%s2940_s2 + $0x10] sm:$0xff] }
 0x174   : > { %v1226_v10 = vadd.f32 %v1214_v15, %v1172_v47  ;;  %1722 = vmatpush.msra.mxu1 %v1695_v21 }
 0x177   : > { %v1268_v9 = vpop.f32.mrf.mxu1 }
 0x178   : > { %v1280_v28 = vadd.f32 %v1268_v9, %v1226_v10 }
 0x17a   : > { %v1376_v50 = vpop.f32.mrf.mxu3  ;;  %v1322_v23 = vpop.f32.mrf.mxu2 }
 0x17b   : > { %v1334_v52 = vadd.f32 %v1322_v23, %v1280_v28  ;;  %v1694_v23 = vld [vmem:[%s2940_s2 + $0x8] sm:$0xff] }
 0x17c   : > { %1723 = vmatpush.msra.mxu1 %v1694_v23 }
 0x17d   : > { %v1217_v41 = vpop.f32.mrf.mxu0  ;;  %v1388_v36 = vadd.f32 %v1376_v50, %v1334_v52 }
 0x17e   : > { %v1227_v29 = vadd.f32 %v1217_v41, %v1173_v38 }
 0x181   : > { %v1271_v53 = vpop.f32.mrf.mxu1 }
 0x182   : > { %v1281_v47 = vadd.f32 %v1271_v53, %v1227_v29 }
 0x184   : > { %v1379_v54 = vpop.f32.mrf.mxu3  ;;  %v1325_v17 = vpop.f32.mrf.mxu2 }
 0x185   : > { %v1335_v37 = vadd.f32 %v1325_v17, %v1281_v47  ;;  %v1693_v17 = vld [vmem:[%s2940_s2] sm:$0xff] }
 0x186   : > { %1724 = vmatpush.msra.mxu1 %v1693_v17 }
 0x187   : > { %v1220_v18 = vpop.f32.mrf.mxu0  ;;  %v1389_v44 = vadd.f32 %v1379_v54, %v1335_v37 }
 0x188   : > { %v1228_v45 = vadd.f32 %v1220_v18, %v1174_v48 }
 0x18b   : > { %v1274_v55 = vpop.f32.mrf.mxu1 }
 0x18c   : > { %v1282_v62 = vadd.f32 %v1274_v55, %v1228_v45 }
 0x18e   : > { %v1382_v14 = vpop.f32.mrf.mxu3  ;;  %v1328_v57 = vpop.f32.mrf.mxu2 }
 0x18f   : > { %v1336_v0 = vadd.f32 %v1328_v57, %v1282_v62 }
 0x191   : > { %v1223_v58 = vpop.f32.mrf.mxu0  ;;  %v1390_v46 = vadd.f32 %v1382_v14, %v1336_v0 }
 0x192   : > { %v1229_v32 = vadd.f32 %v1223_v58, %v1175_v30 }
 0x195   : > { %v1277_v51 = vpop.f32.mrf.mxu1 }
 0x196   : > { %v1283_v40 = vadd.f32 %v1277_v51, %v1229_v32 }
 0x198   : > { %v2818_v59 = vpop.f32.mrf.mxu3  ;;  %v1331_v61 = vpop.f32.mrf.mxu2 }
 0x199   : > { %v1337_v49 = vadd.f32 %v1331_v61, %v1283_v40 }
 0x19b   : > { %v1431_v25 = vpop.f32.mrf.mxu0  ;;  %v1391_v53 = vadd.f32 %v2818_v59, %v1337_v49 }
 0x19c   : > { %v1443_v34 = vadd.f32 %v1431_v25, %v1388_v36  ;;  %v1729_v25 = vld [vmem:[#allocation8] sm:$0xff] }
 0x19d   : > { %1749 = vmatpush.msra.mxu2 %v1729_v25 }
 0x19e   : > { %v1485_v56 = vpop.f32.mrf.mxu1 }
 0x19f   : > { %v1497_v24 = vadd.f32 %v1485_v56, %v1443_v34 }
 0x1a2   : > { %v2823_v5 = vpop.f32.mrf.mxu3  ;;  %v1539_v63 = vpop.f32.mrf.mxu2 }
 0x1a3   : > { %v1434_v3 = vpop.f32.mrf.mxu0  ;;  %v1551_v41 = vadd.f32 %v1539_v63, %v1497_v24 }
 0x1a4   : > { %v1444_v15 = vadd.f32 %v1434_v3, %v1389_v44  ;;  %v2219_v3 = vld [vmem:[#allocation9] ss:$0 sm:$0xff] }
 0x1a5   : > { %v1605_v57 = vadd.f32 %v2823_v5, %v1551_v41 }
 0x1a7   : > { %v1488_v20 = vpop.f32.mrf.mxu1 }
 0x1a8   : > { %v1498_v18 = vadd.f32 %v1488_v20, %v1444_v15 }
 0x1aa   : > { %v1542_v39 = vpop.f32.mrf.mxu2 }
 0x1ab   : > { %v2837_v12 = vpop.f32.mrf.mxu3  ;;  %v1437_v13 = vpop.f32.mrf.mxu0  ;;  %v1552_v58 = vadd.f32 %v1542_v39, %v1498_v18 }
 0x1ac   : > { %v1445_v9 = vadd.f32 %v1437_v13, %v1390_v46 }
 0x1ad   : > { %v1606_v63 = vadd.f32 %v2837_v12, %v1552_v58  ;;  %v2220_v58 = vld [vmem:[#allocation9 + $0x1] ss:$0 sm:$0xff] }
 0x1af   : > { %v1491_v7 = vpop.f32.mrf.mxu1 }
 0x1b0   : > { %v1499_v55 = vadd.f32 %v1491_v7, %v1445_v9 }
 0x1b3   : > { %v1599_v33 = vpop.f32.mrf.mxu3  ;;  %v1440_v38 = vpop.f32.mrf.mxu0 }
 0x1b4   : > { %v1545_v48 = vpop.f32.mrf.mxu2  ;;  %v1446_v14 = vadd.f32 %v1440_v38, %v1391_v53 }
 0x1b5   : > { %v1553_v51 = vadd.f32 %v1545_v48, %v1499_v55 }
 0x1b7   : > { %v1494_v61 = vpop.f32.mrf.mxu1  ;;  %v1607_v42 = vadd.f32 %v1599_v33, %v1553_v51 }
 0x1b8   : > { %v1500_v59 = vadd.f32 %v1494_v61, %v1446_v14 }
 0x1bb   : > { %v1602_v50 = vpop.f32.mrf.mxu3 }
 0x1bc   : > { %v1548_v1 = vpop.f32.mrf.mxu2 }
 0x1bd   : > { %v1647_v54 = vpop.f32.mrf.mxu0  ;;  %v1554_v60 = vadd.f32 %v1548_v1, %v1500_v59 }
 0x1be   : > { %v1659_v56 = vadd.f32 %v1647_v54, %v1605_v57 }
 0x1bf   : > { %v1608_v13 = vadd.f32 %v1602_v50, %v1554_v60  ;;  %v2225_v60 = vld [vmem:[#allocation9 + $0x4] ss:$0 sm:$0xff] }
 0x1c0   : > { %v1665_v16 = vadd.f32 %v2219_v3, %v1659_v56  ;;  %v2221_v56 = vld [vmem:[#allocation9 + $0x2] ss:$0 sm:$0xff] }
 0x1c2   : > { %v1678_v19 = vmul.f32 %v1665_v16, %v1665_v16 }
 0x1c3   : > { %v1653_v6 = vpop.f32.mrf.mxu3 }
 0x1c4   : > { %v1661_v10 = vadd.f32 %v1653_v6, %v1607_v42  ;;  %v2222_v42 = vld [vmem:[#allocation9 + $0x3] ss:$0 sm:$0xff] }
 0x1c5   : > { %v1650_v8 = vpop.f32.mrf.mxu0 }
 0x1c6   : > { %v1660_v11 = vadd.f32 %v1650_v8, %v1606_v63  ;;  %v1667_v20 = vadd.f32 %v2219_v3, %v1661_v10 }
 0x1c8   : > { %v1666_v5 = vadd.f32 %v2219_v3, %v1660_v11  ;;  %v1680_v39 = vmul.f32 %v1667_v20, %v1667_v20 }
 0x1ca   : > { %v1669_v26 = vadd.f32 %v1666_v5, %v1665_v16  ;;  %v1679_v27 = vmul.f32 %v1666_v5, %v1666_v5 }
 0x1cb   : > { %v1656_v28 = vpop.f32.mrf.mxu3 }
 0x1cc   : > { %v1682_v29 = vadd.f32 %v1679_v27, %v1678_v19  ;;  %v1662_v45 = vadd.f32 %v1656_v28, %v1608_v13  ;;  %v1670_v52 = vadd.f32 %v1669_v26, %v1667_v20  ;;  %v2226_v13 = vld [vmem:[#allocation9 + $0x8] ss:$0 sm:$0xff] }
 0x1ce   : > { %v1668_v4 = vadd.f32 %v2219_v3, %v1662_v45  ;;  %v1683_v31 = vadd.f32 %v1682_v29, %v1680_v39 }
 0x1d0   : > { %v1671_v30 = vadd.f32 %v1670_v52, %v1668_v4  ;;  %v1681_v12 = vmul.f32 %v1668_v4, %v1668_v4 }
 0x1d2   : > { %v1672_v47 = vrot.slane %v1671_v30, 4  ;;  %v1684_v62 = vadd.f32 %v1683_v31, %v1681_v12 }
 0x1d4   : > { %v1673_v32 = vadd.f32 %v1672_v47, %v1671_v30  ;;  %v1685_v33 = vrot.slane %v1684_v62, 4 }
 0x1d6   : > { %v1674_v35 = vrot.slane %v1673_v32, 2  ;;  %v1686_v36 = vadd.f32 %v1685_v33, %v1684_v62 }
 0x1d8   : > { %v1675_v37 = vadd.f32 %v1674_v35, %v1673_v32  ;;  %v1687_v0 = vrot.slane %v1686_v36, 2 }
 0x1da   : > { %v1676_v38 = vrot.slane %v1675_v37, 1  ;;  %v1688_v2 = vadd.f32 %v1687_v0, %v1686_v36 }
 0x1dc   : > { %v1689_v34 = vrot.slane %v1688_v2, 1  ;;  %v1677_v7 = vadd.f32 %v1676_v38, %v1675_v37 }
 0x1de   : > { %v1690_v40 = vadd.f32 %v1689_v34, %v1688_v2 }
 0x1e0   : > { %v1692_v43 = vsel %vm1691_vm0, %v1677_v7, %v1690_v40 }
 0x1e1   : > { %1725 = vmatmul.f32.vlgmr.msra.gmra.mxu1 %v1692_v43 }
 0x25e   : > { %v1726_v44 = vpop.f32.mrf.mxu1 }
 0x25f   : > { %2113 = vmatmul.msk.f32.vlgmr.msra.gmra.mxu2 %vm1730_vm1, %v1726_v44 }
 0x2e2   : > { %v1751_v46 = vpop.f32.mrf.mxu2 }
 0x2e3   : > { %v1754_v48 = vmul.f32 %v1751_v46, %v1751_v46  ;;  %v1759_v23 = vperm.slane %v1751_v46, 0 }
 0x2e5   : > { %v1756_v22 = vrot.slane %v1754_v48, 7  ;;  %v1760_v54 = vsub.f32 %v1665_v16, %v1759_v23  ;;  %v1761_v18 = vsub.f32 %v1666_v5, %v1759_v23  ;;  %v1762_v55 = vsub.f32 %v1667_v20, %v1759_v23  ;;  %v2223_v5 = vld [vmem:[#allocation9 + $0x7] ss:$0 sm:$0xff] }
 0x2e6   : > { %v1763_v14 = vsub.f32 %v1668_v4, %v1759_v23 }
 0x2e7   : > { %v1758_v49 = vsub.f32 %v1751_v46, %v1756_v22 }
 0x2e9   : > { %v1764_v21 = vadd.f32 1e-05, %v1758_v49 }
 0x2eb   : > { %2236 = vrsqrt.f32 %v1764_v21  ;;  %vm1771_vm3 = vweird.f32 %v1764_v21 }
 0x2f1   : > { %v2237_v24 = vpop.eup %2236 }
 0x2f2   : > { %v1766_v15 = vmul.f32 %v2237_v24, %v1764_v21  ;;  %vm1772_vm2 = vweird.f32 %v2237_v24 }
 0x2f3   : > { %vm1773_vm4 = vmor %vm1771_vm3, %vm1772_vm2 }
 0x2f4   : > { %v1767_v9 = vmul.f32 %v2237_v24, %v1766_v15 }
 0x2f6   : > { %v1768_v50 = vmul.f32 0.5, %v1767_v9 }
 0x2f8   : > { %v1769_v41 = vsub.f32 1.5, %v1768_v50  ;;  %v2228_v50 = vld [vmem:[#allocation9 + $0x5] ss:$0 sm:$0xff] }
 0x2fa   : > { %v1770_v53 = vmul.f32 %v2237_v24, %v1769_v41 }
 0x2fc   : > { %v1774_v17 = vsel %vm1773_vm4, %v2237_v24, %v1770_v53 }
 0x2fd   : > { %v1775_v57 = vperm.slane %v1774_v17, 1 }
 0x2ff   : > { %v1776_v51 = vmul.f32 %v1775_v57, %v1760_v54  ;;  %v1777_v61 = vmul.f32 %v1775_v57, %v1761_v18  ;;  %v1778_v25 = vmul.f32 %v1775_v57, %v1762_v55  ;;  %v1779_v1 = vmul.f32 %v1775_v57, %v1763_v14  ;;  %v2224_v57 = vld [vmem:[#allocation9 + $0xb] ss:$0 sm:$0xff] }
 0x301   : > { %v1782_v3 = vmul.f32 %v2220_v58, %v1776_v51  ;;  %v1783_v59 = vmul.f32 %v2220_v58, %v1777_v61  ;;  %v1784_v6 = vmul.f32 %v2220_v58, %v1778_v25  ;;  %v1785_v63 = vmul.f32 %v2220_v58, %v1779_v1  ;;  %v2227_v1 = vld [vmem:[#allocation9 + $0xc] ss:$0 sm:$0xff] }
 0x303   : > { %v2875_v8 = vadd.f32 %v2221_v56, %v1782_v3  ;;  %v2877_v16 = vadd.f32 %v2221_v56, %v1783_v59  ;;  %v2879_v10 = vadd.f32 %v2221_v56, %v1784_v6  ;;  %v2881_v11 = vadd.f32 %v2221_v56, %v1785_v63  ;;  %v2229_v56 = vld [vmem:[#allocation9 + $0x9] ss:$0 sm:$0xff] }
 0x305   : > { %v1794_v19 = vmul.f32 %v2222_v42, %v2875_v8  ;;  %v1795_v20 = vmul.f32 %v2222_v42, %v2877_v16  ;;  %v1796_v26 = vmul.f32 %v2222_v42, %v2879_v10  ;;  %v1797_v27 = vmul.f32 %v2222_v42, %v2881_v11 }
 0x306   : > { %v1832_v28 = vmul.f32 %v2225_v60, %v2875_v8  ;;  %v1833_v29 = vmul.f32 %v2225_v60, %v2877_v16  ;;  %v1834_v45 = vmul.f32 %v2225_v60, %v2879_v10  ;;  %v1835_v39 = vmul.f32 %v2225_v60, %v2881_v11 }
 0x307   : > { %v1800_v4 = vadd.f32 %v2223_v5, %v1794_v19  ;;  %v1801_v52 = vadd.f32 %v2223_v5, %v1795_v20  ;;  %v1802_v30 = vadd.f32 %v2223_v5, %v1796_v26  ;;  %v1803_v12 = vadd.f32 %v2223_v5, %v1797_v27 }
 0x308   : > { %v1838_v31 = vadd.f32 %v2226_v13, %v1832_v28  ;;  %v1839_v47 = vadd.f32 %v2226_v13, %v1833_v29  ;;  %v1840_v62 = vadd.f32 %v2226_v13, %v1834_v45  ;;  %v1841_v32 = vadd.f32 %v2226_v13, %v1835_v39 }
 0x309   : > { %v1804_v33 = vadd.f32 3.0, %v1800_v4  ;;  %v1805_v35 = vadd.f32 3.0, %v1801_v52  ;;  %v1806_v36 = vadd.f32 3.0, %v1802_v30  ;;  %v1807_v37 = vadd.f32 3.0, %v1803_v12 }
 0x30a   : > { %v1842_v0 = vadd.f32 3.0, %v1838_v31  ;;  %v1843_v38 = vadd.f32 3.0, %v1839_v47  ;;  %v1844_v2 = vadd.f32 3.0, %v1840_v62  ;;  %v1845_v34 = vadd.f32 3.0, %v1841_v32 }
 0x30b   : > { %v1808_v7 = vmax.f32 %v1804_v33, 0.0  ;;  %v1809_v40 = vmax.f32 %v1805_v35, 0.0  ;;  %v1810_v43 = vmax.f32 %v1806_v36, 0.0  ;;  %v1811_v44 = vmax.f32 %v1807_v37, 0.0  ;;  %v2232_v35 = vld [vmem:[#allocation9 + $0xa] ss:$0 sm:$0xff] }
 0x30c   : > { %v1846_v46 = vmax.f32 %v1842_v0, 0.0  ;;  %v1847_v48 = vmax.f32 %v1843_v38, 0.0  ;;  %v1848_v22 = vmax.f32 %v1844_v2, 0.0  ;;  %v1849_v49 = vmax.f32 %v1845_v34, 0.0 }
 0x30d   : > { %v1812_v21 = vmin.f32 %v1808_v7, 6.0  ;;  %v1813_v24 = vmin.f32 %v1809_v40, 6.0  ;;  %v1814_v15 = vmin.f32 %v1810_v43, 6.0  ;;  %v1815_v9 = vmin.f32 %v1811_v44, 6.0 }
 0x30e   : > { %v1850_v23 = vmin.f32 %v1846_v46, 6.0  ;;  %v1851_v41 = vmin.f32 %v1847_v48, 6.0  ;;  %v1852_v53 = vmin.f32 %v1848_v22, 6.0  ;;  %v1853_v54 = vmin.f32 %v1849_v49, 6.0 }
 0x30f   : > { %v1816_v17 = vmul.f32 %v1812_v21, %v1800_v4  ;;  %v1817_v18 = vmul.f32 %v1813_v24, %v1801_v52  ;;  %v1818_v55 = vmul.f32 %v1814_v15, %v1802_v30  ;;  %v1819_v14 = vmul.f32 %v1815_v9, %v1803_v12  ;;  %v2231_v4 = vld [vmem:[#allocation9 + $0x6] ss:$0 sm:$0xff] }
 0x310   : > { %v1854_v58 = vmul.f32 %v1850_v23, %v1838_v31  ;;  %v1855_v51 = vmul.f32 %v1851_v41, %v1839_v47  ;;  %v1856_v61 = vmul.f32 %v1852_v53, %v1840_v62  ;;  %v1857_v25 = vmul.f32 %v1853_v54, %v1841_v32 }
 0x311   : > { %v1820_v3 = vmul.f32 0.16666667, %v1816_v17  ;;  %v1821_v59 = vmul.f32 0.16666667, %v1817_v18  ;;  %v1822_v6 = vmul.f32 0.16666667, %v1818_v55  ;;  %v1874_v63 = vmul.f32 %v2228_v50, %v2875_v8 }
 0x312   : > { %v1823_v42 = vmul.f32 0.16666667, %v1819_v14  ;;  %v1858_v60 = vmul.f32 0.16666667, %v1854_v58  ;;  %v1859_v5 = vmul.f32 0.16666667, %v1855_v51  ;;  %v1875_v13 = vmul.f32 %v2228_v50, %v2877_v16 }
 0x313   : > { %v1826_v19 = vmul.f32 %v2224_v57, %v1820_v3  ;;  %v1827_v20 = vmul.f32 %v2224_v57, %v1821_v59  ;;  %v1828_v26 = vmul.f32 %v2224_v57, %v1822_v6  ;;  %v1860_v27 = vmul.f32 0.16666667, %v1856_v61  ;;  %v2230_v55 = vld [vmem:[#allocation9 + $0xd] ss:$0 sm:$0xff] }
 0x314   : > { %v1829_v28 = vmul.f32 %v2224_v57, %v1823_v42  ;;  %v1861_v29 = vmul.f32 0.16666667, %v1857_v25  ;;  %v1864_v45 = vmul.f32 %v2227_v1, %v1858_v60  ;;  %v1865_v39 = vmul.f32 %v2227_v1, %v1859_v5 }
 0x315   : > { %v1866_v52 = vmul.f32 %v2227_v1, %v1860_v27  ;;  %v1876_v30 = vmul.f32 %v2228_v50, %v2879_v10  ;;  %v1877_v12 = vmul.f32 %v2228_v50, %v2881_v11  ;;  %v1880_v31 = vadd.f32 %v2229_v56, %v1874_v63  ;;  %v2233_v27 = vld [vmem:[#allocation9 + $0xe] ss:$0 sm:$0xff] }
 0x316   : > { %v1867_v47 = vmul.f32 %v2227_v1, %v1861_v29  ;;  %v1868_v62 = vadd.f32 %v1864_v45, %v1826_v19  ;;  %v1869_v32 = vadd.f32 %v1865_v39, %v1827_v20  ;;  %v1881_v33 = vadd.f32 %v2229_v56, %v1875_v13 }
 0x317   : > { %v1870_v36 = vadd.f32 %v1866_v52, %v1828_v26  ;;  %v1882_v37 = vadd.f32 %v2229_v56, %v1876_v30  ;;  %v1883_v0 = vadd.f32 %v2229_v56, %v1877_v12  ;;  %v1884_v38 = vadd.f32 3.0, %v1880_v31 }
 0x318   : > { %v1871_v2 = vadd.f32 %v1867_v47, %v1829_v28  ;;  %v1885_v34 = vadd.f32 3.0, %v1881_v33  ;;  %v1916_v7 = vmul.f32 %v2231_v4, %v2875_v8  ;;  %v1917_v40 = vmul.f32 %v2231_v4, %v2877_v16 }
 0x319   : > { %v1886_v43 = vadd.f32 3.0, %v1882_v37  ;;  %v1887_v44 = vadd.f32 3.0, %v1883_v0  ;;  %v1888_v46 = vmax.f32 %v1884_v38, 0.0  ;;  %v1918_v48 = vmul.f32 %v2231_v4, %v2879_v10  ;;  %v2234_v38 = vld [vmem:[#allocation9 + $0xf] ss:$0 sm:$0xff] }
 0x31a   : > { %v1889_v22 = vmax.f32 %v1885_v34, 0.0  ;;  %v1919_v49 = vmul.f32 %v2231_v4, %v2881_v11  ;;  %v1922_v21 = vadd.f32 %v2232_v35, %v1916_v7  ;;  %v1923_v24 = vadd.f32 %v2232_v35, %v1917_v40 }
 0x31b   : > { %v1890_v15 = vmax.f32 %v1886_v43, 0.0  ;;  %v1891_v9 = vmax.f32 %v1887_v44, 0.0  ;;  %v1892_v50 = vmin.f32 %v1888_v46, 6.0  ;;  %v1924_v23 = vadd.f32 %v2232_v35, %v1918_v48  ;;  %v1962_v48 = vld [vmem:[%s2599_s7] sm:$0xff] }
 0x31c   : > { %v1893_v41 = vmin.f32 %v1889_v22, 6.0  ;;  %v1925_v53 = vadd.f32 %v2232_v35, %v1919_v49  ;;  %v1926_v54 = vadd.f32 3.0, %v1922_v21  ;;  %v1927_v8 = vadd.f32 3.0, %v1923_v24  ;;  %v1963_v22 = vld [vmem:[%s2599_s7 + $0x8] sm:$0xff] }
 0x31d   : > { %v1894_v17 = vmin.f32 %v1890_v15, 6.0  ;;  %v1895_v16 = vmin.f32 %v1891_v9, 6.0  ;;  %v1896_v18 = vmul.f32 %v1892_v50, %v1880_v31  ;;  %v1928_v14 = vadd.f32 3.0, %v1924_v23  ;;  %v1965_v9 = vld [vmem:[%s2599_s7 + $0x18] sm:$0xff] }
 0x31e   : > { %v1897_v57 = vmul.f32 %v1893_v41, %v1881_v33  ;;  %v1929_v10 = vadd.f32 3.0, %v1925_v53  ;;  %v1930_v58 = vmax.f32 %v1926_v54, 0.0  ;;  %v1931_v51 = vmax.f32 %v1927_v8, 0.0 }
 0x31f   : > { %v1898_v11 = vmul.f32 %v1894_v17, %v1882_v37  ;;  %v1899_v61 = vmul.f32 %v1895_v16, %v1883_v0  ;;  %v1900_v25 = vmul.f32 0.16666667, %v1896_v18  ;;  %v1932_v1 = vmax.f32 %v1928_v14, 0.0 }
 0x320   : > { %v1901_v56 = vmul.f32 0.16666667, %v1897_v57  ;;  %v1933_v3 = vmax.f32 %v1929_v10, 0.0  ;;  %v1934_v59 = vmin.f32 %v1930_v58, 6.0  ;;  %v1935_v6 = vmin.f32 %v1931_v51, 6.0 }
 0x321   : > { %v1902_v63 = vmul.f32 0.16666667, %v1898_v11  ;;  %v1903_v42 = vmul.f32 0.16666667, %v1899_v61  ;;  %v1906_v60 = vmul.f32 %v2230_v55, %v1900_v25  ;;  %v1936_v5 = vmin.f32 %v1932_v1, 6.0 }
 0x322   : > { %v1907_v13 = vmul.f32 %v2230_v55, %v1901_v56  ;;  %v1937_v19 = vmin.f32 %v1933_v3, 6.0  ;;  %v1938_v20 = vmul.f32 %v1934_v59, %v1922_v21  ;;  %v1939_v26 = vmul.f32 %v1935_v6, %v1923_v24  ;;  %v1964_v21 = vld [vmem:[%s2599_s7 + $0x10] sm:$0xff]  ;;  %s2375_s7 = sshra.s32 %s1996_s9, 4  ;;  %s2376_s7 = int_to_ptr.hbm [resolvable:$true] %s2375_s7 }
 0x323   : > { %v1908_v28 = vmul.f32 %v2230_v55, %v1902_v63  ;;  %v1909_v29 = vmul.f32 %v2230_v55, %v1903_v42  ;;  %v1910_v45 = vadd.f32 %v1906_v60, %v1868_v62  ;;  %v1940_v39 = vmul.f32 %v1936_v5, %v1924_v23  ;;  %s2377_s24 = scalar_lea.hbm %s2376_s7, 32  ;;  %p2382_p11 = scmp.lt.s32.totalorder %s2376_s7, %s2943_s5 }
 0x324   : > { %v1911_v4 = vadd.f32 %v1907_v13, %v1869_v32  ;;  %v1941_v52 = vmul.f32 %v1937_v19, %v1925_v53  ;;  %v1942_v30 = vmul.f32 0.16666667, %v1938_v20  ;;  %v1943_v12 = vmul.f32 0.16666667, %v1939_v26  ;;  %v2235_v32 = vld [vmem:[#allocation9 + $0x10] ss:$0 sm:$0xff]  ;;  %p2378_p1 = scmp.ne.s32.totalorder %s2376_s7, %s2377_s24  ;;  %p2383_p9 = scmp.lt.s32.totalorder %s2381_s12, %s2377_s24 }
 0x325   : > { %v1912_v31 = vadd.f32 %v1908_v28, %v1870_v36  ;;  %v1944_v47 = vmul.f32 0.16666667, %v1940_v39  ;;  %v1913_v33 = vadd.f32 %v1909_v29, %v1871_v2 }
 0x326   : > { %v1945_v35 = vmul.f32 0.16666667, %v1941_v52  ;;  %v1948_v37 = vmul.f32 %v2233_v27, %v1942_v30  ;;  %v1949_v0 = vmul.f32 %v2233_v27, %v1943_v12  ;;  %p2379_p4 = pnand %p2378_p1, %p2563_p3  ;;  %p2384_p2 = por %p2383_p9, %p2382_p11 }
 0x327   : > { %v1950_v34 = vmul.f32 %v2233_v27, %v1944_v47 }
 0x328   : > { %v1951_v7 = vmul.f32 %v2233_v27, %v1945_v35  ;;  %v1952_v62 = vadd.f32 %v1948_v37, %v1910_v45  ;;  %v1953_v40 = vadd.f32 %v1949_v0, %v1911_v4  ;;  %p2380_p8 = pneg %p2379_p4 }
 0x329   : > { %v1954_v43 = vadd.f32 %v1950_v34, %v1912_v31 }
 0x32a   : > { %v1955_v44 = vadd.f32 %v1951_v7, %v1913_v33  ;;  %v1958_v36 = vadd.f32 %v2234_v38, %v1952_v62  ;;  %v1959_v46 = vadd.f32 %v2234_v38, %v1953_v40  ;;  %p2385_p10 = pnand %p2384_p2, %p2380_p8 }
 0x32b   : > { %v1960_v2 = vadd.f32 %v2234_v38, %v1954_v43 }
 0x32c   : > { %v1961_v49 = vadd.f32 %v2234_v38, %v1955_v44  ;;  %v1968_v24 = vmul.f32 %v2235_v32, %v1958_v36  ;;  %v1969_v15 = vmul.f32 %v2235_v32, %v1959_v46 }
 0x32d   : > { %v1970_v50 = vmul.f32 %v2235_v32, %v1960_v2 }
 0x32e   : > { %v1971_v23 = vmul.f32 %v2235_v32, %v1961_v49  ;;  %v1972_v41 = vadd.f32 %v1968_v24, %v1962_v48  ;;  %v1973_v53 = vadd.f32 %v1969_v15, %v1963_v22 }
 0x32f   : > { %v1974_v54 = vadd.f32 %v1970_v50, %v1964_v21 }
 0x330   : > { %v1975_v8 = vadd.f32 %v1971_v23, %v1965_v9  ;;  %1976 = vst [vmem:[%s292_s22] sm:$0xff] %v1972_v41 }
 0x331   : > { %1977 = vst [vmem:[%s292_s22 + $0x8] sm:$0xff] %v1973_v53 }
 0x332   : > { %1978 = vst [vmem:[%s292_s22 + $0x10] sm:$0xff] %v1974_v54 }
 0x333   : > { %1979 = vst [vmem:[%s292_s22 + $0x18] sm:$0xff] %v1975_v8 }
 0x334   : > { %2388 = shalt.err (!%p2385_p10)
}
 0x335   : > { %s2443_s17 = smov 128   ;;  %s2444_s26 = smov 8  }
 0x336   : > { %2151 = dma.vmem_to_hbm [thread:$0]  (%p2563_p3), %s1994_s15, 512, %s1996_s9, %s1981_s30, %s2443_s17, %s2443_s17, %s2444_s26  }
 0x337 PF: > { %s2010_s28 = sand.u32 1, %s2423_s18   ;;  %p2952_p12 = scmp.ge.s32.totalorder %s2435_s21, 2 }
 0x338   : > { %s2011_s13 = scalar_lea.sflag [#allocation5], %s2010_s28 }
 0x339   : > { %p2168_p13 = pnand %p2952_p12, %p2510_p6 }
 0x33b   : > { %p2169_p0 = pneg %p2168_p13 }
 0x33d   : > { %2418 = dma.done.wait (%p2169_p0), %s2011_s13, 512  }
 0x33e   : > { %2420 = vsyncadd (%p2169_p0), %s2011_s13, 4294966784  ;;  %p20_p5 = scmp.ge.s32.totalorder %s2545_s27, 4   ;;  %s2953_s18 = smov %s2427_s19 }
 0x33f   : > { %s2954_s19 = smov %s2431_s20  ;;  %s2955_s20 = smov %s2559_s6 }
 0x340   : > { %s2956_s21 = smov %s2545_s27  ;;  %22 = sbr.rel (!%p20_p5) target bundleno = 7 (0x7), region = 126 }
 0x345   :  { %2017 = vsyncpa [#allocation4], 1 }
 0x346   :  { %2019 = vsyncpa [#allocation4 + $0x1], 1 }
 0x347   :  { %2020 = vsyncpa [#allocation7], 1 }
 0x348   :  { %2021 = vsyncpa [#allocation10], 1 }
 0x349   :  { %2022 = vsyncpa [#allocation5], 1 }
 0x34a   :  { %2024 = vsyncpa [#allocation5 + $0x1], 1 }

</bundles_post_ra>
